<compile_context>
chip_gen: v7x
topology: tpu7x:2x2x1
jax: 0.10.0
libtpu: 0.0.40
codegen_flags: <defaults>
</compile_context>

<pallas_src>
import functools

import jax
import jax.numpy as jnp
from jax.experimental import pallas as pl
from jax.experimental.pallas import tpu as pltpu


def _round_up(x, m):
    return ((x + m - 1) // m) * m


# ----------------------------------------------------------------------------
# Pallas kernel: fused forward pass for one batch tile (4 MXU pushes)
# ----------------------------------------------------------------------------
def low_level_net_kernel(
    state_ref,     # (TILE_B, state_dim)
    subgoal_ref,   # (TILE_B, subgoal_dim)
    w_e_ref,       # (state_dim+subgoal_dim, h+h//2)  block-diag [W_se 0; 0 W_ge]
    w_c_ref,       # (h+h//2, h)
    w_h1_ref,      # (h, 2h)                          [W_a1 | W_v1]
    w_h2_ref,      # (2h, n_actions+1)                block-diag [W_a2 0; 0 W_v2]
    bias_ref,      # (8, BIAS_W)                      packed biases
    out_ref,       # (TILE_B, n_actions+1)            [logits | value]
    xcat_ref,      # scratch (TILE_B, state_dim+subgoal_dim)
):
    f32 = jnp.float32
    sd = state_ref.shape[1]
    he = w_e_ref.shape[1]          # h + h//2
    h = w_c_ref.shape[1]
    hh = w_h1_ref.shape[1]         # 2h
    out_w = w_h2_ref.shape[1]      # n_actions + 1

    # Packed biases (static slices -> cheap views broadcast over the batch tile).
    b_e = bias_ref[0:1, :he]       # [b_se | b_ge]
    b_c = bias_ref[1:2, :h]
    b_h1 = bias_ref[2:3, :hh]      # [b_a1 | b_v1]
    b_h2 = bias_ref[3:4, :out_w]   # [b_a2 | b_v2]

    # Build [state | subgoal] once in VMEM (two masked lane-offset stores),
    # so the two encoder matmuls fuse into one block-diagonal matmul.
    xcat_ref[:, :sd] = state_ref[...]
    xcat_ref[:, sd:] = subgoal_ref[...]

    # embed == concat([state_features, subgoal_features])
    embed = jnp.maximum(
        jnp.dot(xcat_ref[...], w_e_ref[...], preferred_element_type=f32) + b_e,
        0.0)

    # features = ReLU(embed @ W_c + b_c)
    feat = jnp.maximum(
        jnp.dot(embed, w_c_ref[...], preferred_element_type=f32) + b_c,
        0.0)

    # Fused head hidden layers: [ah | vh] = ReLU(feat @ [W_a1 | W_v1] + [b_a1 | b_v1])
    head = jnp.maximum(
        jnp.dot(feat, w_h1_ref[...], preferred_element_type=f32) + b_h1,
        0.0)

    # Fused head output layers via block-diagonal weight:
    # cols [0, n_actions) = logits, col n_actions = value.
    out_ref[...] = (
        jnp.dot(head, w_h2_ref[...], preferred_element_type=f32) + b_h2
    ).astype(out_ref.dtype)


# ----------------------------------------------------------------------------
# Parameter construction (mirrors nn.init.orthogonal_(gain=1.0) + zeros biases)
# ----------------------------------------------------------------------------
def orthogonal_weight(key, out_dim, in_dim, gain=1.0):
    """Orthogonal init for a PyTorch-style (out, in) weight, returned as (in, out)."""
    rows, cols = out_dim, in_dim
    a = jax.random.normal(key, (max(rows, cols), min(rows, cols)), dtype=jnp.float32)
    q, r = jnp.linalg.qr(a)
    q = q * jnp.sign(jnp.diagonal(r))
    if rows < cols:
        q = q.T
    w = gain * q[:rows, :cols]            # (out, in)
    return jnp.asarray(w.T, jnp.float32)  # (in, out) so every layer is x @ W


def make_params(key, state_dim, subgoal_dim, n_actions, hidden_dim):
    h, h2 = hidden_dim, hidden_dim // 2
    ks = jax.random.split(key, 7)
    return {
        "w_se": orthogonal_weight(ks[0], h, state_dim),
        "b_se": jnp.zeros((1, h), jnp.float32),
        "w_ge": orthogonal_weight(ks[1], h2, subgoal_dim),
        "b_ge": jnp.zeros((1, h2), jnp.float32),
        "w_c": orthogonal_weight(ks[2], h, h + h2),      # (h+h2, h)
        "b_c": jnp.zeros((1, h), jnp.float32),
        "w_a1": orthogonal_weight(ks[3], h, h),
        "b_a1": jnp.zeros((1, h), jnp.float32),
        "w_a2": orthogonal_weight(ks[4], n_actions, h),  # (h, n_actions)
        "b_a2": jnp.zeros((1, n_actions), jnp.float32),
        "w_v1": orthogonal_weight(ks[5], h, h),
        "b_v1": jnp.zeros((1, h), jnp.float32),
        "w_v2": orthogonal_weight(ks[6], 1, h),          # (h, 1)
        "b_v2": jnp.zeros((1, 1), jnp.float32),
    }


def pack_params(params, state_dim, subgoal_dim, n_actions, hidden_dim):
    """One-time packing/fusion of parameters into the kernel's 5 operand arrays."""
    h, h2 = hidden_dim, hidden_dim // 2
    out_w = n_actions + 1

    # Fused embedding: block-diagonal (state_dim+subgoal_dim, h+h2)
    w_e = jnp.zeros((state_dim + subgoal_dim, h + h2), jnp.float32)
    w_e = w_e.at[:state_dim, :h].set(params["w_se"])
    w_e = w_e.at[state_dim:, h:].set(params["w_ge"])

    # Fused head hidden layer: (h, 2h) = [W_a1 | W_v1]
    w_h1 = jnp.concatenate([params["w_a1"], params["w_v1"]], axis=1)

    # Fused head output layer: block-diagonal (2h, n_actions+1)
    w_h2 = jnp.zeros((2 * h, out_w), jnp.float32)
    w_h2 = w_h2.at[:h, :n_actions].set(params["w_a2"])
    w_h2 = w_h2.at[h:, n_actions:].set(params["w_v2"])

    # All biases packed into one (8, BIAS_W) slab (one row per fused layer).
    bias_w = _round_up(max(h + h2, 2 * h, out_w), 128)
    bias = jnp.zeros((8, bias_w), jnp.float32)
    bias = bias.at[0, :h].set(params["b_se"].reshape(-1))
    bias = bias.at[0, h:h + h2].set(params["b_ge"].reshape(-1))
    bias = bias.at[1, :h].set(params["b_c"].reshape(-1))
    bias = bias.at[2, :h].set(params["b_a1"].reshape(-1))
    bias = bias.at[2, h:2 * h].set(params["b_v1"].reshape(-1))
    bias = bias.at[3, :n_actions].set(params["b_a2"].reshape(-1))
    bias = bias.at[3, n_actions:out_w].set(params["b_v2"].reshape(-1))

    return {"w_e": w_e, "w_c": params["w_c"], "w_h1": w_h1, "w_h2": w_h2, "bias": bias}


# ----------------------------------------------------------------------------
# Wrapper: batch-tiled pallas_call (no wrapper-side padding, narrow output)
# ----------------------------------------------------------------------------
@functools.partial(jax.jit, static_argnames=("n_actions", "tile_b"))
def low_level_network_forward(state, subgoal, packed, n_actions, tile_b=512):
    B, sd = state.shape
    gd = subgoal.shape[1]
    he = packed["w_e"].shape[1]
    h = packed["w_c"].shape[1]
    hh = packed["w_h1"].shape[1]
    out_w = packed["w_h2"].shape[1]           # n_actions + 1 (narrow, not lane-padded)

    # Batch tile: multiple of 8 sublanes. No jnp.pad of the inputs -- ragged last
    # tiles are handled by Pallas boundary masking (row-independent computation).
    tile_b = _round_up(min(tile_b, _round_up(B, 8)), 8)
    # v7x has 2 TensorCores: keep at least 2 grid steps when the batch allows it
    # without shrinking tiles below 256 rows (no-op on v5e/v6e beyond tiny overhead).
    if pl.cdiv(B, tile_b) < 2 and B >= 512:
        tile_b = _round_up(pl.cdiv(B, 2), 8)
    grid = (pl.cdiv(B, tile_b),)

    batch_map = lambda i: (i, 0)
    const_map = lambda i: (0, 0)   # weights/biases stay VMEM-resident across the grid

    flops = 2 * B * ((sd + gd) * he + he * h + h * hh + hh * out_w)
    bytes_accessed = 4 * (B * (sd + gd + out_w)
                          + packed["w_e"].size + packed["w_c"].size
                          + packed["w_h1"].size + packed["w_h2"].size
                          + packed["bias"].size)

    out = pl.pallas_call(
        low_level_net_kernel,
        out_shape=jax.ShapeDtypeStruct((B, out_w), jnp.float32),
        grid=grid,
        in_specs=[
            pl.BlockSpec((tile_b, sd), batch_map),
            pl.BlockSpec((tile_b, gd), batch_map),
            pl.BlockSpec(packed["w_e"].shape, const_map),
            pl.BlockSpec(packed["w_c"].shape, const_map),
            pl.BlockSpec(packed["w_h1"].shape, const_map),
            pl.BlockSpec(packed["w_h2"].shape, const_map),
            pl.BlockSpec(packed["bias"].shape, const_map),
        ],
        out_specs=pl.BlockSpec((tile_b, out_w), batch_map),
        scratch_shapes=[pltpu.VMEM((tile_b, sd + gd), jnp.float32)],
        compiler_params=pltpu.CompilerParams(
            dimension_semantics=("parallel",)),
        cost_estimate=pl.CostEstimate(
            flops=flops, transcendentals=0, bytes_accessed=bytes_accessed),
    )(
        state, subgoal,
        packed["w_e"], packed["w_c"], packed["w_h1"], packed["w_h2"], packed["bias"],
    )

    # Single narrow (B, n_actions+1) result; split into the module's two outputs.
    logits = out[:, :n_actions]
    value = out[:, n_actions:]
    return logits, value


# ----------------------------------------------------------------------------
# Pure-JAX reference (mirrors the PyTorch forward exactly, unfused)
# ----------------------------------------------------------------------------
def reference_forward(state, subgoal, params):
    relu = lambda x: jnp.maximum(x, 0.0)
    sf = relu(state @ params["w_se"] + params["b_se"])
    gf = relu(subgoal @ params["w_ge"] + params["b_ge"])
    combined = jnp.concatenate([sf, gf], axis=-1)
    feat = relu(combined @ params["w_c"] + params["b_c"])
    ah = relu(feat @ params["w_a1"] + params["b_a1"])
    logits = ah @ params["w_a2"] + params["b_a2"]
    vh = relu(feat @ params["w_v1"] + params["b_v1"])
    value = vh @ params["w_v2"] + params["b_v2"]
    return logits, value


if __name__ == "__main__":
    # Shapes consistent with the module's constructor. batch=1000 exercises two
    # grid steps (tile 512) plus a ragged last tile handled by boundary masking.
    state_dim, subgoal_dim, n_actions, hidden_dim = 32, 16, 8, 32
    batch = 1000

    key = jax.random.PRNGKey(0)
    k_state, k_subgoal, k_params = jax.random.split(key, 3)

    state = jax.random.normal(k_state, (batch, state_dim), dtype=jnp.float32)
    subgoal = jax.random.normal(k_subgoal, (batch, subgoal_dim), dtype=jnp.float32)

    params = make_params(k_params, state_dim, subgoal_dim, n_actions, hidden_dim)
    packed = pack_params(params, state_dim, subgoal_dim, n_actions, hidden_dim)

    logits, value = low_level_network_forward(state, subgoal, packed, n_actions)
    jax.block_until_ready((logits, value))

    ref_logits, ref_value = reference_forward(state, subgoal, params)
    assert logits.shape == (batch, n_actions)
    assert value.shape == (batch, 1)
    assert jnp.allclose(logits, ref_logits, atol=1e-5, rtol=1e-5)
    assert jnp.allclose(value, ref_value, atol=1e-5, rtol=1e-5)

    print("KERNEL_OK")
</pallas_src>

<mosaic_0001>
module attributes {stable_mosaic.version = 11 : i64} {
  func.func @low_level_net_kernel(%arg0: i32, %arg1: memref<512x32xf32, #tpu.memory_space<vmem>>, %arg2: memref<512x16xf32, #tpu.memory_space<vmem>>, %arg3: memref<48x48xf32, #tpu.memory_space<vmem>>, %arg4: memref<48x32xf32, #tpu.memory_space<vmem>>, %arg5: memref<32x64xf32, #tpu.memory_space<vmem>>, %arg6: memref<64x9xf32, #tpu.memory_space<vmem>>, %arg7: memref<8x128xf32, #tpu.memory_space<vmem>>, %arg8: memref<512x9xf32, #tpu.memory_space<vmem>>, %arg9: memref<512x48xf32, #tpu.memory_space<vmem>>) attributes {dimension_semantics = [#tpu.dimension_semantics<parallel>], iteration_bounds = array<i64: 2>, scalar_prefetch = 0 : i64, scratch_operands = 1 : i64, tpu.core_type = #tpu.core_type<tc>, window_params = [{transform_indices = @transform_0, window_bounds = array<i64: 512, 32>}, {transform_indices = @transform_1, window_bounds = array<i64: 512, 16>}, {pipeline_mode = #tpu.pipeline_mode<synchronous>, transform_indices = @transform_2, window_bounds = array<i64: 48, 48>}, {pipeline_mode = #tpu.pipeline_mode<synchronous>, transform_indices = @transform_3, window_bounds = array<i64: 48, 32>}, {pipeline_mode = #tpu.pipeline_mode<synchronous>, transform_indices = @transform_4, window_bounds = array<i64: 32, 64>}, {pipeline_mode = #tpu.pipeline_mode<synchronous>, transform_indices = @transform_5, window_bounds = array<i64: 64, 9>}, {pipeline_mode = #tpu.pipeline_mode<synchronous>, transform_indices = @transform_6, window_bounds = array<i64: 8, 128>}, {transform_indices = @transform_7, window_bounds = array<i64: 512, 9>}]} {
    %c0 = arith.constant 0 : index
    %c0_0 = arith.constant 0 : index
    %0 = vector.load %arg7[%c0, %c0_0] : memref<8x128xf32, #tpu.memory_space<vmem>>, vector<1x48xf32>
    %c1 = arith.constant 1 : index
    %c0_1 = arith.constant 0 : index
    %1 = vector.load %arg7[%c1, %c0_1] : memref<8x128xf32, #tpu.memory_space<vmem>>, vector<1x32xf32>
    %c2 = arith.constant 2 : index
    %c0_2 = arith.constant 0 : index
    %2 = vector.load %arg7[%c2, %c0_2] : memref<8x128xf32, #tpu.memory_space<vmem>>, vector<1x64xf32>
    %c3 = arith.constant 3 : index
    %c0_3 = arith.constant 0 : index
    %3 = vector.load %arg7[%c3, %c0_3] : memref<8x128xf32, #tpu.memory_space<vmem>>, vector<1x9xf32>
    %c0_4 = arith.constant 0 : index
    %c0_5 = arith.constant 0 : index
    %4 = vector.load %arg1[%c0_4, %c0_5] : memref<512x32xf32, #tpu.memory_space<vmem>>, vector<512x32xf32>
    %c0_6 = arith.constant 0 : index
    %c0_7 = arith.constant 0 : index
    %5 = vector.load %arg9[%c0_6, %c0_7] : memref<512x48xf32, #tpu.memory_space<vmem>>, vector<512x32xf32>
    tpu.vector_store %arg9[%c0_6, %c0_7], %4 {strides = array<i32>} : memref<512x48xf32, #tpu.memory_space<vmem>>, vector<512x32xf32>,
    %c0_8 = arith.constant 0 : index
    %c0_9 = arith.constant 0 : index
    %6 = vector.load %arg2[%c0_8, %c0_9] : memref<512x16xf32, #tpu.memory_space<vmem>>, vector<512x16xf32>
    %c0_10 = arith.constant 0 : index
    %c32 = arith.constant 32 : index
    %7 = vector.load %arg9[%c0_10, %c32] : memref<512x48xf32, #tpu.memory_space<vmem>>, vector<512x16xf32>
    tpu.vector_store %arg9[%c0_10, %c32], %6 {strides = array<i32>} : memref<512x48xf32, #tpu.memory_space<vmem>>, vector<512x16xf32>,
    %c0_11 = arith.constant 0 : index
    %c0_12 = arith.constant 0 : index
    %8 = vector.load %arg9[%c0_11, %c0_12] : memref<512x48xf32, #tpu.memory_space<vmem>>, vector<512x48xf32>
    %c0_13 = arith.constant 0 : index
    %c0_14 = arith.constant 0 : index
    %9 = vector.load %arg3[%c0_13, %c0_14] : memref<48x48xf32, #tpu.memory_space<vmem>>, vector<48x48xf32>
    %cst = arith.constant dense<0.000000e+00> : vector<512x48xf32>
    %10 = tpu.matmul %8, %9, %cst {dimension_numbers = #tpu.dot_dimension_numbers<[1], [0], [0], [1], [0, 0, 1, 1], [], []>} : vector<512x48xf32>, vector<48x48xf32>, vector<512x48xf32> -> vector<512x48xf32>
    %11 = vector.broadcast %0 : vector<1x48xf32> to vector<512x48xf32>
    %12 = arith.addf %10, %11 : vector<512x48xf32>
    %cst_15 = arith.constant 0.000000e+00 : f32
    %13 = vector.broadcast %cst_15 : f32 to vector<512x48xf32>
    %14 = arith.maximumf %12, %13 : vector<512x48xf32>
    %c0_16 = arith.constant 0 : index
    %c0_17 = arith.constant 0 : index
    %15 = vector.load %arg4[%c0_16, %c0_17] : memref<48x32xf32, #tpu.memory_space<vmem>>, vector<48x32xf32>
    %cst_18 = arith.constant dense<0.000000e+00> : vector<512x32xf32>
    %16 = tpu.matmul %14, %15, %cst_18 {dimension_numbers = #tpu.dot_dimension_numbers<[1], [0], [0], [1], [0, 0, 1, 1], [], []>} : vector<512x48xf32>, vector<48x32xf32>, vector<512x32xf32> -> vector<512x32xf32>
    %17 = vector.broadcast %1 : vector<1x32xf32> to vector<512x32xf32>
    %18 = arith.addf %16, %17 : vector<512x32xf32>
    %cst_19 = arith.constant 0.000000e+00 : f32
    %19 = vector.broadcast %cst_19 : f32 to vector<512x32xf32>
    %20 = arith.maximumf %18, %19 : vector<512x32xf32>
    %c0_20 = arith.constant 0 : index
    %c0_21 = arith.constant 0 : index
    %21 = vector.load %arg5[%c0_20, %c0_21] : memref<32x64xf32, #tpu.memory_space<vmem>>, vector<32x64xf32>
    %cst_22 = arith.constant dense<0.000000e+00> : vector<512x64xf32>
    %22 = tpu.matmul %20, %21, %cst_22 {dimension_numbers = #tpu.dot_dimension_numbers<[1], [0], [0], [1], [0, 0, 1, 1], [], []>} : vector<512x32xf32>, vector<32x64xf32>, vector<512x64xf32> -> vector<512x64xf32>
    %23 = vector.broadcast %2 : vector<1x64xf32> to vector<512x64xf32>
    %24 = arith.addf %22, %23 : vector<512x64xf32>
    %cst_23 = arith.constant 0.000000e+00 : f32
    %25 = vector.broadcast %cst_23 : f32 to vector<512x64xf32>
    %26 = arith.maximumf %24, %25 : vector<512x64xf32>
    %c0_24 = arith.constant 0 : index
    %c0_25 = arith.constant 0 : index
    %27 = vector.load %arg6[%c0_24, %c0_25] : memref<64x9xf32, #tpu.memory_space<vmem>>, vector<64x9xf32>
    %cst_26 = arith.constant dense<0.000000e+00> : vector<512x9xf32>
    %28 = tpu.matmul %26, %27, %cst_26 {dimension_numbers = #tpu.dot_dimension_numbers<[1], [0], [0], [1], [0, 0, 1, 1], [], []>} : vector<512x64xf32>, vector<64x9xf32>, vector<512x9xf32> -> vector<512x9xf32>
    %29 = vector.broadcast %3 : vector<1x9xf32> to vector<512x9xf32>
    %30 = arith.addf %28, %29 : vector<512x9xf32>
    %c0_27 = arith.constant 0 : index
    %c0_28 = arith.constant 0 : index
    %31 = vector.load %arg8[%c0_27, %c0_28] : memref<512x9xf32, #tpu.memory_space<vmem>>, vector<512x9xf32>
    tpu.vector_store %arg8[%c0_27, %c0_28], %30 {strides = array<i32>} : memref<512x9xf32, #tpu.memory_space<vmem>>, vector<512x9xf32>,
    return
  }
  func.func @transform_0(%arg0: i32) -> (i32, i32) {
    %c0_i32 = arith.constant 0 : i32
    %c0_i32_0 = arith.constant 0 : i32
    return %arg0, %c0_i32 : i32, i32
  }
  func.func @transform_1(%arg0: i32) -> (i32, i32) {
    %c0_i32 = arith.constant 0 : i32
    %c0_i32_0 = arith.constant 0 : i32
    return %arg0, %c0_i32 : i32, i32
  }
  func.func @transform_2(%arg0: i32) -> (i32, i32) {
    %c0_i32 = arith.constant 0 : i32
    %c0_i32_0 = arith.constant 0 : i32
    %c0_i32_1 = arith.constant 0 : i32
    return %c0_i32, %c0_i32_0 : i32, i32
  }
  func.func @transform_3(%arg0: i32) -> (i32, i32) {
    %c0_i32 = arith.constant 0 : i32
    %c0_i32_0 = arith.constant 0 : i32
    %c0_i32_1 = arith.constant 0 : i32
    return %c0_i32, %c0_i32_0 : i32, i32
  }
  func.func @transform_4(%arg0: i32) -> (i32, i32) {
    %c0_i32 = arith.constant 0 : i32
    %c0_i32_0 = arith.constant 0 : i32
    %c0_i32_1 = arith.constant 0 : i32
    return %c0_i32, %c0_i32_0 : i32, i32
  }
  func.func @transform_5(%arg0: i32) -> (i32, i32) {
    %c0_i32 = arith.constant 0 : i32
    %c0_i32_0 = arith.constant 0 : i32
    %c0_i32_1 = arith.constant 0 : i32
    return %c0_i32, %c0_i32_0 : i32, i32
  }
  func.func @transform_6(%arg0: i32) -> (i32, i32) {
    %c0_i32 = arith.constant 0 : i32
    %c0_i32_0 = arith.constant 0 : i32
    %c0_i32_1 = arith.constant 0 : i32
    return %c0_i32, %c0_i32_0 : i32, i32
  }
  func.func @transform_7(%arg0: i32) -> (i32, i32) {
    %c0_i32 = arith.constant 0 : i32
    %c0_i32_0 = arith.constant 0 : i32
    return %arg0, %c0_i32 : i32, i32
  }
}

</mosaic_0001>

<bundles_post_ra>
// kernel: low_level_network_forward.1
= control target key start
LH: loop header
LB: loop body
LE: loop exit
PB: predicated region body
PF: predicated region fallthrough
CT: control target
= control target key end

     0   :  { %s5277_s24 = smov 0   ;;  %s5279_s25 = smov 0   ;;  %s6585_s0 = inlined_call_operand.vmem [shape: f32[1000,32], index: 0, kind: input, shape index: {}]   ;;  %s6586_s1 = inlined_call_operand.vmem [shape: f32[1000,16], index: 1, kind: input, shape index: {}]   ;;  %s6587_s2 = inlined_call_operand.vmem [shape: f32[48,48], index: 2, kind: input, shape index: {}]   ;;  %s6588_s3 = inlined_call_operand.vmem [shape: f32[48,32], index: 3, kind: input, shape index: {}]   ;;  %s6589_s4 = inlined_call_operand.vmem [shape: f32[32,64], index: 4, kind: input, shape index: {}]   ;;  %s6590_s5 = inlined_call_operand.vmem [shape: f32[64,9], index: 5, kind: input, shape index: {}]   ;;  %s6591_s6 = inlined_call_operand.vmem [shape: f32[8,128], index: 6, kind: input, shape index: {}]   ;;  %s6592_s7 = inlined_call_operand.vmem [shape: f32[1000,9], index: 7, kind: output, shape index: {}]  }
   0x1   :  { %s5281_s26 = smov 0  }
   0x2 LB: > { %s5290_s27 = sadd.s32 4294967295, %s5202_s26   ;;  %s5292_s28 = sadd.s32 1, %s5202_s26   ;;  %s5202_s26 = sphi %s5281_s26, %s6601_s26   ;;  %s5198_s25 = sphi %s5279_s25, %s6600_s25   ;;  %s5194_s24 = sphi %s5277_s24, %s6599_s24  }
   0x3   : > { %s178_s29 = ssub.s32 %s5202_s26, %s5292_s28  ;;  %s181_s30 = sadd.s32 1, %s5198_s25 }
   0x4   : > { %p179_p0 = scmp.eq.s32.totalorder %s178_s29, 0  ;;  %p191_p1 = scmp.ne.s32.totalorder %s5198_s25, %s5194_s24 }
   0x5   : > { %p192_p2 = scmp.eq.s32.totalorder %s5290_s27, 1  ;;  %p4013_p3 = scmp.ge.s32.totalorder %s5202_s26, 1 }
   0x6   : > { %s5300_s8 = scalar_select %p179_p0, %s5198_s25, %s181_s30  }
   0x7   : > { %p5302_p4 = por %p192_p2, %p191_p1  ;;  %p265_p5 = scmp.lt.s32.totalorder %s5202_s26, 3 }
   0x9   : > { %p266_p6 = pnand %p4013_p3, %p265_p5 }
   0xa   : > { %s5307_s10 = sshll.u32 (!%p266_p6), %s5290_s27, 6  ;;  %v924_v0 = vld [vmem:[%s6587_s2] sm:$0xff] (!%p266_p6)  ;;  %v925_v1 = vld [vmem:[%s6587_s2 + $0x8] sm:$0xff] (!%p266_p6)  ;;  %v926_v3 = vld [vmem:[%s6587_s2 + $0x10] sm:$0xff] (!%p266_p6)  ;;  %s5236_s12 = smov (!%p266_p6), 32   ;;  %vm410_vm0 = vcmask (!%p266_p6), 261120  }
   0xb   : > { %269 = sbr.rel (%p266_p6) target bundleno = 1216 (0x4c0), region = 48  ;;  %p314_p7 = scmp.lt.s32.totalorder (!%p266_p6), %s5307_s10, 124  ;;  %v5011_v2 = vpack.c.bf16 (!%p266_p6), %v925_v1, %v924_v0  ;;  %v927_v4 = vld [vmem:[%s6587_s2 + $0x18] sm:$0xff] (!%p266_p6)  ;;  %v928_v6 = vld [vmem:[%s6587_s2 + $0x20] sm:$0xff] (!%p266_p6)  ;;  %v929_v7 = vld [vmem:[%s6587_s2 + $0x28] sm:$0xff] (!%p266_p6)  ;;  %vm795_vm1 = vcmask (!%p266_p6), 392448  }
   0xc   : > { %v5015_v5 = vpack.c.bf16 (!%p266_p6), %v927_v4, %v926_v3  ;;  %v5019_v8 = vpack.c.bf16 (!%p266_p6), %v929_v7, %v928_v6  ;;  %vm934_vm2 = vcmask (!%p266_p6), 392192   ;;  %vm2888_vm3 = vcmask (!%p266_p6), 523264   ;;  %s306_s30 = sand.u32 (!%p266_p6), 1, %s5194_s24  }
   0xd   : > { %5012 = vmatprep.subr.bf16.mxu0 (!%p266_p6), %v5011_v2  ;;  %vm3466_vm4 = vcmask (!%p266_p6), 72704  }
   0xe   : > { %5014 = vmatpush3.bf16.msra.mxu0 (!%p266_p6), %v5011_v2 }
   0xf   : > { %5016 = vmatprep.subr.bf16.mxu0 (!%p266_p6), %v5015_v5 }
  0x12   : > { %s5323_s19 = scalar_select %p314_p7, %s5307_s10, 124  ;;  %5018 = vmatpush3.bf16.msra.mxu0 %v5015_v5 }
  0x13   : > { %5020 = vmatprep.subr.bf16.mxu0 %v5019_v8  ;;  %s3539_s24 = ssub.s32 (%p5302_p4), 125, %s5307_s10 }
  0x14   : > { %s4016_s26 = sshll.u32 %s5323_s19, 3  ;;  %p3540_p8 = scmp.lt.s32.totalorder (%p5302_p4), %s3539_s24, 64 }
  0x15   : > { %s5335_s11 = scalar_lea.vmem %s6586_s1, %s4016_s26  ;;  %s5358_s15 = scalar_lea.vmem %s6585_s0, %s4016_s26 }
  0x16   : > { %v475_v9 = vld [vmem:[%s5335_s11] sm:$0xff]  ;;  %v477_v10 = vld [vmem:[%s5335_s11 + $0x10] sm:$0xff]  ;;  %v476_v11 = vld [vmem:[%s5335_s11 + $0x8] sm:$0xff]  ;;  %5022 = vmatpush3.bf16.msra.mxu0 %v5019_v8 }
  0x17   : > { %603 = vrot.lane.b32.xlu0 %v475_v9, %s5236_s12  ;;  %607 = vrot.lane.b32.xlu1 %v477_v10, %s5236_s12  ;;  %v478_v12 = vld [vmem:[%s5335_s11 + $0x18] sm:$0xff]  ;;  %v479_v13 = vld [vmem:[%s5335_s11 + $0x20] sm:$0xff] }
  0x18   : > { %v480_v14 = vld [vmem:[%s5335_s11 + $0x28] sm:$0xff]  ;;  %v481_v15 = vld [vmem:[%s5335_s11 + $0x30] sm:$0xff]  ;;  %v482_v16 = vld [vmem:[%s5335_s11 + $0x38] sm:$0xff] }
  0x19   : > { %v483_v17 = vld [vmem:[%s5335_s11 + $0x40] sm:$0xff]  ;;  %v484_v18 = vld [vmem:[%s5335_s11 + $0x48] sm:$0xff]  ;;  %v485_v19 = vld [vmem:[%s5335_s11 + $0x50] sm:$0xff] }
  0x1a   : > { %v486_v20 = vld [vmem:[%s5335_s11 + $0x58] sm:$0xff]  ;;  %v346_v21 = vld [vmem:[%s5358_s15] sm:$0xff]  ;;  %v348_v22 = vld [vmem:[%s5358_s15 + $0x10] sm:$0xff] }
  0x1b   : > { %605 = vrot.lane.b32.xlu0 %v476_v11, %s5236_s12  ;;  %609 = vrot.lane.b32.xlu1 %v478_v12, %s5236_s12  ;;  %411 = vst.msk [vmem:[#allocation2] sm:$0xff] %vm410_vm0, %v346_v21  ;;  %v487_v23 = vld [vmem:[%s5335_s11 + $0x60] sm:$0xff]  ;;  %v488_v24 = vld [vmem:[%s5335_s11 + $0x68] sm:$0xff]  ;;  %413 = vst.msk [vmem:[#allocation2 + $0x10] sm:$0xff] %vm410_vm0, %v348_v22 }
  0x1c   : > { %v347_v25 = vld [vmem:[%s5358_s15 + $0x8] sm:$0xff]  ;;  %v349_v26 = vld [vmem:[%s5358_s15 + $0x18] sm:$0xff]  ;;  %v489_v27 = vld [vmem:[%s5335_s11 + $0x70] sm:$0xff] }
  0x1d   : > { %412 = vst.msk [vmem:[#allocation2 + $0x8] sm:$0xff] %vm410_vm0, %v347_v25  ;;  %414 = vst.msk [vmem:[#allocation2 + $0x18] sm:$0xff] %vm410_vm0, %v349_v26  ;;  %v350_v28 = vld [vmem:[%s5358_s15 + $0x20] sm:$0xff]  ;;  %v351_v29 = vld [vmem:[%s5358_s15 + $0x28] sm:$0xff] }
  0x1e   : > { %v490_v30 = vld [vmem:[%s5335_s11 + $0x78] sm:$0xff]  ;;  %415 = vst.msk [vmem:[#allocation2 + $0x20] sm:$0xff] %vm410_vm0, %v350_v28  ;;  %416 = vst.msk [vmem:[#allocation2 + $0x28] sm:$0xff] %vm410_vm0, %v351_v29  ;;  %v352_v31 = vld [vmem:[%s5358_s15 + $0x30] sm:$0xff] }
  0x1f   : > { %611 = vrot.lane.b32.xlu0 %v479_v13, %s5236_s12  ;;  %613 = vrot.lane.b32.xlu1 %v480_v14, %s5236_s12  ;;  %417 = vst.msk [vmem:[#allocation2 + $0x30] sm:$0xff] %vm410_vm0, %v352_v31  ;;  %v353_v32 = vld [vmem:[%s5358_s15 + $0x38] sm:$0xff]  ;;  %v354_v33 = vld [vmem:[%s5358_s15 + $0x40] sm:$0xff] }
  0x20   : > { %v355_v34 = vld [vmem:[%s5358_s15 + $0x48] sm:$0xff]  ;;  %418 = vst.msk [vmem:[#allocation2 + $0x38] sm:$0xff] %vm410_vm0, %v353_v32  ;;  %419 = vst.msk [vmem:[#allocation2 + $0x40] sm:$0xff] %vm410_vm0, %v354_v33  ;;  %v356_v35 = vld [vmem:[%s5358_s15 + $0x50] sm:$0xff] }
  0x21   : > { %420 = vst.msk [vmem:[#allocation2 + $0x48] sm:$0xff] %vm410_vm0, %v355_v34  ;;  %v357_v36 = vld [vmem:[%s5358_s15 + $0x58] sm:$0xff]  ;;  %v358_v37 = vld [vmem:[%s5358_s15 + $0x60] sm:$0xff]  ;;  %v492_v39 = vld [vmem:[%s5335_s11 + $0x88] sm:$0xff] }
  0x22   : > { %v491_v38 = vld [vmem:[%s5335_s11 + $0x80] sm:$0xff]  ;;  %421 = vst.msk [vmem:[#allocation2 + $0x50] sm:$0xff] %vm410_vm0, %v356_v35  ;;  %422 = vst.msk [vmem:[#allocation2 + $0x58] sm:$0xff] %vm410_vm0, %v357_v36  ;;  %v359_v40 = vld [vmem:[%s5358_s15 + $0x68] sm:$0xff] }
  0x23   : > { %615 = vrot.lane.b32.xlu0 %v481_v15, %s5236_s12  ;;  %617 = vrot.lane.b32.xlu1 %v482_v16, %s5236_s12  ;;  %423 = vst.msk [vmem:[#allocation2 + $0x60] sm:$0xff] %vm410_vm0, %v358_v37  ;;  %v360_v41 = vld [vmem:[%s5358_s15 + $0x70] sm:$0xff]  ;;  %v361_v42 = vld [vmem:[%s5358_s15 + $0x78] sm:$0xff]  ;;  %424 = vst.msk [vmem:[#allocation2 + $0x68] sm:$0xff] %vm410_vm0, %v359_v40 }
  0x24   : > { %425 = vst.msk [vmem:[#allocation2 + $0x70] sm:$0xff] %vm410_vm0, %v360_v41  ;;  %426 = vst.msk [vmem:[#allocation2 + $0x78] sm:$0xff] %vm410_vm0, %v361_v42  ;;  %v362_v43 = vld [vmem:[%s5358_s15 + $0x80] sm:$0xff]  ;;  %v363_v44 = vld [vmem:[%s5358_s15 + $0x88] sm:$0xff] }
  0x25   : > { %427 = vst.msk [vmem:[#allocation2 + $0x80] sm:$0xff] %vm410_vm0, %v362_v43  ;;  %428 = vst.msk [vmem:[#allocation2 + $0x88] sm:$0xff] %vm410_vm0, %v363_v44  ;;  %v364_v45 = vld [vmem:[%s5358_s15 + $0x90] sm:$0xff]  ;;  %v365_v46 = vld [vmem:[%s5358_s15 + $0x98] sm:$0xff] }
  0x26   : > { %v366_v47 = vld [vmem:[%s5358_s15 + $0xa0] sm:$0xff]  ;;  %429 = vst.msk [vmem:[#allocation2 + $0x90] sm:$0xff] %vm410_vm0, %v364_v45  ;;  %430 = vst.msk [vmem:[#allocation2 + $0x98] sm:$0xff] %vm410_vm0, %v365_v46  ;;  %v367_v48 = vld [vmem:[%s5358_s15 + $0xa8] sm:$0xff] }
  0x27   : > { %619 = vrot.lane.b32.xlu0 %v483_v17, %s5236_s12  ;;  %621 = vrot.lane.b32.xlu1 %v484_v18, %s5236_s12  ;;  %431 = vst.msk [vmem:[#allocation2 + $0xa0] sm:$0xff] %vm410_vm0, %v366_v47  ;;  %432 = vst.msk [vmem:[#allocation2 + $0xa8] sm:$0xff] %vm410_vm0, %v367_v48  ;;  %v368_v49 = vld [vmem:[%s5358_s15 + $0xb0] sm:$0xff]  ;;  %v369_v50 = vld [vmem:[%s5358_s15 + $0xb8] sm:$0xff] }
  0x28   : > { %433 = vst.msk [vmem:[#allocation2 + $0xb0] sm:$0xff] %vm410_vm0, %v368_v49  ;;  %434 = vst.msk [vmem:[#allocation2 + $0xb8] sm:$0xff] %vm410_vm0, %v369_v50  ;;  %v493_v51 = vld [vmem:[%s5335_s11 + $0x90] sm:$0xff]  ;;  %v494_v52 = vld [vmem:[%s5335_s11 + $0x98] sm:$0xff] }
  0x29   : > { %v370_v53 = vld [vmem:[%s5358_s15 + $0xc0] sm:$0xff]  ;;  %v371_v54 = vld [vmem:[%s5358_s15 + $0xc8] sm:$0xff]  ;;  %v372_v57 = vld [vmem:[%s5358_s15 + $0xd0] sm:$0xff] }
  0x2a   : > { %435 = vst.msk [vmem:[#allocation2 + $0xc0] sm:$0xff] %vm410_vm0, %v370_v53  ;;  %436 = vst.msk [vmem:[#allocation2 + $0xc8] sm:$0xff] %vm410_vm0, %v371_v54  ;;  %v495_v55 = vld [vmem:[%s5335_s11 + $0xa0] sm:$0xff]  ;;  %v496_v56 = vld [vmem:[%s5335_s11 + $0xa8] sm:$0xff] }
  0x2b   : > { %623 = vrot.lane.b32.xlu0 %v485_v19, %s5236_s12  ;;  %625 = vrot.lane.b32.xlu1 %v486_v20, %s5236_s12  ;;  %v373_v58 = vld [vmem:[%s5358_s15 + $0xd8] sm:$0xff]  ;;  %437 = vst.msk [vmem:[#allocation2 + $0xd0] sm:$0xff] %vm410_vm0, %v372_v57  ;;  %v497_v59 = vld [vmem:[%s5335_s11 + $0xb0] sm:$0xff] }
  0x2c   : > { %438 = vst.msk [vmem:[#allocation2 + $0xd8] sm:$0xff] %vm410_vm0, %v373_v58  ;;  %v498_v60 = vld [vmem:[%s5335_s11 + $0xb8] sm:$0xff]  ;;  %v374_v61 = vld [vmem:[%s5358_s15 + $0xe0] sm:$0xff]  ;;  %v375_v62 = vld [vmem:[%s5358_s15 + $0xe8] sm:$0xff] }
  0x2d   : > { %439 = vst.msk [vmem:[#allocation2 + $0xe0] sm:$0xff] %vm410_vm0, %v374_v61  ;;  %440 = vst.msk [vmem:[#allocation2 + $0xe8] sm:$0xff] %vm410_vm0, %v375_v62  ;;  %v499_v63 = vld [vmem:[%s5335_s11 + $0xc0] sm:$0xff]  ;;  %v500_v0 = vld [vmem:[%s5335_s11 + $0xc8] sm:$0xff] }
  0x2e   : > { %v376_v1 = vld [vmem:[%s5358_s15 + $0xf0] sm:$0xff]  ;;  %v377_v2 = vld [vmem:[%s5358_s15 + $0xf8] sm:$0xff]  ;;  %v378_v5 = vld [vmem:[%s5358_s15 + $0x100] sm:$0xff] }
  0x2f   : > { %627 = vrot.lane.b32.xlu0 %v487_v23, %s5236_s12  ;;  %629 = vrot.lane.b32.xlu1 %v488_v24, %s5236_s12  ;;  %441 = vst.msk [vmem:[#allocation2 + $0xf0] sm:$0xff] %vm410_vm0, %v376_v1  ;;  %442 = vst.msk [vmem:[#allocation2 + $0xf8] sm:$0xff] %vm410_vm0, %v377_v2  ;;  %v501_v3 = vld [vmem:[%s5335_s11 + $0xd0] sm:$0xff]  ;;  %v502_v4 = vld [vmem:[%s5335_s11 + $0xd8] sm:$0xff] }
  0x30   : > { %v379_v6 = vld [vmem:[%s5358_s15 + $0x108] sm:$0xff]  ;;  %443 = vst.msk [vmem:[#allocation2 + $0x100] sm:$0xff] %vm410_vm0, %v378_v5  ;;  %v503_v7 = vld [vmem:[%s5335_s11 + $0xe0] sm:$0xff]  ;;  %v380_v9 = vld [vmem:[%s5358_s15 + $0x110] sm:$0xff] }
  0x31   : > { %444 = vst.msk [vmem:[#allocation2 + $0x108] sm:$0xff] %vm410_vm0, %v379_v6  ;;  %v504_v8 = vld [vmem:[%s5335_s11 + $0xe8] sm:$0xff]  ;;  %v381_v10 = vld [vmem:[%s5358_s15 + $0x118] sm:$0xff]  ;;  %445 = vst.msk [vmem:[#allocation2 + $0x110] sm:$0xff] %vm410_vm0, %v380_v9 }
  0x32   : > { %446 = vst.msk [vmem:[#allocation2 + $0x118] sm:$0xff] %vm410_vm0, %v381_v10  ;;  %v505_v11 = vld [vmem:[%s5335_s11 + $0xf0] sm:$0xff]  ;;  %v506_v12 = vld [vmem:[%s5335_s11 + $0xf8] sm:$0xff]  ;;  %v382_v13 = vld [vmem:[%s5358_s15 + $0x120] sm:$0xff] }
  0x33   : > { %631 = vrot.lane.b32.xlu0 %v489_v27, %s5236_s12  ;;  %633 = vrot.lane.b32.xlu1 %v490_v30, %s5236_s12  ;;  %v383_v14 = vld [vmem:[%s5358_s15 + $0x128] sm:$0xff]  ;;  %447 = vst.msk [vmem:[#allocation2 + $0x120] sm:$0xff] %vm410_vm0, %v382_v13  ;;  %v507_v15 = vld [vmem:[%s5335_s11 + $0x100] sm:$0xff] }
  0x34   : > { %448 = vst.msk [vmem:[#allocation2 + $0x128] sm:$0xff] %vm410_vm0, %v383_v14  ;;  %v508_v16 = vld [vmem:[%s5335_s11 + $0x108] sm:$0xff]  ;;  %v384_v17 = vld [vmem:[%s5358_s15 + $0x130] sm:$0xff]  ;;  %v385_v18 = vld [vmem:[%s5358_s15 + $0x138] sm:$0xff] }
  0x35   : > { %449 = vst.msk [vmem:[#allocation2 + $0x130] sm:$0xff] %vm410_vm0, %v384_v17  ;;  %450 = vst.msk [vmem:[#allocation2 + $0x138] sm:$0xff] %vm410_vm0, %v385_v18  ;;  %v509_v19 = vld [vmem:[%s5335_s11 + $0x110] sm:$0xff]  ;;  %v510_v20 = vld [vmem:[%s5335_s11 + $0x118] sm:$0xff] }
  0x36   : > { %v386_v21 = vld [vmem:[%s5358_s15 + $0x140] sm:$0xff]  ;;  %v387_v22 = vld [vmem:[%s5358_s15 + $0x148] sm:$0xff]  ;;  %v388_v25 = vld [vmem:[%s5358_s15 + $0x150] sm:$0xff] }
  0x37   : > { %635 = vrot.lane.b32.xlu0 %v491_v38, %s5236_s12  ;;  %637 = vrot.lane.b32.xlu1 %v492_v39, %s5236_s12  ;;  %451 = vst.msk [vmem:[#allocation2 + $0x140] sm:$0xff] %vm410_vm0, %v386_v21  ;;  %452 = vst.msk [vmem:[#allocation2 + $0x148] sm:$0xff] %vm410_vm0, %v387_v22  ;;  %v511_v23 = vld [vmem:[%s5335_s11 + $0x120] sm:$0xff]  ;;  %v512_v24 = vld [vmem:[%s5335_s11 + $0x128] sm:$0xff] }
  0x38   : > { %v389_v26 = vld [vmem:[%s5358_s15 + $0x158] sm:$0xff]  ;;  %453 = vst.msk [vmem:[#allocation2 + $0x150] sm:$0xff] %vm410_vm0, %v388_v25  ;;  %v513_v27 = vld [vmem:[%s5335_s11 + $0x130] sm:$0xff]  ;;  %v390_v29 = vld [vmem:[%s5358_s15 + $0x160] sm:$0xff] }
  0x39   : > { %454 = vst.msk [vmem:[#allocation2 + $0x158] sm:$0xff] %vm410_vm0, %v389_v26  ;;  %v514_v28 = vld [vmem:[%s5335_s11 + $0x138] sm:$0xff]  ;;  %v391_v30 = vld [vmem:[%s5358_s15 + $0x168] sm:$0xff]  ;;  %455 = vst.msk [vmem:[#allocation2 + $0x160] sm:$0xff] %vm410_vm0, %v390_v29 }
  0x3a   : > { %456 = vst.msk [vmem:[#allocation2 + $0x168] sm:$0xff] %vm410_vm0, %v391_v30  ;;  %v515_v31 = vld [vmem:[%s5335_s11 + $0x140] sm:$0xff]  ;;  %v516_v32 = vld [vmem:[%s5335_s11 + $0x148] sm:$0xff]  ;;  %v392_v33 = vld [vmem:[%s5358_s15 + $0x170] sm:$0xff] }
  0x3b   : > { %639 = vrot.lane.b32.xlu0 %v493_v51, %s5236_s12  ;;  %641 = vrot.lane.b32.xlu1 %v494_v52, %s5236_s12  ;;  %v393_v34 = vld [vmem:[%s5358_s15 + $0x178] sm:$0xff]  ;;  %457 = vst.msk [vmem:[#allocation2 + $0x170] sm:$0xff] %vm410_vm0, %v392_v33  ;;  %v517_v35 = vld [vmem:[%s5335_s11 + $0x150] sm:$0xff] }
  0x3c   : > { %458 = vst.msk [vmem:[#allocation2 + $0x178] sm:$0xff] %vm410_vm0, %v393_v34  ;;  %v518_v36 = vld [vmem:[%s5335_s11 + $0x158] sm:$0xff]  ;;  %v394_v37 = vld [vmem:[%s5358_s15 + $0x180] sm:$0xff]  ;;  %v395_v38 = vld [vmem:[%s5358_s15 + $0x188] sm:$0xff] }
  0x3d   : > { %459 = vst.msk [vmem:[#allocation2 + $0x180] sm:$0xff] %vm410_vm0, %v394_v37  ;;  %460 = vst.msk [vmem:[#allocation2 + $0x188] sm:$0xff] %vm410_vm0, %v395_v38  ;;  %v519_v39 = vld [vmem:[%s5335_s11 + $0x160] sm:$0xff]  ;;  %v520_v40 = vld [vmem:[%s5335_s11 + $0x168] sm:$0xff] }
  0x3e   : > { %v396_v41 = vld [vmem:[%s5358_s15 + $0x190] sm:$0xff]  ;;  %v397_v42 = vld [vmem:[%s5358_s15 + $0x198] sm:$0xff]  ;;  %v398_v45 = vld [vmem:[%s5358_s15 + $0x1a0] sm:$0xff] }
  0x3f   : > { %643 = vrot.lane.b32.xlu0 %v495_v55, %s5236_s12  ;;  %645 = vrot.lane.b32.xlu1 %v496_v56, %s5236_s12  ;;  %461 = vst.msk [vmem:[#allocation2 + $0x190] sm:$0xff] %vm410_vm0, %v396_v41  ;;  %462 = vst.msk [vmem:[#allocation2 + $0x198] sm:$0xff] %vm410_vm0, %v397_v42  ;;  %v521_v43 = vld [vmem:[%s5335_s11 + $0x170] sm:$0xff]  ;;  %v522_v44 = vld [vmem:[%s5335_s11 + $0x178] sm:$0xff] }
  0x40   : > { %v399_v46 = vld [vmem:[%s5358_s15 + $0x1a8] sm:$0xff]  ;;  %463 = vst.msk [vmem:[#allocation2 + $0x1a0] sm:$0xff] %vm410_vm0, %v398_v45  ;;  %v523_v47 = vld [vmem:[%s5335_s11 + $0x180] sm:$0xff]  ;;  %v400_v49 = vld [vmem:[%s5358_s15 + $0x1b0] sm:$0xff] }
  0x41   : > { %464 = vst.msk [vmem:[#allocation2 + $0x1a8] sm:$0xff] %vm410_vm0, %v399_v46  ;;  %v524_v48 = vld [vmem:[%s5335_s11 + $0x188] sm:$0xff]  ;;  %v401_v50 = vld [vmem:[%s5358_s15 + $0x1b8] sm:$0xff]  ;;  %465 = vst.msk [vmem:[#allocation2 + $0x1b0] sm:$0xff] %vm410_vm0, %v400_v49 }
  0x42   : > { %466 = vst.msk [vmem:[#allocation2 + $0x1b8] sm:$0xff] %vm410_vm0, %v401_v50  ;;  %v525_v51 = vld [vmem:[%s5335_s11 + $0x190] sm:$0xff]  ;;  %v526_v52 = vld [vmem:[%s5335_s11 + $0x198] sm:$0xff]  ;;  %v402_v53 = vld [vmem:[%s5358_s15 + $0x1c0] sm:$0xff] }
  0x43   : > { %647 = vrot.lane.b32.xlu0 %v497_v59, %s5236_s12  ;;  %649 = vrot.lane.b32.xlu1 %v498_v60, %s5236_s12  ;;  %v403_v54 = vld [vmem:[%s5358_s15 + $0x1c8] sm:$0xff]  ;;  %467 = vst.msk [vmem:[#allocation2 + $0x1c0] sm:$0xff] %vm410_vm0, %v402_v53  ;;  %v527_v55 = vld [vmem:[%s5335_s11 + $0x1a0] sm:$0xff] }
  0x44   : > { %468 = vst.msk [vmem:[#allocation2 + $0x1c8] sm:$0xff] %vm410_vm0, %v403_v54  ;;  %v528_v56 = vld [vmem:[%s5335_s11 + $0x1a8] sm:$0xff]  ;;  %v404_v57 = vld [vmem:[%s5358_s15 + $0x1d0] sm:$0xff]  ;;  %v405_v58 = vld [vmem:[%s5358_s15 + $0x1d8] sm:$0xff] }
  0x45   : > { %469 = vst.msk [vmem:[#allocation2 + $0x1d0] sm:$0xff] %vm410_vm0, %v404_v57  ;;  %470 = vst.msk [vmem:[#allocation2 + $0x1d8] sm:$0xff] %vm410_vm0, %v405_v58  ;;  %v529_v59 = vld [vmem:[%s5335_s11 + $0x1b0] sm:$0xff]  ;;  %v530_v60 = vld [vmem:[%s5335_s11 + $0x1b8] sm:$0xff] }
  0x46   : > { %v406_v61 = vld [vmem:[%s5358_s15 + $0x1e0] sm:$0xff]  ;;  %v407_v62 = vld [vmem:[%s5358_s15 + $0x1e8] sm:$0xff]  ;;  %v408_v1 = vld [vmem:[%s5358_s15 + $0x1f0] sm:$0xff] }
  0x47   : > { %651 = vrot.lane.b32.xlu0 %v499_v63, %s5236_s12  ;;  %653 = vrot.lane.b32.xlu1 %v500_v0, %s5236_s12  ;;  %471 = vst.msk [vmem:[#allocation2 + $0x1e0] sm:$0xff] %vm410_vm0, %v406_v61  ;;  %472 = vst.msk [vmem:[#allocation2 + $0x1e8] sm:$0xff] %vm410_vm0, %v407_v62  ;;  %v531_v63 = vld [vmem:[%s5335_s11 + $0x1c0] sm:$0xff]  ;;  %v532_v0 = vld [vmem:[%s5335_s11 + $0x1c8] sm:$0xff] }
  0x48   : > { %v409_v2 = vld [vmem:[%s5358_s15 + $0x1f8] sm:$0xff]  ;;  %473 = vst.msk [vmem:[#allocation2 + $0x1f0] sm:$0xff] %vm410_vm0, %v408_v1  ;;  %v1577_v17 = vld [vmem:[%s6588_s3 + $0x8] sm:$0xff]  ;;  %v1578_v18 = vld [vmem:[%s6588_s3 + $0x10] sm:$0xff]  ;;  %s4296_s15 = sshll.u32 (%p5302_p4), %s5290_s27, 9 }
  0x49   : > { %474 = vst.msk [vmem:[#allocation2 + $0x1f8] sm:$0xff] %vm410_vm0, %v409_v2  ;;  %s6386_s18 = scalar_lea.vmem (%p5302_p4), %s6592_s7, %s4296_s15  }
  0x4b   : > { %655 = vrot.lane.b32.xlu0 %v501_v3, %s5236_s12  ;;  %657 = vrot.lane.b32.xlu1 %v502_v4, %s5236_s12  ;;  %v533_v3 = vld [vmem:[%s5335_s11 + $0x1d0] sm:$0xff]  ;;  %v534_v4 = vld [vmem:[%s5335_s11 + $0x1d8] sm:$0xff] }
  0x4f   : > { %659 = vrot.lane.b32.xlu0 %v503_v7, %s5236_s12  ;;  %661 = vrot.lane.b32.xlu1 %v504_v8, %s5236_s12  ;;  %v535_v7 = vld [vmem:[%s5335_s11 + $0x1e0] sm:$0xff]  ;;  %v536_v8 = vld [vmem:[%s5335_s11 + $0x1e8] sm:$0xff] }
  0x53   : > { %663 = vrot.lane.b32.xlu0 %v505_v11, %s5236_s12  ;;  %665 = vrot.lane.b32.xlu1 %v506_v12, %s5236_s12  ;;  %v537_v11 = vld [vmem:[%s5335_s11 + $0x1f0] sm:$0xff]  ;;  %v538_v12 = vld [vmem:[%s5335_s11 + $0x1f8] sm:$0xff]  ;;  %s4014_s11 = sshll.u32 %s306_s30, 9 }
  0x54   : > { %s6187_s14 = scalar_lea.vmem [#allocation3], %s4014_s11  }
  0x57   : > { %667 = vrot.lane.b32.xlu0 %v507_v15, %s5236_s12  ;;  %669 = vrot.lane.b32.xlu1 %v508_v16, %s5236_s12  ;;  %v1576_v16 = vld [vmem:[%s6588_s3] sm:$0xff] }
  0x5b   : > { %671 = vrot.lane.b32.xlu0 %v509_v19, %s5236_s12  ;;  %673 = vrot.lane.b32.xlu1 %v510_v20, %s5236_s12  ;;  %v5023_v19 = vpack.c.bf16 %v1577_v17, %v1576_v16  ;;  %v1579_v20 = vld [vmem:[%s6588_s3 + $0x18] sm:$0xff] }
  0x5c   : > { %v5027_v22 = vpack.c.bf16 %v1579_v20, %v1578_v18 }
  0x5d   : > { %5024 = vmatprep.subr.bf16.mxu1 %v5023_v19 }
  0x5e   : > { %5026 = vmatpush3.bf16.msra.mxu1 %v5023_v19 }
  0x5f   : > { %675 = vrot.lane.b32.xlu0 %v511_v23, %s5236_s12  ;;  %677 = vrot.lane.b32.xlu1 %v512_v24, %s5236_s12 }
  0x60   : > { %5028 = vmatprep.subr.bf16.mxu1 %v5027_v22 }
  0x62   : > { %5030 = vmatpush3.bf16.msra.mxu1 %v5027_v22 }
  0x63   : > { %679 = vrot.lane.b32.xlu0 %v513_v27, %s5236_s12  ;;  %681 = vrot.lane.b32.xlu1 %v514_v28, %s5236_s12 }
  0x67   : > { %683 = vrot.lane.b32.xlu0 %v515_v31, %s5236_s12  ;;  %685 = vrot.lane.b32.xlu1 %v516_v32, %s5236_s12 }
  0x6b   : > { %687 = vrot.lane.b32.xlu0 %v517_v35, %s5236_s12  ;;  %689 = vrot.lane.b32.xlu1 %v518_v36, %s5236_s12 }
  0x6f   : > { %691 = vrot.lane.b32.xlu0 %v519_v39, %s5236_s12  ;;  %693 = vrot.lane.b32.xlu1 %v520_v40, %s5236_s12 }
  0x73   : > { %695 = vrot.lane.b32.xlu0 %v521_v43, %s5236_s12  ;;  %697 = vrot.lane.b32.xlu1 %v522_v44, %s5236_s12 }
  0x77   : > { %699 = vrot.lane.b32.xlu0 %v523_v47, %s5236_s12  ;;  %701 = vrot.lane.b32.xlu1 %v524_v48, %s5236_s12 }
  0x7b   : > { %703 = vrot.lane.b32.xlu0 %v525_v51, %s5236_s12  ;;  %705 = vrot.lane.b32.xlu1 %v526_v52, %s5236_s12 }
  0x7f   : > { %707 = vrot.lane.b32.xlu0 %v527_v55, %s5236_s12  ;;  %709 = vrot.lane.b32.xlu1 %v528_v56, %s5236_s12 }
  0x83   : > { %711 = vrot.lane.b32.xlu0 %v529_v59, %s5236_s12  ;;  %713 = vrot.lane.b32.xlu1 %v530_v60, %s5236_s12 }
  0x87   : > { %715 = vrot.lane.b32.xlu0 %v531_v63, %s5236_s12  ;;  %717 = vrot.lane.b32.xlu1 %v532_v0, %s5236_s12 }
  0x89   : > { %v604_v5 = vpop.permute.xlu0 %603  ;;  %v608_v6 = vpop.permute.xlu1 %607 }
  0x8a   : > { %796 = vst.msk [vmem:[#allocation2] sm:$0xff] %vm795_vm1, %v604_v5  ;;  %798 = vst.msk [vmem:[#allocation2 + $0x10] sm:$0xff] %vm795_vm1, %v608_v6 }
  0x8b   : > { %719 = vrot.lane.b32.xlu0 %v533_v3, %s5236_s12  ;;  %721 = vrot.lane.b32.xlu1 %v534_v4, %s5236_s12 }
  0x8d   : > { %v606_v9 = vpop.permute.xlu0 %605  ;;  %v610_v10 = vpop.permute.xlu1 %609 }
  0x8e   : > { %797 = vst.msk [vmem:[#allocation2 + $0x8] sm:$0xff] %vm795_vm1, %v606_v9  ;;  %799 = vst.msk [vmem:[#allocation2 + $0x18] sm:$0xff] %vm795_vm1, %v610_v10 }
  0x8f   : > { %723 = vrot.lane.b32.xlu0 %v535_v7, %s5236_s12  ;;  %725 = vrot.lane.b32.xlu1 %v536_v8, %s5236_s12 }
  0x91   : > { %v860_v13 = vld [vmem:[#allocation2] sm:$0xff]  ;;  %v612_v14 = vpop.permute.xlu0 %611  ;;  %v614_v15 = vpop.permute.xlu1 %613  ;;  %v862_v21 = vld [vmem:[#allocation2 + $0x10] sm:$0xff] }
  0x92   : > { %4591 = vmatprep.mubr.msk.f32.mxu0 %vm934_vm2, %v860_v13  ;;  %800 = vst.msk [vmem:[#allocation2 + $0x20] sm:$0xff] %vm795_vm1, %v612_v14  ;;  %801 = vst.msk [vmem:[#allocation2 + $0x28] sm:$0xff] %vm795_vm1, %v614_v15 }
  0x93   : > { %727 = vrot.lane.b32.xlu0 %v537_v11, %s5236_s12  ;;  %729 = vrot.lane.b32.xlu1 %v538_v12, %s5236_s12 }
  0x95   : > { %v861_v23 = vld [vmem:[#allocation2 + $0x8] sm:$0xff]  ;;  %v616_v24 = vpop.permute.xlu0 %615  ;;  %v618_v25 = vpop.permute.xlu1 %617  ;;  %v863_v26 = vld [vmem:[#allocation2 + $0x18] sm:$0xff] }
  0x96   : > { %4592 = vmatmul.mubr.msk.f32.vlgmr.msra.gmra.mrb[0].mxu0 %vm934_vm2, %v861_v23  ;;  %802 = vst.msk [vmem:[#allocation2 + $0x30] sm:$0xff] %vm795_vm1, %v616_v24  ;;  %803 = vst.msk [vmem:[#allocation2 + $0x38] sm:$0xff] %vm795_vm1, %v618_v25 }
  0x97   : > { %4594 = vmatprep.mubr.msk.f32.mxu0 %vm934_vm2, %v862_v21 }
  0x99   : > { %v620_v27 = vpop.permute.xlu0 %619  ;;  %v622_v28 = vpop.permute.xlu1 %621  ;;  %v864_v29 = vld [vmem:[#allocation2 + $0x20] sm:$0xff]  ;;  %v865_v30 = vld [vmem:[#allocation2 + $0x28] sm:$0xff] }
  0x9a   : > { %4595 = vmatmul.mubr.msk.f32.gmra.mrb[2].mxu0 %vm934_vm2, %v863_v26  ;;  %804 = vst.msk [vmem:[#allocation2 + $0x40] sm:$0xff] %vm795_vm1, %v620_v27  ;;  %805 = vst.msk [vmem:[#allocation2 + $0x48] sm:$0xff] %vm795_vm1, %v622_v28 }
  0x9b   : > { %4597 = vmatprep.mubr.msk.f32.mxu0 %vm934_vm2, %v864_v29 }
  0x9d   : > { %v624_v31 = vpop.permute.xlu0 %623  ;;  %v626_v32 = vpop.permute.xlu1 %625  ;;  %v866_v33 = vld [vmem:[#allocation2 + $0x30] sm:$0xff]  ;;  %v867_v34 = vld [vmem:[#allocation2 + $0x38] sm:$0xff] }
  0x9e   : > { %4598 = vmatmul.mubr.msk.f32.gmra.mrb[4].mxu0 %vm934_vm2, %v865_v30  ;;  %806 = vst.msk [vmem:[#allocation2 + $0x50] sm:$0xff] %vm795_vm1, %v624_v31  ;;  %807 = vst.msk [vmem:[#allocation2 + $0x58] sm:$0xff] %vm795_vm1, %v626_v32 }
  0x9f   : > { %4600 = vmatprep.mubr.msk.f32.mxu0 %vm934_vm2, %v866_v33 }
  0xa1   : > { %v628_v35 = vpop.permute.xlu0 %627  ;;  %v630_v36 = vpop.permute.xlu1 %629  ;;  %v868_v37 = vld [vmem:[#allocation2 + $0x40] sm:$0xff]  ;;  %v869_v38 = vld [vmem:[#allocation2 + $0x48] sm:$0xff] }
  0xa2   : > { %4601 = vmatmul.mubr.msk.f32.gmra.mrb[6].mxu0 %vm934_vm2, %v867_v34  ;;  %808 = vst.msk [vmem:[#allocation2 + $0x60] sm:$0xff] %vm795_vm1, %v628_v35  ;;  %809 = vst.msk [vmem:[#allocation2 + $0x68] sm:$0xff] %vm795_vm1, %v630_v36 }
  0xa3   : > { %4603 = vmatprep.mubr.msk.f32.mxu0 %vm934_vm2, %v868_v37 }
  0xa5   : > { %v632_v39 = vpop.permute.xlu0 %631  ;;  %v634_v40 = vpop.permute.xlu1 %633  ;;  %v870_v41 = vld [vmem:[#allocation2 + $0x50] sm:$0xff]  ;;  %v871_v42 = vld [vmem:[#allocation2 + $0x58] sm:$0xff] }
  0xa6   : > { %4604 = vmatmul.mubr.msk.f32.gmra.mrb[8].mxu0 %vm934_vm2, %v869_v38  ;;  %810 = vst.msk [vmem:[#allocation2 + $0x70] sm:$0xff] %vm795_vm1, %v632_v39  ;;  %811 = vst.msk [vmem:[#allocation2 + $0x78] sm:$0xff] %vm795_vm1, %v634_v40 }
  0xa7   : > { %4606 = vmatprep.mubr.msk.f32.mxu0 %vm934_vm2, %v870_v41 }
  0xa9   : > { %v636_v43 = vpop.permute.xlu0 %635  ;;  %v638_v44 = vpop.permute.xlu1 %637  ;;  %v872_v45 = vld [vmem:[#allocation2 + $0x60] sm:$0xff]  ;;  %v873_v46 = vld [vmem:[#allocation2 + $0x68] sm:$0xff] }
  0xaa   : > { %4607 = vmatmul.mubr.msk.f32.gmra.mrb[10].mxu0 %vm934_vm2, %v871_v42  ;;  %812 = vst.msk [vmem:[#allocation2 + $0x80] sm:$0xff] %vm795_vm1, %v636_v43  ;;  %813 = vst.msk [vmem:[#allocation2 + $0x88] sm:$0xff] %vm795_vm1, %v638_v44 }
  0xab   : > { %4609 = vmatprep.mubr.msk.f32.mxu0 %vm934_vm2, %v872_v45 }
  0xad   : > { %v640_v47 = vpop.permute.xlu0 %639  ;;  %v642_v48 = vpop.permute.xlu1 %641  ;;  %v874_v49 = vld [vmem:[#allocation2 + $0x70] sm:$0xff]  ;;  %v875_v50 = vld [vmem:[#allocation2 + $0x78] sm:$0xff] }
  0xae   : > { %4610 = vmatmul.mubr.msk.f32.gmra.mrb[12].mxu0 %vm934_vm2, %v873_v46  ;;  %814 = vst.msk [vmem:[#allocation2 + $0x90] sm:$0xff] %vm795_vm1, %v640_v47  ;;  %815 = vst.msk [vmem:[#allocation2 + $0x98] sm:$0xff] %vm795_vm1, %v642_v48  ;;  %v1580_v46 = vld [vmem:[%s6588_s3 + $0x20] sm:$0xff]  ;;  %v1581_v47 = vld [vmem:[%s6588_s3 + $0x28] sm:$0xff] }
  0xaf   : > { %4612 = vmatprep.mubr.msk.f32.mxu0 %vm934_vm2, %v874_v49  ;;  %v5031_v49 = vpack.c.bf16 %v1581_v47, %v1580_v46 }
  0xb1   : > { %v644_v51 = vpop.permute.xlu0 %643  ;;  %v646_v52 = vpop.permute.xlu1 %645  ;;  %v876_v53 = vld [vmem:[#allocation2 + $0x80] sm:$0xff]  ;;  %v877_v54 = vld [vmem:[#allocation2 + $0x88] sm:$0xff]  ;;  %5032 = vmatprep.subr.bf16.mxu1 %v5031_v49 }
  0xb2   : > { %4613 = vmatmul.mubr.msk.f32.gmra.mrb[14].mxu0 %vm934_vm2, %v875_v50  ;;  %816 = vst.msk [vmem:[#allocation2 + $0xa0] sm:$0xff] %vm795_vm1, %v644_v51  ;;  %817 = vst.msk [vmem:[#allocation2 + $0xa8] sm:$0xff] %vm795_vm1, %v646_v52  ;;  %5034 = vmatpush3.bf16.msra.mxu1 %v5031_v49 }
  0xb3   : > { %4615 = vmatprep.mubr.msk.f32.mxu0 %vm934_vm2, %v876_v53 }
  0xb5   : > { %v648_v55 = vpop.permute.xlu0 %647  ;;  %v650_v56 = vpop.permute.xlu1 %649  ;;  %v878_v57 = vld [vmem:[#allocation2 + $0x90] sm:$0xff]  ;;  %v879_v58 = vld [vmem:[#allocation2 + $0x98] sm:$0xff] }
  0xb6   : > { %4616 = vmatmul.mubr.msk.f32.gmra.mrb[16].mxu0 %vm934_vm2, %v877_v54  ;;  %818 = vst.msk [vmem:[#allocation2 + $0xb0] sm:$0xff] %vm795_vm1, %v648_v55  ;;  %819 = vst.msk [vmem:[#allocation2 + $0xb8] sm:$0xff] %vm795_vm1, %v650_v56 }
  0xb7   : > { %4618 = vmatprep.mubr.msk.f32.mxu0 %vm934_vm2, %v878_v57 }
  0xb9   : > { %v652_v59 = vpop.permute.xlu0 %651  ;;  %v654_v60 = vpop.permute.xlu1 %653  ;;  %v880_v61 = vld [vmem:[#allocation2 + $0xa0] sm:$0xff]  ;;  %v881_v62 = vld [vmem:[#allocation2 + $0xa8] sm:$0xff] }
  0xba   : > { %4619 = vmatmul.mubr.msk.f32.gmra.mrb[18].mxu0 %vm934_vm2, %v879_v58  ;;  %820 = vst.msk [vmem:[#allocation2 + $0xc0] sm:$0xff] %vm795_vm1, %v652_v59  ;;  %821 = vst.msk [vmem:[#allocation2 + $0xc8] sm:$0xff] %vm795_vm1, %v654_v60 }
  0xbb   : > { %4621 = vmatprep.mubr.msk.f32.mxu0 %vm934_vm2, %v880_v61 }
  0xbd   : > { %v656_v63 = vpop.permute.xlu0 %655  ;;  %v658_v0 = vpop.permute.xlu1 %657  ;;  %v882_v1 = vld [vmem:[#allocation2 + $0xb0] sm:$0xff]  ;;  %v883_v2 = vld [vmem:[#allocation2 + $0xb8] sm:$0xff] }
  0xbe   : > { %4622 = vmatmul.mubr.msk.f32.gmra.mrb[20].mxu0 %vm934_vm2, %v881_v62  ;;  %822 = vst.msk [vmem:[#allocation2 + $0xd0] sm:$0xff] %vm795_vm1, %v656_v63  ;;  %823 = vst.msk [vmem:[#allocation2 + $0xd8] sm:$0xff] %vm795_vm1, %v658_v0 }
  0xbf   : > { %4624 = vmatprep.mubr.msk.f32.mxu0 %vm934_vm2, %v882_v1 }
  0xc1   : > { %v660_v3 = vpop.permute.xlu0 %659  ;;  %v662_v4 = vpop.permute.xlu1 %661  ;;  %v884_v5 = vld [vmem:[#allocation2 + $0xc0] sm:$0xff]  ;;  %v885_v6 = vld [vmem:[#allocation2 + $0xc8] sm:$0xff] }
  0xc2   : > { %4625 = vmatmul.mubr.msk.f32.gmra.mrb[22].mxu0 %vm934_vm2, %v883_v2  ;;  %824 = vst.msk [vmem:[#allocation2 + $0xe0] sm:$0xff] %vm795_vm1, %v660_v3  ;;  %825 = vst.msk [vmem:[#allocation2 + $0xe8] sm:$0xff] %vm795_vm1, %v662_v4 }
  0xc3   : > { %4627 = vmatprep.mubr.msk.f32.mxu0 %vm934_vm2, %v884_v5 }
  0xc5   : > { %v664_v7 = vpop.permute.xlu0 %663  ;;  %v666_v8 = vpop.permute.xlu1 %665  ;;  %v886_v9 = vld [vmem:[#allocation2 + $0xd0] sm:$0xff]  ;;  %v887_v10 = vld [vmem:[#allocation2 + $0xd8] sm:$0xff] }
  0xc6   : > { %4628 = vmatmul.mubr.msk.f32.gmra.mrb[24].mxu0 %vm934_vm2, %v885_v6  ;;  %826 = vst.msk [vmem:[#allocation2 + $0xf0] sm:$0xff] %vm795_vm1, %v664_v7  ;;  %827 = vst.msk [vmem:[#allocation2 + $0xf8] sm:$0xff] %vm795_vm1, %v666_v8 }
  0xc7   : > { %4630 = vmatprep.mubr.msk.f32.mxu0 %vm934_vm2, %v886_v9 }
  0xc9   : > { %v668_v11 = vpop.permute.xlu0 %667  ;;  %v670_v12 = vpop.permute.xlu1 %669  ;;  %v888_v13 = vld [vmem:[#allocation2 + $0xe0] sm:$0xff]  ;;  %v889_v14 = vld [vmem:[#allocation2 + $0xe8] sm:$0xff] }
  0xca   : > { %4631 = vmatmul.mubr.msk.f32.gmra.mrb[26].mxu0 %vm934_vm2, %v887_v10  ;;  %828 = vst.msk [vmem:[#allocation2 + $0x100] sm:$0xff] %vm795_vm1, %v668_v11  ;;  %829 = vst.msk [vmem:[#allocation2 + $0x108] sm:$0xff] %vm795_vm1, %v670_v12 }
  0xcb   : > { %4633 = vmatprep.mubr.msk.f32.mxu0 %vm934_vm2, %v888_v13 }
  0xcd   : > { %v672_v15 = vpop.permute.xlu0 %671  ;;  %v674_v16 = vpop.permute.xlu1 %673  ;;  %v890_v17 = vld [vmem:[#allocation2 + $0xf0] sm:$0xff]  ;;  %v891_v18 = vld [vmem:[#allocation2 + $0xf8] sm:$0xff] }
  0xce   : > { %4634 = vmatmul.mubr.msk.f32.gmra.mrb[28].mxu0 %vm934_vm2, %v889_v14  ;;  %830 = vst.msk [vmem:[#allocation2 + $0x110] sm:$0xff] %vm795_vm1, %v672_v15  ;;  %831 = vst.msk [vmem:[#allocation2 + $0x118] sm:$0xff] %vm795_vm1, %v674_v16 }
  0xcf   : > { %4636 = vmatprep.mubr.msk.f32.mxu0 %vm934_vm2, %v890_v17 }
  0xd1   : > { %v676_v19 = vpop.permute.xlu0 %675  ;;  %v678_v20 = vpop.permute.xlu1 %677  ;;  %v892_v21 = vld [vmem:[#allocation2 + $0x100] sm:$0xff]  ;;  %v893_v22 = vld [vmem:[#allocation2 + $0x108] sm:$0xff] }
  0xd2   : > { %4637 = vmatmul.mubr.msk.f32.gmra.mrb[30].mxu0 %vm934_vm2, %v891_v18  ;;  %832 = vst.msk [vmem:[#allocation2 + $0x120] sm:$0xff] %vm795_vm1, %v676_v19  ;;  %833 = vst.msk [vmem:[#allocation2 + $0x128] sm:$0xff] %vm795_vm1, %v678_v20  ;;  %v2227_v18 = vld [vmem:[%s6589_s4] sm:$0xff]  ;;  %v2228_v19 = vld [vmem:[%s6589_s4 + $0x8] sm:$0xff] }
  0xd3   : > { %4639 = vmatprep.mubr.msk.f32.mxu0 %vm934_vm2, %v892_v21  ;;  %v5035_v20 = vpack.c.bf16 %v2228_v19, %v2227_v18  ;;  %v5753_v21 = vld [vmem:[%s6591_s6] ss:$0 sm:$0xff] }
  0xd5   : > { %v680_v23 = vpop.permute.xlu0 %679  ;;  %v682_v24 = vpop.permute.xlu1 %681  ;;  %v894_v25 = vld [vmem:[#allocation2 + $0x110] sm:$0xff]  ;;  %v895_v26 = vld [vmem:[#allocation2 + $0x118] sm:$0xff]  ;;  %5036 = vmatprep.subr.bf16.mxu0 %v5035_v20 }
  0xd6   : > { %4640 = vmatmul.mubr.msk.f32.gmra.mrb[32].mxu0 %vm934_vm2, %v893_v22  ;;  %834 = vst.msk [vmem:[#allocation2 + $0x130] sm:$0xff] %vm795_vm1, %v680_v23  ;;  %835 = vst.msk [vmem:[#allocation2 + $0x138] sm:$0xff] %vm795_vm1, %v682_v24 }
  0xd7   : > { %4642 = vmatprep.mubr.msk.f32.mxu0 %vm934_vm2, %v894_v25  ;;  %5038 = vmatpush3.bf16.msra.mxu0 %v5035_v20 }
  0xd9   : > { %v684_v27 = vpop.permute.xlu0 %683  ;;  %v686_v28 = vpop.permute.xlu1 %685  ;;  %v896_v29 = vld [vmem:[#allocation2 + $0x120] sm:$0xff]  ;;  %v897_v30 = vld [vmem:[#allocation2 + $0x128] sm:$0xff] }
  0xda   : > { %4643 = vmatmul.mubr.msk.f32.gmra.mrb[34].mxu0 %vm934_vm2, %v895_v26  ;;  %836 = vst.msk [vmem:[#allocation2 + $0x140] sm:$0xff] %vm795_vm1, %v684_v27  ;;  %837 = vst.msk [vmem:[#allocation2 + $0x148] sm:$0xff] %vm795_vm1, %v686_v28  ;;  %v2229_v26 = vld [vmem:[%s6589_s4 + $0x10] sm:$0xff]  ;;  %v2230_v27 = vld [vmem:[%s6589_s4 + $0x18] sm:$0xff] }
  0xdb   : > { %4645 = vmatprep.mubr.msk.f32.mxu0 %vm934_vm2, %v896_v29 }
  0xdd   : > { %v688_v31 = vpop.permute.xlu0 %687  ;;  %v690_v32 = vpop.permute.xlu1 %689  ;;  %v898_v33 = vld [vmem:[#allocation2 + $0x130] sm:$0xff]  ;;  %v899_v34 = vld [vmem:[#allocation2 + $0x138] sm:$0xff] }
  0xde   : > { %4646 = vmatmul.mubr.msk.f32.gmra.mrb[36].mxu0 %vm934_vm2, %v897_v30  ;;  %838 = vst.msk [vmem:[#allocation2 + $0x150] sm:$0xff] %vm795_vm1, %v688_v31  ;;  %839 = vst.msk [vmem:[#allocation2 + $0x158] sm:$0xff] %vm795_vm1, %v690_v32  ;;  %v5039_v30 = vpack.c.bf16 %v2230_v27, %v2229_v26 }
  0xdf   : > { %4648 = vmatprep.mubr.msk.f32.mxu0 %vm934_vm2, %v898_v33 }
  0xe0   : > { %5040 = vmatprep.subr.bf16.mxu0 %v5039_v30 }
  0xe1   : > { %v692_v35 = vpop.permute.xlu0 %691  ;;  %v694_v36 = vpop.permute.xlu1 %693  ;;  %v900_v37 = vld [vmem:[#allocation2 + $0x140] sm:$0xff]  ;;  %v901_v38 = vld [vmem:[#allocation2 + $0x148] sm:$0xff]  ;;  %5042 = vmatpush3.bf16.msra.mxu0 %v5039_v30 }
  0xe2   : > { %4649 = vmatmul.mubr.msk.f32.gmra.mrb[38].mxu0 %vm934_vm2, %v899_v34  ;;  %840 = vst.msk [vmem:[#allocation2 + $0x160] sm:$0xff] %vm795_vm1, %v692_v35  ;;  %841 = vst.msk [vmem:[#allocation2 + $0x168] sm:$0xff] %vm795_vm1, %v694_v36 }
  0xe3   : > { %4651 = vmatprep.mubr.msk.f32.mxu0 %vm934_vm2, %v900_v37 }
  0xe5   : > { %v696_v39 = vpop.permute.xlu0 %695  ;;  %v698_v40 = vpop.permute.xlu1 %697  ;;  %v902_v41 = vld [vmem:[#allocation2 + $0x150] sm:$0xff]  ;;  %v903_v42 = vld [vmem:[#allocation2 + $0x158] sm:$0xff] }
  0xe6   : > { %4652 = vmatmul.mubr.msk.f32.gmra.mrb[40].mxu0 %vm934_vm2, %v901_v38  ;;  %842 = vst.msk [vmem:[#allocation2 + $0x170] sm:$0xff] %vm795_vm1, %v696_v39  ;;  %843 = vst.msk [vmem:[#allocation2 + $0x178] sm:$0xff] %vm795_vm1, %v698_v40 }
  0xe7   : > { %4654 = vmatprep.mubr.msk.f32.mxu0 %vm934_vm2, %v902_v41 }
  0xe9   : > { %v700_v43 = vpop.permute.xlu0 %699  ;;  %v702_v44 = vpop.permute.xlu1 %701  ;;  %v904_v45 = vld [vmem:[#allocation2 + $0x160] sm:$0xff]  ;;  %v905_v48 = vld [vmem:[#allocation2 + $0x168] sm:$0xff] }
  0xea   : > { %4655 = vmatmul.mubr.msk.f32.gmra.mrb[42].mxu0 %vm934_vm2, %v903_v42  ;;  %844 = vst.msk [vmem:[#allocation2 + $0x180] sm:$0xff] %vm795_vm1, %v700_v43  ;;  %845 = vst.msk [vmem:[#allocation2 + $0x188] sm:$0xff] %vm795_vm1, %v702_v44 }
  0xeb   : > { %4657 = vmatprep.mubr.msk.f32.mxu0 %vm934_vm2, %v904_v45 }
  0xed   : > { %v704_v50 = vpop.permute.xlu0 %703  ;;  %v706_v51 = vpop.permute.xlu1 %705  ;;  %v906_v52 = vld [vmem:[#allocation2 + $0x170] sm:$0xff]  ;;  %v907_v53 = vld [vmem:[#allocation2 + $0x178] sm:$0xff] }
  0xee   : > { %4658 = vmatmul.mubr.msk.f32.gmra.mrb[44].mxu0 %vm934_vm2, %v905_v48  ;;  %846 = vst.msk [vmem:[#allocation2 + $0x190] sm:$0xff] %vm795_vm1, %v704_v50  ;;  %847 = vst.msk [vmem:[#allocation2 + $0x198] sm:$0xff] %vm795_vm1, %v706_v51 }
  0xef   : > { %4660 = vmatprep.mubr.msk.f32.mxu0 %vm934_vm2, %v906_v52 }
  0xf1   : > { %v708_v54 = vpop.permute.xlu0 %707  ;;  %v710_v55 = vpop.permute.xlu1 %709  ;;  %v908_v56 = vld [vmem:[#allocation2 + $0x180] sm:$0xff]  ;;  %v909_v57 = vld [vmem:[#allocation2 + $0x188] sm:$0xff] }
  0xf2   : > { %4661 = vmatmul.mubr.msk.f32.gmra.mrb[46].mxu0 %vm934_vm2, %v907_v53  ;;  %848 = vst.msk [vmem:[#allocation2 + $0x1a0] sm:$0xff] %vm795_vm1, %v708_v54  ;;  %849 = vst.msk [vmem:[#allocation2 + $0x1a8] sm:$0xff] %vm795_vm1, %v710_v55 }
  0xf3   : > { %4663 = vmatprep.mubr.msk.f32.mxu0 %vm934_vm2, %v908_v56 }
  0xf5   : > { %v712_v58 = vpop.permute.xlu0 %711  ;;  %v714_v59 = vpop.permute.xlu1 %713  ;;  %v910_v60 = vld [vmem:[#allocation2 + $0x190] sm:$0xff]  ;;  %v911_v61 = vld [vmem:[#allocation2 + $0x198] sm:$0xff] }
  0xf6   : > { %4664 = vmatmul.mubr.msk.f32.gmra.mrb[48].mxu0 %vm934_vm2, %v909_v57  ;;  %850 = vst.msk [vmem:[#allocation2 + $0x1b0] sm:$0xff] %vm795_vm1, %v712_v58  ;;  %851 = vst.msk [vmem:[#allocation2 + $0x1b8] sm:$0xff] %vm795_vm1, %v714_v59 }
  0xf7   : > { %4666 = vmatprep.mubr.msk.f32.mxu0 %vm934_vm2, %v910_v60 }
  0xf9   : > { %v716_v62 = vpop.permute.xlu0 %715  ;;  %v718_v63 = vpop.permute.xlu1 %717  ;;  %v912_v0 = vld [vmem:[#allocation2 + $0x1a0] sm:$0xff]  ;;  %v913_v1 = vld [vmem:[#allocation2 + $0x1a8] sm:$0xff] }
  0xfa   : > { %4667 = vmatmul.mubr.msk.f32.gmra.mrb[50].mxu0 %vm934_vm2, %v911_v61  ;;  %852 = vst.msk [vmem:[#allocation2 + $0x1c0] sm:$0xff] %vm795_vm1, %v716_v62  ;;  %853 = vst.msk [vmem:[#allocation2 + $0x1c8] sm:$0xff] %vm795_vm1, %v718_v63 }
  0xfb   : > { %4669 = vmatprep.mubr.msk.f32.mxu0 %vm934_vm2, %v912_v0 }
  0xfd   : > { %v720_v2 = vpop.permute.xlu0 %719  ;;  %v722_v3 = vpop.permute.xlu1 %721  ;;  %v914_v4 = vld [vmem:[#allocation2 + $0x1b0] sm:$0xff]  ;;  %v915_v5 = vld [vmem:[#allocation2 + $0x1b8] sm:$0xff] }
  0xfe   : > { %4670 = vmatmul.mubr.msk.f32.gmra.mrb[52].mxu0 %vm934_vm2, %v913_v1  ;;  %854 = vst.msk [vmem:[#allocation2 + $0x1d0] sm:$0xff] %vm795_vm1, %v720_v2  ;;  %855 = vst.msk [vmem:[#allocation2 + $0x1d8] sm:$0xff] %vm795_vm1, %v722_v3 }
  0xff   : > { %4672 = vmatprep.mubr.msk.f32.mxu0 %vm934_vm2, %v914_v4 }
 0x101   : > { %v724_v6 = vpop.permute.xlu0 %723  ;;  %v726_v7 = vpop.permute.xlu1 %725  ;;  %v916_v8 = vld [vmem:[#allocation2 + $0x1c0] sm:$0xff]  ;;  %v917_v9 = vld [vmem:[#allocation2 + $0x1c8] sm:$0xff] }
 0x102   : > { %4673 = vmatmul.mubr.msk.f32.gmra.mrb[54].mxu0 %vm934_vm2, %v915_v5  ;;  %856 = vst.msk [vmem:[#allocation2 + $0x1e0] sm:$0xff] %vm795_vm1, %v724_v6  ;;  %857 = vst.msk [vmem:[#allocation2 + $0x1e8] sm:$0xff] %vm795_vm1, %v726_v7 }
 0x103   : > { %4675 = vmatprep.mubr.msk.f32.mxu0 %vm934_vm2, %v916_v8 }
 0x105   : > { %v728_v10 = vpop.permute.xlu0 %727  ;;  %v730_v11 = vpop.permute.xlu1 %729  ;;  %v918_v12 = vld [vmem:[#allocation2 + $0x1d0] sm:$0xff]  ;;  %v919_v13 = vld [vmem:[#allocation2 + $0x1d8] sm:$0xff] }
 0x106   : > { %4676 = vmatmul.mubr.msk.f32.gmra.mrb[56].mxu0 %vm934_vm2, %v917_v9  ;;  %858 = vst.msk [vmem:[#allocation2 + $0x1f0] sm:$0xff] %vm795_vm1, %v728_v10  ;;  %859 = vst.msk [vmem:[#allocation2 + $0x1f8] sm:$0xff] %vm795_vm1, %v730_v11 }
 0x107   : > { %4678 = vmatprep.mubr.msk.f32.mxu0 %vm934_vm2, %v918_v12 }
 0x109   : > { %v920_v14 = vld [vmem:[#allocation2 + $0x1e0] sm:$0xff]  ;;  %v921_v15 = vld [vmem:[#allocation2 + $0x1e8] sm:$0xff] }
 0x10a   : > { %4679 = vmatmul.mubr.msk.f32.gmra.mrb[58].mxu0 %vm934_vm2, %v919_v13 }
 0x10b   : > { %4681 = vmatprep.mubr.msk.f32.mxu0 %vm934_vm2, %v920_v14 }
 0x10d   : > { %v922_v16 = vld [vmem:[#allocation2 + $0x1f0] sm:$0xff]  ;;  %v923_v17 = vld [vmem:[#allocation2 + $0x1f8] sm:$0xff] }
 0x10e   : > { %4682 = vmatmul.mubr.msk.f32.gmra.mrb[60].mxu0 %vm934_vm2, %v921_v15 }
 0x10f   : > { %4684 = vmatprep.mubr.msk.f32.mxu0 %vm934_vm2, %v922_v16 }
 0x112   : > { %4685 = vmatmul.mubr.msk.f32.gmra.mrb[62].mxu0 %vm934_vm2, %v923_v17 }
 0x169   : > { %v4593_v22 = vpop.f32.mrb[0].mxu0 }
 0x16a   : > { %v1199_v23 = vadd.f32 %v4593_v22, %v5753_v21  ;;  %v1193_v24 = vpop.f32.mrb[1].mxu0 }
 0x16b   : > { %v1194_v25 = vadd.f32 %v5753_v21, %v1193_v24 }
 0x16c   : > { %v1513_v31 = vmax.f32 %v1199_v23, 0.0 }
 0x16d   : > { %v1512_v28 = vmax.f32 %v1194_v25, 0.0  ;;  %v4596_v29 = vpop.f32.mrb[2].mxu0 }
 0x16e   : > { %v1209_v32 = vadd.f32 %v4596_v29, %v5753_v21  ;;  %v1203_v33 = vpop.f32.mrb[3].mxu0 }
 0x16f   : > { %v1204_v34 = vadd.f32 %v5753_v21, %v1203_v33  ;;  %4699 = vmatprep.mubr.msk.f32.mxu1 %vm934_vm2, %v1512_v28 }
 0x170   : > { %4700 = vmatmul.mubr.msk.f32.vlgmr.msra.gmra.mrb[0].mxu1 %vm934_vm2, %v1513_v31  ;;  %v1515_v37 = vmax.f32 %v1209_v32, 0.0 }
 0x171   : > { %v1514_v35 = vmax.f32 %v1204_v34, 0.0  ;;  %v4599_v36 = vpop.f32.mrb[4].mxu0 }
 0x172   : > { %v1219_v38 = vadd.f32 %v4599_v36, %v5753_v21  ;;  %v1213_v39 = vpop.f32.mrb[5].mxu0 }
 0x173   : > { %v1214_v40 = vadd.f32 %v5753_v21, %v1213_v39  ;;  %4702 = vmatprep.mubr.msk.f32.mxu1 %vm934_vm2, %v1514_v35 }
 0x174   : > { %4703 = vmatmul.mubr.msk.f32.gmra.mrb[2].mxu1 %vm934_vm2, %v1515_v37  ;;  %v1517_v43 = vmax.f32 %v1219_v38, 0.0 }
 0x175   : > { %v1516_v41 = vmax.f32 %v1214_v40, 0.0  ;;  %v4602_v42 = vpop.f32.mrb[6].mxu0 }
 0x176   : > { %v1229_v44 = vadd.f32 %v4602_v42, %v5753_v21  ;;  %v1223_v45 = vpop.f32.mrb[7].mxu0 }
 0x177   : > { %v1224_v46 = vadd.f32 %v5753_v21, %v1223_v45  ;;  %4705 = vmatprep.mubr.msk.f32.mxu1 %vm934_vm2, %v1516_v41 }
 0x178   : > { %4706 = vmatmul.mubr.msk.f32.gmra.mrb[4].mxu1 %vm934_vm2, %v1517_v43  ;;  %v1519_v49 = vmax.f32 %v1229_v44, 0.0 }
 0x179   : > { %v1518_v47 = vmax.f32 %v1224_v46, 0.0  ;;  %v4605_v48 = vpop.f32.mrb[8].mxu0 }
 0x17a   : > { %v1239_v50 = vadd.f32 %v4605_v48, %v5753_v21  ;;  %v1233_v51 = vpop.f32.mrb[9].mxu0 }
 0x17b   : > { %v1234_v52 = vadd.f32 %v5753_v21, %v1233_v51  ;;  %4708 = vmatprep.mubr.msk.f32.mxu1 %vm934_vm2, %v1518_v47 }
 0x17c   : > { %4709 = vmatmul.mubr.msk.f32.gmra.mrb[6].mxu1 %vm934_vm2, %v1519_v49  ;;  %v1521_v55 = vmax.f32 %v1239_v50, 0.0 }
 0x17d   : > { %v1520_v53 = vmax.f32 %v1234_v52, 0.0  ;;  %v4608_v54 = vpop.f32.mrb[10].mxu0 }
 0x17e   : > { %v1249_v56 = vadd.f32 %v4608_v54, %v5753_v21  ;;  %v1243_v57 = vpop.f32.mrb[11].mxu0 }
 0x17f   : > { %v1244_v58 = vadd.f32 %v5753_v21, %v1243_v57  ;;  %4711 = vmatprep.mubr.msk.f32.mxu1 %vm934_vm2, %v1520_v53 }
 0x180   : > { %4712 = vmatmul.mubr.msk.f32.gmra.mrb[8].mxu1 %vm934_vm2, %v1521_v55  ;;  %v1523_v61 = vmax.f32 %v1249_v56, 0.0 }
 0x181   : > { %v1522_v59 = vmax.f32 %v1244_v58, 0.0  ;;  %v4611_v60 = vpop.f32.mrb[12].mxu0 }
 0x182   : > { %v1259_v62 = vadd.f32 %v4611_v60, %v5753_v21  ;;  %v1253_v63 = vpop.f32.mrb[13].mxu0 }
 0x183   : > { %v1254_v0 = vadd.f32 %v5753_v21, %v1253_v63  ;;  %4714 = vmatprep.mubr.msk.f32.mxu1 %vm934_vm2, %v1522_v59 }
 0x184   : > { %4715 = vmatmul.mubr.msk.f32.gmra.mrb[10].mxu1 %vm934_vm2, %v1523_v61  ;;  %v1525_v3 = vmax.f32 %v1259_v62, 0.0 }
 0x185   : > { %v1524_v1 = vmax.f32 %v1254_v0, 0.0  ;;  %v4614_v2 = vpop.f32.mrb[14].mxu0 }
 0x186   : > { %v1269_v4 = vadd.f32 %v4614_v2, %v5753_v21  ;;  %v1263_v5 = vpop.f32.mrb[15].mxu0 }
 0x187   : > { %v1264_v6 = vadd.f32 %v5753_v21, %v1263_v5  ;;  %4717 = vmatprep.mubr.msk.f32.mxu1 %vm934_vm2, %v1524_v1 }
 0x188   : > { %4718 = vmatmul.mubr.msk.f32.gmra.mrb[12].mxu1 %vm934_vm2, %v1525_v3  ;;  %v1527_v9 = vmax.f32 %v1269_v4, 0.0 }
 0x189   : > { %v1526_v7 = vmax.f32 %v1264_v6, 0.0  ;;  %v4617_v8 = vpop.f32.mrb[16].mxu0 }
 0x18a   : > { %v1279_v10 = vadd.f32 %v4617_v8, %v5753_v21  ;;  %v1273_v11 = vpop.f32.mrb[17].mxu0 }
 0x18b   : > { %v1274_v12 = vadd.f32 %v5753_v21, %v1273_v11  ;;  %4720 = vmatprep.mubr.msk.f32.mxu1 %vm934_vm2, %v1526_v7 }
 0x18c   : > { %4721 = vmatmul.mubr.msk.f32.gmra.mrb[14].mxu1 %vm934_vm2, %v1527_v9  ;;  %v1529_v15 = vmax.f32 %v1279_v10, 0.0 }
 0x18d   : > { %v1528_v13 = vmax.f32 %v1274_v12, 0.0  ;;  %v4620_v14 = vpop.f32.mrb[18].mxu0 }
 0x18e   : > { %v1289_v16 = vadd.f32 %v4620_v14, %v5753_v21  ;;  %v1283_v17 = vpop.f32.mrb[19].mxu0 }
 0x18f   : > { %v1284_v18 = vadd.f32 %v5753_v21, %v1283_v17  ;;  %4723 = vmatprep.mubr.msk.f32.mxu1 %vm934_vm2, %v1528_v13 }
 0x190   : > { %4724 = vmatmul.mubr.msk.f32.gmra.mrb[16].mxu1 %vm934_vm2, %v1529_v15  ;;  %v1531_v22 = vmax.f32 %v1289_v16, 0.0 }
 0x191   : > { %v1530_v19 = vmax.f32 %v1284_v18, 0.0  ;;  %v4623_v20 = vpop.f32.mrb[20].mxu0 }
 0x192   : > { %v1299_v23 = vadd.f32 %v4623_v20, %v5753_v21  ;;  %v1293_v24 = vpop.f32.mrb[21].mxu0 }
 0x193   : > { %v1294_v25 = vadd.f32 %v5753_v21, %v1293_v24  ;;  %4726 = vmatprep.mubr.msk.f32.mxu1 %vm934_vm2, %v1530_v19 }
 0x194   : > { %4727 = vmatmul.mubr.msk.f32.gmra.mrb[18].mxu1 %vm934_vm2, %v1531_v22  ;;  %v1533_v28 = vmax.f32 %v1299_v23, 0.0 }
 0x195   : > { %v1532_v26 = vmax.f32 %v1294_v25, 0.0  ;;  %v4626_v27 = vpop.f32.mrb[22].mxu0 }
 0x196   : > { %v1309_v29 = vadd.f32 %v4626_v27, %v5753_v21  ;;  %v1303_v30 = vpop.f32.mrb[23].mxu0 }
 0x197   : > { %v1304_v31 = vadd.f32 %v5753_v21, %v1303_v30  ;;  %4729 = vmatprep.mubr.msk.f32.mxu1 %vm934_vm2, %v1532_v26 }
 0x198   : > { %4730 = vmatmul.mubr.msk.f32.gmra.mrb[20].mxu1 %vm934_vm2, %v1533_v28  ;;  %v1535_v34 = vmax.f32 %v1309_v29, 0.0 }
 0x199   : > { %v1534_v32 = vmax.f32 %v1304_v31, 0.0  ;;  %v4629_v33 = vpop.f32.mrb[24].mxu0 }
 0x19a   : > { %v1319_v35 = vadd.f32 %v4629_v33, %v5753_v21  ;;  %v1313_v36 = vpop.f32.mrb[25].mxu0 }
 0x19b   : > { %v1314_v37 = vadd.f32 %v5753_v21, %v1313_v36  ;;  %4732 = vmatprep.mubr.msk.f32.mxu1 %vm934_vm2, %v1534_v32 }
 0x19c   : > { %4733 = vmatmul.mubr.msk.f32.gmra.mrb[22].mxu1 %vm934_vm2, %v1535_v34  ;;  %v1537_v40 = vmax.f32 %v1319_v35, 0.0 }
 0x19d   : > { %v1536_v38 = vmax.f32 %v1314_v37, 0.0  ;;  %v4632_v39 = vpop.f32.mrb[26].mxu0 }
 0x19e   : > { %v1329_v41 = vadd.f32 %v4632_v39, %v5753_v21  ;;  %v1323_v42 = vpop.f32.mrb[27].mxu0 }
 0x19f   : > { %v1324_v43 = vadd.f32 %v5753_v21, %v1323_v42  ;;  %4735 = vmatprep.mubr.msk.f32.mxu1 %vm934_vm2, %v1536_v38 }
 0x1a0   : > { %4736 = vmatmul.mubr.msk.f32.gmra.mrb[24].mxu1 %vm934_vm2, %v1537_v40  ;;  %v1539_v46 = vmax.f32 %v1329_v41, 0.0 }
 0x1a1   : > { %v1538_v44 = vmax.f32 %v1324_v43, 0.0  ;;  %v4635_v45 = vpop.f32.mrb[28].mxu0 }
 0x1a2   : > { %v1339_v47 = vadd.f32 %v4635_v45, %v5753_v21  ;;  %v1333_v48 = vpop.f32.mrb[29].mxu0 }
 0x1a3   : > { %v1334_v49 = vadd.f32 %v5753_v21, %v1333_v48  ;;  %4738 = vmatprep.mubr.msk.f32.mxu1 %vm934_vm2, %v1538_v44 }
 0x1a4   : > { %4739 = vmatmul.mubr.msk.f32.gmra.mrb[26].mxu1 %vm934_vm2, %v1539_v46  ;;  %v1541_v52 = vmax.f32 %v1339_v47, 0.0 }
 0x1a5   : > { %v1540_v50 = vmax.f32 %v1334_v49, 0.0  ;;  %v4638_v51 = vpop.f32.mrb[30].mxu0 }
 0x1a6   : > { %v1349_v53 = vadd.f32 %v4638_v51, %v5753_v21  ;;  %v1343_v54 = vpop.f32.mrb[31].mxu0 }
 0x1a7   : > { %v1344_v55 = vadd.f32 %v5753_v21, %v1343_v54  ;;  %4741 = vmatprep.mubr.msk.f32.mxu1 %vm934_vm2, %v1540_v50 }
 0x1a8   : > { %4742 = vmatmul.mubr.msk.f32.gmra.mrb[28].mxu1 %vm934_vm2, %v1541_v52  ;;  %v1543_v58 = vmax.f32 %v1349_v53, 0.0 }
 0x1a9   : > { %v1542_v56 = vmax.f32 %v1344_v55, 0.0  ;;  %v4641_v57 = vpop.f32.mrb[32].mxu0 }
 0x1aa   : > { %v1359_v59 = vadd.f32 %v4641_v57, %v5753_v21  ;;  %v1353_v60 = vpop.f32.mrb[33].mxu0 }
 0x1ab   : > { %v1354_v61 = vadd.f32 %v5753_v21, %v1353_v60  ;;  %4744 = vmatprep.mubr.msk.f32.mxu1 %vm934_vm2, %v1542_v56 }
 0x1ac   : > { %4745 = vmatmul.mubr.msk.f32.gmra.mrb[30].mxu1 %vm934_vm2, %v1543_v58  ;;  %v1545_v0 = vmax.f32 %v1359_v59, 0.0 }
 0x1ad   : > { %v1544_v62 = vmax.f32 %v1354_v61, 0.0  ;;  %v4644_v63 = vpop.f32.mrb[34].mxu0 }
 0x1ae   : > { %v1369_v1 = vadd.f32 %v4644_v63, %v5753_v21  ;;  %v1363_v2 = vpop.f32.mrb[35].mxu0 }
 0x1af   : > { %v1364_v3 = vadd.f32 %v5753_v21, %v1363_v2  ;;  %4747 = vmatprep.mubr.msk.f32.mxu1 %vm934_vm2, %v1544_v62 }
 0x1b0   : > { %4748 = vmatmul.mubr.msk.f32.gmra.mrb[32].mxu1 %vm934_vm2, %v1545_v0  ;;  %v1547_v6 = vmax.f32 %v1369_v1, 0.0 }
 0x1b1   : > { %v1546_v4 = vmax.f32 %v1364_v3, 0.0  ;;  %v4647_v5 = vpop.f32.mrb[36].mxu0 }
 0x1b2   : > { %v1379_v7 = vadd.f32 %v4647_v5, %v5753_v21  ;;  %v1373_v8 = vpop.f32.mrb[37].mxu0 }
 0x1b3   : > { %v1374_v9 = vadd.f32 %v5753_v21, %v1373_v8  ;;  %4750 = vmatprep.mubr.msk.f32.mxu1 %vm934_vm2, %v1546_v4 }
 0x1b4   : > { %4751 = vmatmul.mubr.msk.f32.gmra.mrb[34].mxu1 %vm934_vm2, %v1547_v6  ;;  %v1549_v12 = vmax.f32 %v1379_v7, 0.0 }
 0x1b5   : > { %v1548_v10 = vmax.f32 %v1374_v9, 0.0  ;;  %v4650_v11 = vpop.f32.mrb[38].mxu0 }
 0x1b6   : > { %v1389_v13 = vadd.f32 %v4650_v11, %v5753_v21  ;;  %v1383_v14 = vpop.f32.mrb[39].mxu0 }
 0x1b7   : > { %v1384_v15 = vadd.f32 %v5753_v21, %v1383_v14  ;;  %4753 = vmatprep.mubr.msk.f32.mxu1 %vm934_vm2, %v1548_v10 }
 0x1b8   : > { %4754 = vmatmul.mubr.msk.f32.gmra.mrb[36].mxu1 %vm934_vm2, %v1549_v12  ;;  %v1551_v18 = vmax.f32 %v1389_v13, 0.0 }
 0x1b9   : > { %v1550_v16 = vmax.f32 %v1384_v15, 0.0  ;;  %v4653_v17 = vpop.f32.mrb[40].mxu0 }
 0x1ba   : > { %v1399_v19 = vadd.f32 %v4653_v17, %v5753_v21  ;;  %v1393_v20 = vpop.f32.mrb[41].mxu0 }
 0x1bb   : > { %v1394_v22 = vadd.f32 %v5753_v21, %v1393_v20  ;;  %4756 = vmatprep.mubr.msk.f32.mxu1 %vm934_vm2, %v1550_v16 }
 0x1bc   : > { %4757 = vmatmul.mubr.msk.f32.gmra.mrb[38].mxu1 %vm934_vm2, %v1551_v18  ;;  %v1553_v25 = vmax.f32 %v1399_v19, 0.0 }
 0x1bd   : > { %v1552_v23 = vmax.f32 %v1394_v22, 0.0  ;;  %v4656_v24 = vpop.f32.mrb[42].mxu0 }
 0x1be   : > { %v1409_v26 = vadd.f32 %v4656_v24, %v5753_v21  ;;  %v1403_v27 = vpop.f32.mrb[43].mxu0 }
 0x1bf   : > { %v1404_v28 = vadd.f32 %v5753_v21, %v1403_v27  ;;  %4759 = vmatprep.mubr.msk.f32.mxu1 %vm934_vm2, %v1552_v23 }
 0x1c0   : > { %4760 = vmatmul.mubr.msk.f32.gmra.mrb[40].mxu1 %vm934_vm2, %v1553_v25  ;;  %v1555_v31 = vmax.f32 %v1409_v26, 0.0 }
 0x1c1   : > { %v1554_v29 = vmax.f32 %v1404_v28, 0.0  ;;  %v4659_v30 = vpop.f32.mrb[44].mxu0  ;;  %v2876_v28 = vld [vmem:[%s6590_s5] sm:$0xff] }
 0x1c2   : > { %v1419_v32 = vadd.f32 %v4659_v30, %v5753_v21  ;;  %v1413_v33 = vpop.f32.mrb[45].mxu0 }
 0x1c3   : > { %v1414_v34 = vadd.f32 %v5753_v21, %v1413_v33  ;;  %4762 = vmatprep.mubr.msk.f32.mxu1 %vm934_vm2, %v1554_v29  ;;  %v2877_v29 = vld [vmem:[%s6590_s5 + $0x8] sm:$0xff]  ;;  %v2879_v33 = vld [vmem:[%s6590_s5 + $0x18] sm:$0xff] }
 0x1c4   : > { %4763 = vmatmul.mubr.msk.f32.gmra.mrb[42].mxu1 %vm934_vm2, %v1555_v31  ;;  %v1557_v37 = vmax.f32 %v1419_v32, 0.0  ;;  %v5043_v30 = vpack.c.bf16 %v2877_v29, %v2876_v28  ;;  %v2878_v32 = vld [vmem:[%s6590_s5 + $0x10] sm:$0xff] }
 0x1c5   : > { %v1556_v35 = vmax.f32 %v1414_v34, 0.0  ;;  %v4662_v36 = vpop.f32.mrb[46].mxu0 }
 0x1c6   : > { %v1429_v38 = vadd.f32 %v4662_v36, %v5753_v21  ;;  %v1423_v39 = vpop.f32.mrb[47].mxu0  ;;  %5044 = vmatprep.subr.bf16.mxu1 %v5043_v30  ;;  %v5047_v36 = vpack.c.bf16 %v2879_v33, %v2878_v32 }
 0x1c7   : > { %v1424_v40 = vadd.f32 %v5753_v21, %v1423_v39  ;;  %4765 = vmatprep.mubr.msk.f32.mxu1 %vm934_vm2, %v1556_v35  ;;  %5046 = vmatpush3.bf16.msra.mxu1 %v5043_v30  ;;  %v2881_v39 = vld [vmem:[%s6590_s5 + $0x28] sm:$0xff] }
 0x1c8   : > { %4766 = vmatmul.mubr.msk.f32.gmra.mrb[44].mxu1 %vm934_vm2, %v1557_v37  ;;  %v1559_v43 = vmax.f32 %v1429_v38, 0.0  ;;  %5048 = vmatprep.subr.bf16.mxu1 %v5047_v36  ;;  %v2880_v38 = vld [vmem:[%s6590_s5 + $0x20] sm:$0xff] }
 0x1c9   : > { %v1558_v41 = vmax.f32 %v1424_v40, 0.0  ;;  %v4665_v42 = vpop.f32.mrb[48].mxu0  ;;  %v2882_v40 = vld [vmem:[%s6590_s5 + $0x30] sm:$0xff] }
 0x1ca   : > { %v1439_v44 = vadd.f32 %v4665_v42, %v5753_v21  ;;  %v1433_v45 = vpop.f32.mrb[49].mxu0 }
 0x1cb   : > { %v1434_v46 = vadd.f32 %v5753_v21, %v1433_v45  ;;  %4768 = vmatprep.mubr.msk.f32.mxu1 %vm934_vm2, %v1558_v41  ;;  %5050 = vmatpush3.bf16.msra.mxu1 %v5047_v36 }
 0x1cc   : > { %4769 = vmatmul.mubr.msk.f32.gmra.mrb[46].mxu1 %vm934_vm2, %v1559_v43  ;;  %v1561_v49 = vmax.f32 %v1439_v44, 0.0  ;;  %v5051_v43 = vpack.c.bf16 %v2881_v39, %v2880_v38  ;;  %v2883_v44 = vld [vmem:[%s6590_s5 + $0x38] sm:$0xff] }
 0x1cd   : > { %v1560_v47 = vmax.f32 %v1434_v46, 0.0  ;;  %v4668_v48 = vpop.f32.mrb[50].mxu0 }
 0x1ce   : > { %v1449_v50 = vadd.f32 %v4668_v48, %v5753_v21  ;;  %v1443_v51 = vpop.f32.mrb[51].mxu0  ;;  %v5055_v48 = vpack.c.bf16 %v2883_v44, %v2882_v40  ;;  %5052 = vmatprep.subr.bf16.mxu1 %v5051_v43 }
 0x1cf   : > { %v1444_v52 = vadd.f32 %v5753_v21, %v1443_v51  ;;  %4771 = vmatprep.mubr.msk.f32.mxu1 %vm934_vm2, %v1560_v47  ;;  %5054 = vmatpush3.bf16.msra.mxu1 %v5051_v43 }
 0x1d0   : > { %4772 = vmatmul.mubr.msk.f32.gmra.mrb[48].mxu1 %vm934_vm2, %v1561_v49  ;;  %v1563_v55 = vmax.f32 %v1449_v50, 0.0  ;;  %5056 = vmatprep.subr.bf16.mxu1 %v5055_v48 }
 0x1d1   : > { %v1562_v53 = vmax.f32 %v1444_v52, 0.0  ;;  %v4671_v54 = vpop.f32.mrb[52].mxu0 }
 0x1d2   : > { %v1459_v56 = vadd.f32 %v4671_v54, %v5753_v21  ;;  %v1453_v57 = vpop.f32.mrb[53].mxu0 }
 0x1d3   : > { %v1454_v58 = vadd.f32 %v5753_v21, %v1453_v57  ;;  %4774 = vmatprep.mubr.msk.f32.mxu1 %vm934_vm2, %v1562_v53  ;;  %5058 = vmatpush3.bf16.msra.mxu1 %v5055_v48 }
 0x1d4   : > { %4775 = vmatmul.mubr.msk.f32.gmra.mrb[50].mxu1 %vm934_vm2, %v1563_v55  ;;  %v1565_v61 = vmax.f32 %v1459_v56, 0.0 }
 0x1d5   : > { %v1564_v59 = vmax.f32 %v1454_v58, 0.0  ;;  %v4674_v60 = vpop.f32.mrb[54].mxu0 }
 0x1d6   : > { %v1469_v62 = vadd.f32 %v4674_v60, %v5753_v21  ;;  %v1463_v63 = vpop.f32.mrb[55].mxu0 }
 0x1d7   : > { %v1464_v0 = vadd.f32 %v5753_v21, %v1463_v63  ;;  %4777 = vmatprep.mubr.msk.f32.mxu1 %vm934_vm2, %v1564_v59 }
 0x1d8   : > { %4778 = vmatmul.mubr.msk.f32.gmra.mrb[52].mxu1 %vm934_vm2, %v1565_v61  ;;  %v1567_v3 = vmax.f32 %v1469_v62, 0.0 }
 0x1d9   : > { %v1566_v1 = vmax.f32 %v1464_v0, 0.0  ;;  %v4677_v2 = vpop.f32.mrb[56].mxu0 }
 0x1da   : > { %v1479_v4 = vadd.f32 %v4677_v2, %v5753_v21  ;;  %v1473_v5 = vpop.f32.mrb[57].mxu0 }
 0x1db   : > { %v1474_v6 = vadd.f32 %v5753_v21, %v1473_v5  ;;  %4780 = vmatprep.mubr.msk.f32.mxu1 %vm934_vm2, %v1566_v1 }
 0x1dc   : > { %4781 = vmatmul.mubr.msk.f32.gmra.mrb[54].mxu1 %vm934_vm2, %v1567_v3  ;;  %v1569_v9 = vmax.f32 %v1479_v4, 0.0 }
 0x1dd   : > { %v1568_v7 = vmax.f32 %v1474_v6, 0.0  ;;  %v4680_v8 = vpop.f32.mrb[58].mxu0 }
 0x1de   : > { %v1489_v10 = vadd.f32 %v4680_v8, %v5753_v21  ;;  %v1483_v11 = vpop.f32.mrb[59].mxu0 }
 0x1df   : > { %v1484_v12 = vadd.f32 %v5753_v21, %v1483_v11  ;;  %4783 = vmatprep.mubr.msk.f32.mxu1 %vm934_vm2, %v1568_v7 }
 0x1e0   : > { %4784 = vmatmul.mubr.msk.f32.gmra.mrb[56].mxu1 %vm934_vm2, %v1569_v9  ;;  %v1571_v15 = vmax.f32 %v1489_v10, 0.0 }
 0x1e1   : > { %v1570_v13 = vmax.f32 %v1484_v12, 0.0  ;;  %v4683_v14 = vpop.f32.mrb[60].mxu0 }
 0x1e2   : > { %v1499_v16 = vadd.f32 %v4683_v14, %v5753_v21  ;;  %v1493_v17 = vpop.f32.mrb[61].mxu0 }
 0x1e3   : > { %v1494_v18 = vadd.f32 %v5753_v21, %v1493_v17  ;;  %4786 = vmatprep.mubr.msk.f32.mxu1 %vm934_vm2, %v1570_v13 }
 0x1e4   : > { %4787 = vmatmul.mubr.msk.f32.gmra.mrb[58].mxu1 %vm934_vm2, %v1571_v15  ;;  %v1573_v22 = vmax.f32 %v1499_v16, 0.0 }
 0x1e5   : > { %v1572_v19 = vmax.f32 %v1494_v18, 0.0  ;;  %v4686_v20 = vpop.f32.mrb[62].mxu0 }
 0x1e6   : > { %v1509_v23 = vadd.f32 %v4686_v20, %v5753_v21  ;;  %v1503_v24 = vpop.f32.mrb[63].mxu0 }
 0x1e7   : > { %v1504_v25 = vadd.f32 %v5753_v21, %v1503_v24  ;;  %4789 = vmatprep.mubr.msk.f32.mxu1 %vm934_vm2, %v1572_v19  ;;  %v5898_v21 = vld [vmem:[%s6591_s6 + $0x1] ss:$0 sm:$0xff] }
 0x1e8   : > { %4790 = vmatmul.mubr.msk.f32.gmra.mrb[60].mxu1 %vm934_vm2, %v1573_v22  ;;  %v1575_v27 = vmax.f32 %v1509_v23, 0.0 }
 0x1e9   : > { %v1574_v26 = vmax.f32 %v1504_v25, 0.0 }
 0x1eb   : > { %4792 = vmatprep.mubr.msk.f32.mxu1 %vm934_vm2, %v1574_v26 }
 0x1ec   : > { %4793 = vmatmul.mubr.msk.f32.gmra.mrb[62].mxu1 %vm934_vm2, %v1575_v27 }
 0x243   : > { %v4701_v31 = vpop.f32.mrb[0].mxu1 }
 0x244   : > { %v1850_v34 = vadd.f32 %v4701_v31, %v5898_v21  ;;  %v1844_v35 = vpop.f32.mrb[1].mxu1 }
 0x245   : > { %v1845_v37 = vadd.f32 %v5898_v21, %v1844_v35 }
 0x246   : > { %v2164_v45 = vmax.f32 %v1850_v34, 0.0 }
 0x247   : > { %v2163_v41 = vmax.f32 %v1845_v37, 0.0  ;;  %v4704_v42 = vpop.f32.mrb[2].mxu1 }
 0x248   : > { %v1860_v46 = vadd.f32 %v4704_v42, %v5898_v21  ;;  %v1854_v47 = vpop.f32.mrb[3].mxu1 }
 0x249   : > { %v1855_v49 = vadd.f32 %v5898_v21, %v1854_v47  ;;  %4803 = vmatprep.mubr.msk.f32.mxu0 %vm410_vm0, %v2163_v41 }
 0x24a   : > { %4804 = vmatmul.mubr.msk.f32.vlgmr.msra.gmra.mrb[64].mxu0 %vm410_vm0, %v2164_v45  ;;  %v2166_v52 = vmax.f32 %v1860_v46, 0.0 }
 0x24b   : > { %v2165_v50 = vmax.f32 %v1855_v49, 0.0  ;;  %v4707_v51 = vpop.f32.mrb[4].mxu1 }
 0x24c   : > { %v1870_v53 = vadd.f32 %v4707_v51, %v5898_v21  ;;  %v1864_v54 = vpop.f32.mrb[5].mxu1 }
 0x24d   : > { %v1865_v55 = vadd.f32 %v5898_v21, %v1864_v54  ;;  %4806 = vmatprep.mubr.msk.f32.mxu0 %vm410_vm0, %v2165_v50 }
 0x24e   : > { %4807 = vmatmul.mubr.msk.f32.gmra.mrb[66].mxu0 %vm410_vm0, %v2166_v52  ;;  %v2168_v58 = vmax.f32 %v1870_v53, 0.0 }
 0x24f   : > { %v2167_v56 = vmax.f32 %v1865_v55, 0.0  ;;  %v4710_v57 = vpop.f32.mrb[6].mxu1 }
 0x250   : > { %v1880_v59 = vadd.f32 %v4710_v57, %v5898_v21  ;;  %v1874_v60 = vpop.f32.mrb[7].mxu1 }
 0x251   : > { %v1875_v61 = vadd.f32 %v5898_v21, %v1874_v60  ;;  %4809 = vmatprep.mubr.msk.f32.mxu0 %vm410_vm0, %v2167_v56 }
 0x252   : > { %4810 = vmatmul.mubr.msk.f32.gmra.mrb[68].mxu0 %vm410_vm0, %v2168_v58  ;;  %v2170_v0 = vmax.f32 %v1880_v59, 0.0 }
 0x253   : > { %v2169_v62 = vmax.f32 %v1875_v61, 0.0  ;;  %v4713_v63 = vpop.f32.mrb[8].mxu1 }
 0x254   : > { %v1890_v1 = vadd.f32 %v4713_v63, %v5898_v21  ;;  %v1884_v2 = vpop.f32.mrb[9].mxu1 }
 0x255   : > { %v1885_v3 = vadd.f32 %v5898_v21, %v1884_v2  ;;  %4812 = vmatprep.mubr.msk.f32.mxu0 %vm410_vm0, %v2169_v62 }
 0x256   : > { %4813 = vmatmul.mubr.msk.f32.gmra.mrb[70].mxu0 %vm410_vm0, %v2170_v0  ;;  %v2172_v6 = vmax.f32 %v1890_v1, 0.0 }
 0x257   : > { %v2171_v4 = vmax.f32 %v1885_v3, 0.0  ;;  %v4716_v5 = vpop.f32.mrb[10].mxu1 }
 0x258   : > { %v1900_v7 = vadd.f32 %v4716_v5, %v5898_v21  ;;  %v1894_v8 = vpop.f32.mrb[11].mxu1 }
 0x259   : > { %v1895_v9 = vadd.f32 %v5898_v21, %v1894_v8  ;;  %4815 = vmatprep.mubr.msk.f32.mxu0 %vm410_vm0, %v2171_v4 }
 0x25a   : > { %4816 = vmatmul.mubr.msk.f32.gmra.mrb[72].mxu0 %vm410_vm0, %v2172_v6  ;;  %v2174_v12 = vmax.f32 %v1900_v7, 0.0 }
 0x25b   : > { %v2173_v10 = vmax.f32 %v1895_v9, 0.0  ;;  %v4719_v11 = vpop.f32.mrb[12].mxu1 }
 0x25c   : > { %v1910_v13 = vadd.f32 %v4719_v11, %v5898_v21  ;;  %v1904_v14 = vpop.f32.mrb[13].mxu1 }
 0x25d   : > { %v1905_v15 = vadd.f32 %v5898_v21, %v1904_v14  ;;  %4818 = vmatprep.mubr.msk.f32.mxu0 %vm410_vm0, %v2173_v10 }
 0x25e   : > { %4819 = vmatmul.mubr.msk.f32.gmra.mrb[74].mxu0 %vm410_vm0, %v2174_v12  ;;  %v2176_v18 = vmax.f32 %v1910_v13, 0.0 }
 0x25f   : > { %v2175_v16 = vmax.f32 %v1905_v15, 0.0  ;;  %v4722_v17 = vpop.f32.mrb[14].mxu1 }
 0x260   : > { %v1920_v19 = vadd.f32 %v4722_v17, %v5898_v21  ;;  %v1914_v20 = vpop.f32.mrb[15].mxu1 }
 0x261   : > { %v1915_v22 = vadd.f32 %v5898_v21, %v1914_v20  ;;  %4821 = vmatprep.mubr.msk.f32.mxu0 %vm410_vm0, %v2175_v16 }
 0x262   : > { %4822 = vmatmul.mubr.msk.f32.gmra.mrb[76].mxu0 %vm410_vm0, %v2176_v18  ;;  %v2178_v25 = vmax.f32 %v1920_v19, 0.0 }
 0x263   : > { %v2177_v23 = vmax.f32 %v1915_v22, 0.0  ;;  %v4725_v24 = vpop.f32.mrb[16].mxu1 }
 0x264   : > { %v1930_v26 = vadd.f32 %v4725_v24, %v5898_v21  ;;  %v1924_v27 = vpop.f32.mrb[17].mxu1 }
 0x265   : > { %v1925_v28 = vadd.f32 %v5898_v21, %v1924_v27  ;;  %4824 = vmatprep.mubr.msk.f32.mxu0 %vm410_vm0, %v2177_v23 }
 0x266   : > { %4825 = vmatmul.mubr.msk.f32.gmra.mrb[78].mxu0 %vm410_vm0, %v2178_v25  ;;  %v2180_v31 = vmax.f32 %v1930_v26, 0.0 }
 0x267   : > { %v2179_v29 = vmax.f32 %v1925_v28, 0.0  ;;  %v4728_v30 = vpop.f32.mrb[18].mxu1 }
 0x268   : > { %v1940_v32 = vadd.f32 %v4728_v30, %v5898_v21  ;;  %v1934_v33 = vpop.f32.mrb[19].mxu1 }
 0x269   : > { %v1935_v34 = vadd.f32 %v5898_v21, %v1934_v33  ;;  %4827 = vmatprep.mubr.msk.f32.mxu0 %vm410_vm0, %v2179_v29 }
 0x26a   : > { %4828 = vmatmul.mubr.msk.f32.gmra.mrb[80].mxu0 %vm410_vm0, %v2180_v31  ;;  %v2182_v37 = vmax.f32 %v1940_v32, 0.0 }
 0x26b   : > { %v2181_v35 = vmax.f32 %v1935_v34, 0.0  ;;  %v4731_v36 = vpop.f32.mrb[20].mxu1 }
 0x26c   : > { %v1950_v38 = vadd.f32 %v4731_v36, %v5898_v21  ;;  %v1944_v39 = vpop.f32.mrb[21].mxu1 }
 0x26d   : > { %v1945_v40 = vadd.f32 %v5898_v21, %v1944_v39  ;;  %4830 = vmatprep.mubr.msk.f32.mxu0 %vm410_vm0, %v2181_v35 }
 0x26e   : > { %4831 = vmatmul.mubr.msk.f32.gmra.mrb[82].mxu0 %vm410_vm0, %v2182_v37  ;;  %v2184_v43 = vmax.f32 %v1950_v38, 0.0 }
 0x26f   : > { %v2183_v41 = vmax.f32 %v1945_v40, 0.0  ;;  %v4734_v42 = vpop.f32.mrb[22].mxu1 }
 0x270   : > { %v1960_v44 = vadd.f32 %v4734_v42, %v5898_v21  ;;  %v1954_v45 = vpop.f32.mrb[23].mxu1 }
 0x271   : > { %v1955_v46 = vadd.f32 %v5898_v21, %v1954_v45  ;;  %4833 = vmatprep.mubr.msk.f32.mxu0 %vm410_vm0, %v2183_v41 }
 0x272   : > { %4834 = vmatmul.mubr.msk.f32.gmra.mrb[84].mxu0 %vm410_vm0, %v2184_v43  ;;  %v2186_v49 = vmax.f32 %v1960_v44, 0.0 }
 0x273   : > { %v2185_v47 = vmax.f32 %v1955_v46, 0.0  ;;  %v4737_v48 = vpop.f32.mrb[24].mxu1 }
 0x274   : > { %v1970_v50 = vadd.f32 %v4737_v48, %v5898_v21  ;;  %v1964_v51 = vpop.f32.mrb[25].mxu1 }
 0x275   : > { %v1965_v52 = vadd.f32 %v5898_v21, %v1964_v51  ;;  %4836 = vmatprep.mubr.msk.f32.mxu0 %vm410_vm0, %v2185_v47 }
 0x276   : > { %4837 = vmatmul.mubr.msk.f32.gmra.mrb[86].mxu0 %vm410_vm0, %v2186_v49  ;;  %v2188_v55 = vmax.f32 %v1970_v50, 0.0 }
 0x277   : > { %v2187_v53 = vmax.f32 %v1965_v52, 0.0  ;;  %v4740_v54 = vpop.f32.mrb[26].mxu1 }
 0x278   : > { %v1980_v56 = vadd.f32 %v4740_v54, %v5898_v21  ;;  %v1974_v57 = vpop.f32.mrb[27].mxu1 }
 0x279   : > { %v1975_v58 = vadd.f32 %v5898_v21, %v1974_v57  ;;  %4839 = vmatprep.mubr.msk.f32.mxu0 %vm410_vm0, %v2187_v53 }
 0x27a   : > { %4840 = vmatmul.mubr.msk.f32.gmra.mrb[88].mxu0 %vm410_vm0, %v2188_v55  ;;  %v2190_v61 = vmax.f32 %v1980_v56, 0.0 }
 0x27b   : > { %v2189_v59 = vmax.f32 %v1975_v58, 0.0  ;;  %v4743_v60 = vpop.f32.mrb[28].mxu1 }
 0x27c   : > { %v1990_v62 = vadd.f32 %v4743_v60, %v5898_v21  ;;  %v1984_v63 = vpop.f32.mrb[29].mxu1 }
 0x27d   : > { %v1985_v0 = vadd.f32 %v5898_v21, %v1984_v63  ;;  %4842 = vmatprep.mubr.msk.f32.mxu0 %vm410_vm0, %v2189_v59 }
 0x27e   : > { %4843 = vmatmul.mubr.msk.f32.gmra.mrb[90].mxu0 %vm410_vm0, %v2190_v61  ;;  %v2192_v3 = vmax.f32 %v1990_v62, 0.0 }
 0x27f   : > { %v2191_v1 = vmax.f32 %v1985_v0, 0.0  ;;  %v4746_v2 = vpop.f32.mrb[30].mxu1 }
 0x280   : > { %v2000_v4 = vadd.f32 %v4746_v2, %v5898_v21  ;;  %v1994_v5 = vpop.f32.mrb[31].mxu1 }
 0x281   : > { %v1995_v6 = vadd.f32 %v5898_v21, %v1994_v5  ;;  %4845 = vmatprep.mubr.msk.f32.mxu0 %vm410_vm0, %v2191_v1 }
 0x282   : > { %4846 = vmatmul.mubr.msk.f32.gmra.mrb[92].mxu0 %vm410_vm0, %v2192_v3  ;;  %v2194_v9 = vmax.f32 %v2000_v4, 0.0 }
 0x283   : > { %v2193_v7 = vmax.f32 %v1995_v6, 0.0  ;;  %v4749_v8 = vpop.f32.mrb[32].mxu1 }
 0x284   : > { %v2010_v10 = vadd.f32 %v4749_v8, %v5898_v21  ;;  %v2004_v11 = vpop.f32.mrb[33].mxu1 }
 0x285   : > { %v2005_v12 = vadd.f32 %v5898_v21, %v2004_v11  ;;  %4848 = vmatprep.mubr.msk.f32.mxu0 %vm410_vm0, %v2193_v7 }
 0x286   : > { %4849 = vmatmul.mubr.msk.f32.gmra.mrb[94].mxu0 %vm410_vm0, %v2194_v9  ;;  %v2196_v15 = vmax.f32 %v2010_v10, 0.0 }
 0x287   : > { %v2195_v13 = vmax.f32 %v2005_v12, 0.0  ;;  %v4752_v14 = vpop.f32.mrb[34].mxu1 }
 0x288   : > { %v2020_v16 = vadd.f32 %v4752_v14, %v5898_v21  ;;  %v2014_v17 = vpop.f32.mrb[35].mxu1 }
 0x289   : > { %v2015_v18 = vadd.f32 %v5898_v21, %v2014_v17  ;;  %4851 = vmatprep.mubr.msk.f32.mxu0 %vm410_vm0, %v2195_v13 }
 0x28a   : > { %4852 = vmatmul.mubr.msk.f32.gmra.mrb[96].mxu0 %vm410_vm0, %v2196_v15  ;;  %v2198_v22 = vmax.f32 %v2020_v16, 0.0 }
 0x28b   : > { %v2197_v19 = vmax.f32 %v2015_v18, 0.0  ;;  %v4755_v20 = vpop.f32.mrb[36].mxu1 }
 0x28c   : > { %v2030_v23 = vadd.f32 %v4755_v20, %v5898_v21  ;;  %v2024_v24 = vpop.f32.mrb[37].mxu1 }
 0x28d   : > { %v2025_v25 = vadd.f32 %v5898_v21, %v2024_v24  ;;  %4854 = vmatprep.mubr.msk.f32.mxu0 %vm410_vm0, %v2197_v19 }
 0x28e   : > { %4855 = vmatmul.mubr.msk.f32.gmra.mrb[98].mxu0 %vm410_vm0, %v2198_v22  ;;  %v2200_v28 = vmax.f32 %v2030_v23, 0.0 }
 0x28f   : > { %v2199_v26 = vmax.f32 %v2025_v25, 0.0  ;;  %v4758_v27 = vpop.f32.mrb[38].mxu1 }
 0x290   : > { %v2040_v29 = vadd.f32 %v4758_v27, %v5898_v21  ;;  %v2034_v30 = vpop.f32.mrb[39].mxu1 }
 0x291   : > { %v2035_v31 = vadd.f32 %v5898_v21, %v2034_v30  ;;  %4857 = vmatprep.mubr.msk.f32.mxu0 %vm410_vm0, %v2199_v26 }
 0x292   : > { %4858 = vmatmul.mubr.msk.f32.gmra.mrb[100].mxu0 %vm410_vm0, %v2200_v28  ;;  %v2202_v34 = vmax.f32 %v2040_v29, 0.0 }
 0x293   : > { %v2201_v32 = vmax.f32 %v2035_v31, 0.0  ;;  %v4761_v33 = vpop.f32.mrb[40].mxu1 }
 0x294   : > { %v2050_v35 = vadd.f32 %v4761_v33, %v5898_v21  ;;  %v2044_v36 = vpop.f32.mrb[41].mxu1 }
 0x295   : > { %v2045_v37 = vadd.f32 %v5898_v21, %v2044_v36  ;;  %4860 = vmatprep.mubr.msk.f32.mxu0 %vm410_vm0, %v2201_v32 }
 0x296   : > { %4861 = vmatmul.mubr.msk.f32.gmra.mrb[102].mxu0 %vm410_vm0, %v2202_v34  ;;  %v2204_v40 = vmax.f32 %v2050_v35, 0.0 }
 0x297   : > { %v2203_v38 = vmax.f32 %v2045_v37, 0.0  ;;  %v4764_v39 = vpop.f32.mrb[42].mxu1 }
 0x298   : > { %v2060_v41 = vadd.f32 %v4764_v39, %v5898_v21  ;;  %v2054_v42 = vpop.f32.mrb[43].mxu1 }
 0x299   : > { %v2055_v43 = vadd.f32 %v5898_v21, %v2054_v42  ;;  %4863 = vmatprep.mubr.msk.f32.mxu0 %vm410_vm0, %v2203_v38 }
 0x29a   : > { %4864 = vmatmul.mubr.msk.f32.gmra.mrb[104].mxu0 %vm410_vm0, %v2204_v40  ;;  %v2206_v46 = vmax.f32 %v2060_v41, 0.0 }
 0x29b   : > { %v2205_v44 = vmax.f32 %v2055_v43, 0.0  ;;  %v4767_v45 = vpop.f32.mrb[44].mxu1  ;;  %v6049_v43 = vld [vmem:[%s6591_s6 + $0x2] ss:$0 sm:$0xff] }
 0x29c   : > { %v2070_v47 = vadd.f32 %v4767_v45, %v5898_v21  ;;  %v2064_v48 = vpop.f32.mrb[45].mxu1 }
 0x29d   : > { %v2065_v49 = vadd.f32 %v5898_v21, %v2064_v48  ;;  %4866 = vmatprep.mubr.msk.f32.mxu0 %vm410_vm0, %v2205_v44 }
 0x29e   : > { %4867 = vmatmul.mubr.msk.f32.gmra.mrb[106].mxu0 %vm410_vm0, %v2206_v46  ;;  %v2208_v52 = vmax.f32 %v2070_v47, 0.0 }
 0x29f   : > { %v2207_v50 = vmax.f32 %v2065_v49, 0.0  ;;  %v4770_v51 = vpop.f32.mrb[46].mxu1 }
 0x2a0   : > { %v2080_v53 = vadd.f32 %v4770_v51, %v5898_v21  ;;  %v2074_v54 = vpop.f32.mrb[47].mxu1 }
 0x2a1   : > { %v2075_v55 = vadd.f32 %v5898_v21, %v2074_v54  ;;  %4869 = vmatprep.mubr.msk.f32.mxu0 %vm410_vm0, %v2207_v50 }
 0x2a2   : > { %4870 = vmatmul.mubr.msk.f32.gmra.mrb[108].mxu0 %vm410_vm0, %v2208_v52  ;;  %v2210_v58 = vmax.f32 %v2080_v53, 0.0 }
 0x2a3   : > { %v2209_v56 = vmax.f32 %v2075_v55, 0.0  ;;  %v4773_v57 = vpop.f32.mrb[48].mxu1 }
 0x2a4   : > { %v2090_v59 = vadd.f32 %v4773_v57, %v5898_v21  ;;  %v2084_v60 = vpop.f32.mrb[49].mxu1 }
 0x2a5   : > { %v2085_v61 = vadd.f32 %v5898_v21, %v2084_v60  ;;  %4872 = vmatprep.mubr.msk.f32.mxu0 %vm410_vm0, %v2209_v56 }
 0x2a6   : > { %4873 = vmatmul.mubr.msk.f32.gmra.mrb[110].mxu0 %vm410_vm0, %v2210_v58  ;;  %v2212_v0 = vmax.f32 %v2090_v59, 0.0 }
 0x2a7   : > { %v2211_v62 = vmax.f32 %v2085_v61, 0.0  ;;  %v4776_v63 = vpop.f32.mrb[50].mxu1 }
 0x2a8   : > { %v2100_v1 = vadd.f32 %v4776_v63, %v5898_v21  ;;  %v2094_v2 = vpop.f32.mrb[51].mxu1 }
 0x2a9   : > { %v2095_v3 = vadd.f32 %v5898_v21, %v2094_v2  ;;  %4875 = vmatprep.mubr.msk.f32.mxu0 %vm410_vm0, %v2211_v62 }
 0x2aa   : > { %4876 = vmatmul.mubr.msk.f32.gmra.mrb[112].mxu0 %vm410_vm0, %v2212_v0  ;;  %v2214_v6 = vmax.f32 %v2100_v1, 0.0 }
 0x2ab   : > { %v2213_v4 = vmax.f32 %v2095_v3, 0.0  ;;  %v4779_v5 = vpop.f32.mrb[52].mxu1 }
 0x2ac   : > { %v2110_v7 = vadd.f32 %v4779_v5, %v5898_v21  ;;  %v2104_v8 = vpop.f32.mrb[53].mxu1 }
 0x2ad   : > { %v2105_v9 = vadd.f32 %v5898_v21, %v2104_v8  ;;  %4878 = vmatprep.mubr.msk.f32.mxu0 %vm410_vm0, %v2213_v4 }
 0x2ae   : > { %4879 = vmatmul.mubr.msk.f32.gmra.mrb[114].mxu0 %vm410_vm0, %v2214_v6  ;;  %v2216_v12 = vmax.f32 %v2110_v7, 0.0 }
 0x2af   : > { %v2215_v10 = vmax.f32 %v2105_v9, 0.0  ;;  %v4782_v11 = vpop.f32.mrb[54].mxu1 }
 0x2b0   : > { %v2120_v13 = vadd.f32 %v4782_v11, %v5898_v21  ;;  %v2114_v14 = vpop.f32.mrb[55].mxu1 }
 0x2b1   : > { %v2115_v15 = vadd.f32 %v5898_v21, %v2114_v14  ;;  %4881 = vmatprep.mubr.msk.f32.mxu0 %vm410_vm0, %v2215_v10 }
 0x2b2   : > { %4882 = vmatmul.mubr.msk.f32.gmra.mrb[116].mxu0 %vm410_vm0, %v2216_v12  ;;  %v2218_v18 = vmax.f32 %v2120_v13, 0.0 }
 0x2b3   : > { %v2217_v16 = vmax.f32 %v2115_v15, 0.0  ;;  %v4785_v17 = vpop.f32.mrb[56].mxu1 }
 0x2b4   : > { %v2130_v19 = vadd.f32 %v4785_v17, %v5898_v21  ;;  %v2124_v20 = vpop.f32.mrb[57].mxu1 }
 0x2b5   : > { %v2125_v22 = vadd.f32 %v5898_v21, %v2124_v20  ;;  %4884 = vmatprep.mubr.msk.f32.mxu0 %vm410_vm0, %v2217_v16 }
 0x2b6   : > { %4885 = vmatmul.mubr.msk.f32.gmra.mrb[118].mxu0 %vm410_vm0, %v2218_v18  ;;  %v2220_v25 = vmax.f32 %v2130_v19, 0.0 }
 0x2b7   : > { %v2219_v23 = vmax.f32 %v2125_v22, 0.0  ;;  %v4788_v24 = vpop.f32.mrb[58].mxu1 }
 0x2b8   : > { %v2140_v26 = vadd.f32 %v4788_v24, %v5898_v21  ;;  %v2134_v27 = vpop.f32.mrb[59].mxu1 }
 0x2b9   : > { %v2135_v28 = vadd.f32 %v5898_v21, %v2134_v27  ;;  %4887 = vmatprep.mubr.msk.f32.mxu0 %vm410_vm0, %v2219_v23 }
 0x2ba   : > { %4888 = vmatmul.mubr.msk.f32.gmra.mrb[120].mxu0 %vm410_vm0, %v2220_v25  ;;  %v2222_v31 = vmax.f32 %v2140_v26, 0.0 }
 0x2bb   : > { %v2221_v29 = vmax.f32 %v2135_v28, 0.0  ;;  %v4791_v30 = vpop.f32.mrb[60].mxu1 }
 0x2bc   : > { %v2150_v32 = vadd.f32 %v4791_v30, %v5898_v21  ;;  %v2144_v33 = vpop.f32.mrb[61].mxu1 }
 0x2bd   : > { %v2145_v34 = vadd.f32 %v5898_v21, %v2144_v33  ;;  %4890 = vmatprep.mubr.msk.f32.mxu0 %vm410_vm0, %v2221_v29 }
 0x2be   : > { %4891 = vmatmul.mubr.msk.f32.gmra.mrb[122].mxu0 %vm410_vm0, %v2222_v31  ;;  %v2224_v37 = vmax.f32 %v2150_v32, 0.0 }
 0x2bf   : > { %v2223_v35 = vmax.f32 %v2145_v34, 0.0  ;;  %v4794_v36 = vpop.f32.mrb[62].mxu1 }
 0x2c0   : > { %v2160_v38 = vadd.f32 %v4794_v36, %v5898_v21  ;;  %v2154_v39 = vpop.f32.mrb[63].mxu1 }
 0x2c1   : > { %v2155_v40 = vadd.f32 %v5898_v21, %v2154_v39  ;;  %4893 = vmatprep.mubr.msk.f32.mxu0 %vm410_vm0, %v2223_v35 }
 0x2c2   : > { %4894 = vmatmul.mubr.msk.f32.gmra.mrb[124].mxu0 %vm410_vm0, %v2224_v37  ;;  %v2226_v42 = vmax.f32 %v2160_v38, 0.0 }
 0x2c3   : > { %v2225_v41 = vmax.f32 %v2155_v40, 0.0 }
 0x2c5   : > { %4896 = vmatprep.mubr.msk.f32.mxu0 %vm410_vm0, %v2225_v41 }
 0x2c6   : > { %4897 = vmatmul.mubr.msk.f32.gmra.mrb[126].mxu0 %vm410_vm0, %v2226_v42 }
 0x31d   : > { %v4805_v44 = vpop.f32.mrb[64].mxu0 }
 0x31e   : > { %v2499_v45 = vadd.f32 %v4805_v44, %v6049_v43  ;;  %v2493_v46 = vpop.f32.mrb[65].mxu0 }
 0x31f   : > { %v2494_v21 = vadd.f32 %v6049_v43, %v2493_v46 }
 0x320   : > { %v2813_v49 = vmax.f32 %v2499_v45, 0.0 }
 0x321   : > { %v2812_v47 = vmax.f32 %v2494_v21, 0.0  ;;  %v4808_v48 = vpop.f32.mrb[66].mxu0 }
 0x322   : > { %v2509_v50 = vadd.f32 %v4808_v48, %v6049_v43  ;;  %v2503_v51 = vpop.f32.mrb[67].mxu0 }
 0x323   : > { %v2504_v52 = vadd.f32 %v6049_v43, %v2503_v51  ;;  %4915 = vmatprep.mubr.msk.f32.mxu1 %vm2888_vm3, %v2812_v47 }
 0x324   : > { %4916 = vmatmul.mubr.msk.f32.vlgmr.msra.gmra.mrb[64].mxu1 %vm2888_vm3, %v2813_v49  ;;  %v2815_v55 = vmax.f32 %v2509_v50, 0.0 }
 0x325   : > { %v2814_v53 = vmax.f32 %v2504_v52, 0.0  ;;  %v4811_v54 = vpop.f32.mrb[68].mxu0 }
 0x326   : > { %v2519_v56 = vadd.f32 %v4811_v54, %v6049_v43  ;;  %v2513_v57 = vpop.f32.mrb[69].mxu0 }
 0x327   : > { %v2514_v58 = vadd.f32 %v6049_v43, %v2513_v57  ;;  %4918 = vmatprep.mubr.msk.f32.mxu1 %vm2888_vm3, %v2814_v53 }
 0x328   : > { %4919 = vmatmul.mubr.msk.f32.gmra.mrb[66].mxu1 %vm2888_vm3, %v2815_v55  ;;  %v2817_v61 = vmax.f32 %v2519_v56, 0.0 }
 0x329   : > { %v2816_v59 = vmax.f32 %v2514_v58, 0.0  ;;  %v4814_v60 = vpop.f32.mrb[70].mxu0 }
 0x32a   : > { %v2529_v62 = vadd.f32 %v4814_v60, %v6049_v43  ;;  %v2523_v63 = vpop.f32.mrb[71].mxu0 }
 0x32b   : > { %v2524_v0 = vadd.f32 %v6049_v43, %v2523_v63  ;;  %4921 = vmatprep.mubr.msk.f32.mxu1 %vm2888_vm3, %v2816_v59 }
 0x32c   : > { %4922 = vmatmul.mubr.msk.f32.gmra.mrb[68].mxu1 %vm2888_vm3, %v2817_v61  ;;  %v2819_v3 = vmax.f32 %v2529_v62, 0.0 }
 0x32d   : > { %v2818_v1 = vmax.f32 %v2524_v0, 0.0  ;;  %v4817_v2 = vpop.f32.mrb[72].mxu0 }
 0x32e   : > { %v2539_v4 = vadd.f32 %v4817_v2, %v6049_v43  ;;  %v2533_v5 = vpop.f32.mrb[73].mxu0 }
 0x32f   : > { %v2534_v6 = vadd.f32 %v6049_v43, %v2533_v5  ;;  %4924 = vmatprep.mubr.msk.f32.mxu1 %vm2888_vm3, %v2818_v1 }
 0x330   : > { %4925 = vmatmul.mubr.msk.f32.gmra.mrb[70].mxu1 %vm2888_vm3, %v2819_v3  ;;  %v2821_v9 = vmax.f32 %v2539_v4, 0.0 }
 0x331   : > { %v2820_v7 = vmax.f32 %v2534_v6, 0.0  ;;  %v4820_v8 = vpop.f32.mrb[74].mxu0 }
 0x332   : > { %v2549_v10 = vadd.f32 %v4820_v8, %v6049_v43  ;;  %v2543_v11 = vpop.f32.mrb[75].mxu0 }
 0x333   : > { %v2544_v12 = vadd.f32 %v6049_v43, %v2543_v11  ;;  %4927 = vmatprep.mubr.msk.f32.mxu1 %vm2888_vm3, %v2820_v7 }
 0x334   : > { %4928 = vmatmul.mubr.msk.f32.gmra.mrb[72].mxu1 %vm2888_vm3, %v2821_v9  ;;  %v2823_v15 = vmax.f32 %v2549_v10, 0.0 }
 0x335   : > { %v2822_v13 = vmax.f32 %v2544_v12, 0.0  ;;  %v4823_v14 = vpop.f32.mrb[76].mxu0 }
 0x336   : > { %v2559_v16 = vadd.f32 %v4823_v14, %v6049_v43  ;;  %v2553_v17 = vpop.f32.mrb[77].mxu0 }
 0x337   : > { %v2554_v18 = vadd.f32 %v6049_v43, %v2553_v17  ;;  %4930 = vmatprep.mubr.msk.f32.mxu1 %vm2888_vm3, %v2822_v13 }
 0x338   : > { %4931 = vmatmul.mubr.msk.f32.gmra.mrb[74].mxu1 %vm2888_vm3, %v2823_v15  ;;  %v2825_v22 = vmax.f32 %v2559_v16, 0.0 }
 0x339   : > { %v2824_v19 = vmax.f32 %v2554_v18, 0.0  ;;  %v4826_v20 = vpop.f32.mrb[78].mxu0 }
 0x33a   : > { %v2569_v23 = vadd.f32 %v4826_v20, %v6049_v43  ;;  %v2563_v24 = vpop.f32.mrb[79].mxu0 }
 0x33b   : > { %v2564_v25 = vadd.f32 %v6049_v43, %v2563_v24  ;;  %4933 = vmatprep.mubr.msk.f32.mxu1 %vm2888_vm3, %v2824_v19 }
 0x33c   : > { %4934 = vmatmul.mubr.msk.f32.gmra.mrb[76].mxu1 %vm2888_vm3, %v2825_v22  ;;  %v2827_v28 = vmax.f32 %v2569_v23, 0.0 }
 0x33d   : > { %v2826_v26 = vmax.f32 %v2564_v25, 0.0  ;;  %v4829_v27 = vpop.f32.mrb[80].mxu0 }
 0x33e   : > { %v2579_v29 = vadd.f32 %v4829_v27, %v6049_v43  ;;  %v2573_v30 = vpop.f32.mrb[81].mxu0 }
 0x33f   : > { %v2574_v31 = vadd.f32 %v6049_v43, %v2573_v30  ;;  %4936 = vmatprep.mubr.msk.f32.mxu1 %vm2888_vm3, %v2826_v26 }
 0x340   : > { %4937 = vmatmul.mubr.msk.f32.gmra.mrb[78].mxu1 %vm2888_vm3, %v2827_v28  ;;  %v2829_v34 = vmax.f32 %v2579_v29, 0.0 }
 0x341   : > { %v2828_v32 = vmax.f32 %v2574_v31, 0.0  ;;  %v4832_v33 = vpop.f32.mrb[82].mxu0 }
 0x342   : > { %v2589_v35 = vadd.f32 %v4832_v33, %v6049_v43  ;;  %v2583_v36 = vpop.f32.mrb[83].mxu0 }
 0x343   : > { %v2584_v37 = vadd.f32 %v6049_v43, %v2583_v36  ;;  %4939 = vmatprep.mubr.msk.f32.mxu1 %vm2888_vm3, %v2828_v32 }
 0x344   : > { %4940 = vmatmul.mubr.msk.f32.gmra.mrb[80].mxu1 %vm2888_vm3, %v2829_v34  ;;  %v2831_v40 = vmax.f32 %v2589_v35, 0.0 }
 0x345   : > { %v2830_v38 = vmax.f32 %v2584_v37, 0.0  ;;  %v4835_v39 = vpop.f32.mrb[84].mxu0 }
 0x346   : > { %v2599_v41 = vadd.f32 %v4835_v39, %v6049_v43  ;;  %v2593_v42 = vpop.f32.mrb[85].mxu0 }
 0x347   : > { %v2594_v44 = vadd.f32 %v6049_v43, %v2593_v42  ;;  %4942 = vmatprep.mubr.msk.f32.mxu1 %vm2888_vm3, %v2830_v38 }
 0x348   : > { %4943 = vmatmul.mubr.msk.f32.gmra.mrb[82].mxu1 %vm2888_vm3, %v2831_v40  ;;  %v2833_v21 = vmax.f32 %v2599_v41, 0.0 }
 0x349   : > { %v2832_v45 = vmax.f32 %v2594_v44, 0.0  ;;  %v4838_v46 = vpop.f32.mrb[86].mxu0 }
 0x34a   : > { %v2609_v47 = vadd.f32 %v4838_v46, %v6049_v43  ;;  %v2603_v48 = vpop.f32.mrb[87].mxu0 }
 0x34b   : > { %v2604_v49 = vadd.f32 %v6049_v43, %v2603_v48  ;;  %4945 = vmatprep.mubr.msk.f32.mxu1 %vm2888_vm3, %v2832_v45 }
 0x34c   : > { %4946 = vmatmul.mubr.msk.f32.gmra.mrb[84].mxu1 %vm2888_vm3, %v2833_v21  ;;  %v2835_v52 = vmax.f32 %v2609_v47, 0.0 }
 0x34d   : > { %v2834_v50 = vmax.f32 %v2604_v49, 0.0  ;;  %v4841_v51 = vpop.f32.mrb[88].mxu0 }
 0x34e   : > { %v2619_v53 = vadd.f32 %v4841_v51, %v6049_v43  ;;  %v2613_v54 = vpop.f32.mrb[89].mxu0 }
 0x34f   : > { %v2614_v55 = vadd.f32 %v6049_v43, %v2613_v54  ;;  %4948 = vmatprep.mubr.msk.f32.mxu1 %vm2888_vm3, %v2834_v50 }
 0x350   : > { %4949 = vmatmul.mubr.msk.f32.gmra.mrb[86].mxu1 %vm2888_vm3, %v2835_v52  ;;  %v2837_v58 = vmax.f32 %v2619_v53, 0.0 }
 0x351   : > { %v2836_v56 = vmax.f32 %v2614_v55, 0.0  ;;  %v4844_v57 = vpop.f32.mrb[90].mxu0 }
 0x352   : > { %v2629_v59 = vadd.f32 %v4844_v57, %v6049_v43  ;;  %v2623_v60 = vpop.f32.mrb[91].mxu0 }
 0x353   : > { %v2624_v61 = vadd.f32 %v6049_v43, %v2623_v60  ;;  %4951 = vmatprep.mubr.msk.f32.mxu1 %vm2888_vm3, %v2836_v56 }
 0x354   : > { %4952 = vmatmul.mubr.msk.f32.gmra.mrb[88].mxu1 %vm2888_vm3, %v2837_v58  ;;  %v2839_v0 = vmax.f32 %v2629_v59, 0.0 }
 0x355   : > { %v2838_v62 = vmax.f32 %v2624_v61, 0.0  ;;  %v4847_v63 = vpop.f32.mrb[92].mxu0 }
 0x356   : > { %v2639_v1 = vadd.f32 %v4847_v63, %v6049_v43  ;;  %v2633_v2 = vpop.f32.mrb[93].mxu0 }
 0x357   : > { %v2634_v3 = vadd.f32 %v6049_v43, %v2633_v2  ;;  %4954 = vmatprep.mubr.msk.f32.mxu1 %vm2888_vm3, %v2838_v62 }
 0x358   : > { %4955 = vmatmul.mubr.msk.f32.gmra.mrb[90].mxu1 %vm2888_vm3, %v2839_v0  ;;  %v2841_v6 = vmax.f32 %v2639_v1, 0.0 }
 0x359   : > { %v2840_v4 = vmax.f32 %v2634_v3, 0.0  ;;  %v4850_v5 = vpop.f32.mrb[94].mxu0 }
 0x35a   : > { %v2649_v7 = vadd.f32 %v4850_v5, %v6049_v43  ;;  %v2643_v8 = vpop.f32.mrb[95].mxu0 }
 0x35b   : > { %v2644_v9 = vadd.f32 %v6049_v43, %v2643_v8  ;;  %4957 = vmatprep.mubr.msk.f32.mxu1 %vm2888_vm3, %v2840_v4 }
 0x35c   : > { %4958 = vmatmul.mubr.msk.f32.gmra.mrb[92].mxu1 %vm2888_vm3, %v2841_v6  ;;  %v2843_v12 = vmax.f32 %v2649_v7, 0.0 }
 0x35d   : > { %v2842_v10 = vmax.f32 %v2644_v9, 0.0  ;;  %v4853_v11 = vpop.f32.mrb[96].mxu0 }
 0x35e   : > { %v2659_v13 = vadd.f32 %v4853_v11, %v6049_v43  ;;  %v2653_v14 = vpop.f32.mrb[97].mxu0 }
 0x35f   : > { %v2654_v15 = vadd.f32 %v6049_v43, %v2653_v14  ;;  %4960 = vmatprep.mubr.msk.f32.mxu1 %vm2888_vm3, %v2842_v10 }
 0x360   : > { %4961 = vmatmul.mubr.msk.f32.gmra.mrb[94].mxu1 %vm2888_vm3, %v2843_v12  ;;  %v2845_v18 = vmax.f32 %v2659_v13, 0.0 }
 0x361   : > { %v2844_v16 = vmax.f32 %v2654_v15, 0.0  ;;  %v4856_v17 = vpop.f32.mrb[98].mxu0 }
 0x362   : > { %v2669_v19 = vadd.f32 %v4856_v17, %v6049_v43  ;;  %v2663_v20 = vpop.f32.mrb[99].mxu0 }
 0x363   : > { %v2664_v22 = vadd.f32 %v6049_v43, %v2663_v20  ;;  %4963 = vmatprep.mubr.msk.f32.mxu1 %vm2888_vm3, %v2844_v16 }
 0x364   : > { %4964 = vmatmul.mubr.msk.f32.gmra.mrb[96].mxu1 %vm2888_vm3, %v2845_v18  ;;  %v2847_v25 = vmax.f32 %v2669_v19, 0.0 }
 0x365   : > { %v2846_v23 = vmax.f32 %v2664_v22, 0.0  ;;  %v4859_v24 = vpop.f32.mrb[100].mxu0 }
 0x366   : > { %v2679_v26 = vadd.f32 %v4859_v24, %v6049_v43  ;;  %v2673_v27 = vpop.f32.mrb[101].mxu0 }
 0x367   : > { %v2674_v28 = vadd.f32 %v6049_v43, %v2673_v27  ;;  %4966 = vmatprep.mubr.msk.f32.mxu1 %vm2888_vm3, %v2846_v23 }
 0x368   : > { %4967 = vmatmul.mubr.msk.f32.gmra.mrb[98].mxu1 %vm2888_vm3, %v2847_v25  ;;  %v2849_v31 = vmax.f32 %v2679_v26, 0.0 }
 0x369   : > { %v2848_v29 = vmax.f32 %v2674_v28, 0.0  ;;  %v4862_v30 = vpop.f32.mrb[102].mxu0 }
 0x36a   : > { %v2689_v32 = vadd.f32 %v4862_v30, %v6049_v43  ;;  %v2683_v33 = vpop.f32.mrb[103].mxu0 }
 0x36b   : > { %v2684_v34 = vadd.f32 %v6049_v43, %v2683_v33  ;;  %4969 = vmatprep.mubr.msk.f32.mxu1 %vm2888_vm3, %v2848_v29 }
 0x36c   : > { %4970 = vmatmul.mubr.msk.f32.gmra.mrb[100].mxu1 %vm2888_vm3, %v2849_v31  ;;  %v2851_v37 = vmax.f32 %v2689_v32, 0.0 }
 0x36d   : > { %v2850_v35 = vmax.f32 %v2684_v34, 0.0  ;;  %v4865_v36 = vpop.f32.mrb[104].mxu0 }
 0x36e   : > { %v2699_v38 = vadd.f32 %v4865_v36, %v6049_v43  ;;  %v2693_v39 = vpop.f32.mrb[105].mxu0 }
 0x36f   : > { %v2694_v40 = vadd.f32 %v6049_v43, %v2693_v39  ;;  %4972 = vmatprep.mubr.msk.f32.mxu1 %vm2888_vm3, %v2850_v35 }
 0x370   : > { %4973 = vmatmul.mubr.msk.f32.gmra.mrb[102].mxu1 %vm2888_vm3, %v2851_v37  ;;  %v2853_v44 = vmax.f32 %v2699_v38, 0.0 }
 0x371   : > { %v2852_v41 = vmax.f32 %v2694_v40, 0.0  ;;  %v4868_v42 = vpop.f32.mrb[106].mxu0 }
 0x372   : > { %v2709_v45 = vadd.f32 %v4868_v42, %v6049_v43  ;;  %v2703_v46 = vpop.f32.mrb[107].mxu0 }
 0x373   : > { %v2704_v21 = vadd.f32 %v6049_v43, %v2703_v46  ;;  %4975 = vmatprep.mubr.msk.f32.mxu1 %vm2888_vm3, %v2852_v41 }
 0x374   : > { %4976 = vmatmul.mubr.msk.f32.gmra.mrb[104].mxu1 %vm2888_vm3, %v2853_v44  ;;  %v2855_v49 = vmax.f32 %v2709_v45, 0.0 }
 0x375   : > { %v2854_v47 = vmax.f32 %v2704_v21, 0.0  ;;  %v4871_v48 = vpop.f32.mrb[108].mxu0  ;;  %v6183_v21 = vld [vmem:[%s6591_s6 + $0x3] ss:$0 sm:$0xff] }
 0x376   : > { %v2719_v50 = vadd.f32 %v4871_v48, %v6049_v43  ;;  %v2713_v51 = vpop.f32.mrb[109].mxu0 }
 0x377   : > { %v2714_v52 = vadd.f32 %v6049_v43, %v2713_v51  ;;  %4978 = vmatprep.mubr.msk.f32.mxu1 %vm2888_vm3, %v2854_v47 }
 0x378   : > { %4979 = vmatmul.mubr.msk.f32.gmra.mrb[106].mxu1 %vm2888_vm3, %v2855_v49  ;;  %v2857_v55 = vmax.f32 %v2719_v50, 0.0 }
 0x379   : > { %v2856_v53 = vmax.f32 %v2714_v52, 0.0  ;;  %v4874_v54 = vpop.f32.mrb[110].mxu0 }
 0x37a   : > { %v2729_v56 = vadd.f32 %v4874_v54, %v6049_v43  ;;  %v2723_v57 = vpop.f32.mrb[111].mxu0 }
 0x37b   : > { %v2724_v58 = vadd.f32 %v6049_v43, %v2723_v57  ;;  %4981 = vmatprep.mubr.msk.f32.mxu1 %vm2888_vm3, %v2856_v53 }
 0x37c   : > { %4982 = vmatmul.mubr.msk.f32.gmra.mrb[108].mxu1 %vm2888_vm3, %v2857_v55  ;;  %v2859_v61 = vmax.f32 %v2729_v56, 0.0 }
 0x37d   : > { %v2858_v59 = vmax.f32 %v2724_v58, 0.0  ;;  %v4877_v60 = vpop.f32.mrb[112].mxu0 }
 0x37e   : > { %v2739_v62 = vadd.f32 %v4877_v60, %v6049_v43  ;;  %v2733_v63 = vpop.f32.mrb[113].mxu0 }
 0x37f   : > { %v2734_v0 = vadd.f32 %v6049_v43, %v2733_v63  ;;  %4984 = vmatprep.mubr.msk.f32.mxu1 %vm2888_vm3, %v2858_v59 }
 0x380   : > { %4985 = vmatmul.mubr.msk.f32.gmra.mrb[110].mxu1 %vm2888_vm3, %v2859_v61  ;;  %v2861_v3 = vmax.f32 %v2739_v62, 0.0 }
 0x381   : > { %v2860_v1 = vmax.f32 %v2734_v0, 0.0  ;;  %v4880_v2 = vpop.f32.mrb[114].mxu0 }
 0x382   : > { %v2749_v4 = vadd.f32 %v4880_v2, %v6049_v43  ;;  %v2743_v5 = vpop.f32.mrb[115].mxu0 }
 0x383   : > { %v2744_v6 = vadd.f32 %v6049_v43, %v2743_v5  ;;  %4987 = vmatprep.mubr.msk.f32.mxu1 %vm2888_vm3, %v2860_v1 }
 0x384   : > { %4988 = vmatmul.mubr.msk.f32.gmra.mrb[112].mxu1 %vm2888_vm3, %v2861_v3  ;;  %v2863_v9 = vmax.f32 %v2749_v4, 0.0 }
 0x385   : > { %v2862_v7 = vmax.f32 %v2744_v6, 0.0  ;;  %v4883_v8 = vpop.f32.mrb[116].mxu0 }
 0x386   : > { %v2759_v10 = vadd.f32 %v4883_v8, %v6049_v43  ;;  %v2753_v11 = vpop.f32.mrb[117].mxu0 }
 0x387   : > { %v2754_v12 = vadd.f32 %v6049_v43, %v2753_v11  ;;  %4990 = vmatprep.mubr.msk.f32.mxu1 %vm2888_vm3, %v2862_v7 }
 0x388   : > { %4991 = vmatmul.mubr.msk.f32.gmra.mrb[114].mxu1 %vm2888_vm3, %v2863_v9  ;;  %v2865_v15 = vmax.f32 %v2759_v10, 0.0 }
 0x389   : > { %v2864_v13 = vmax.f32 %v2754_v12, 0.0  ;;  %v4886_v14 = vpop.f32.mrb[118].mxu0 }
 0x38a   : > { %v2769_v16 = vadd.f32 %v4886_v14, %v6049_v43  ;;  %v2763_v17 = vpop.f32.mrb[119].mxu0 }
 0x38b   : > { %v2764_v18 = vadd.f32 %v6049_v43, %v2763_v17  ;;  %4993 = vmatprep.mubr.msk.f32.mxu1 %vm2888_vm3, %v2864_v13 }
 0x38c   : > { %4994 = vmatmul.mubr.msk.f32.gmra.mrb[116].mxu1 %vm2888_vm3, %v2865_v15  ;;  %v2867_v22 = vmax.f32 %v2769_v16, 0.0 }
 0x38d   : > { %v2866_v19 = vmax.f32 %v2764_v18, 0.0  ;;  %v4889_v20 = vpop.f32.mrb[120].mxu0 }
 0x38e   : > { %v2779_v23 = vadd.f32 %v4889_v20, %v6049_v43  ;;  %v2773_v24 = vpop.f32.mrb[121].mxu0 }
 0x38f   : > { %v2774_v25 = vadd.f32 %v6049_v43, %v2773_v24  ;;  %4996 = vmatprep.mubr.msk.f32.mxu1 %vm2888_vm3, %v2866_v19 }
 0x390   : > { %4997 = vmatmul.mubr.msk.f32.gmra.mrb[118].mxu1 %vm2888_vm3, %v2867_v22  ;;  %v2869_v28 = vmax.f32 %v2779_v23, 0.0 }
 0x391   : > { %v2868_v26 = vmax.f32 %v2774_v25, 0.0  ;;  %v4892_v27 = vpop.f32.mrb[122].mxu0 }
 0x392   : > { %v2789_v29 = vadd.f32 %v4892_v27, %v6049_v43  ;;  %v2783_v30 = vpop.f32.mrb[123].mxu0 }
 0x393   : > { %v2784_v31 = vadd.f32 %v6049_v43, %v2783_v30  ;;  %4999 = vmatprep.mubr.msk.f32.mxu1 %vm2888_vm3, %v2868_v26 }
 0x394   : > { %5000 = vmatmul.mubr.msk.f32.gmra.mrb[120].mxu1 %vm2888_vm3, %v2869_v28  ;;  %v2871_v34 = vmax.f32 %v2789_v29, 0.0 }
 0x395   : > { %v2870_v32 = vmax.f32 %v2784_v31, 0.0  ;;  %v4895_v33 = vpop.f32.mrb[124].mxu0 }
 0x396   : > { %v2799_v35 = vadd.f32 %v4895_v33, %v6049_v43  ;;  %v2793_v36 = vpop.f32.mrb[125].mxu0 }
 0x397   : > { %v2794_v37 = vadd.f32 %v6049_v43, %v2793_v36  ;;  %5002 = vmatprep.mubr.msk.f32.mxu1 %vm2888_vm3, %v2870_v32 }
 0x398   : > { %5003 = vmatmul.mubr.msk.f32.gmra.mrb[122].mxu1 %vm2888_vm3, %v2871_v34  ;;  %v2873_v40 = vmax.f32 %v2799_v35, 0.0 }
 0x399   : > { %v2872_v38 = vmax.f32 %v2794_v37, 0.0  ;;  %v4898_v39 = vpop.f32.mrb[126].mxu0 }
 0x39a   : > { %v2809_v41 = vadd.f32 %v4898_v39, %v6049_v43  ;;  %v2803_v42 = vpop.f32.mrb[127].mxu0 }
 0x39b   : > { %v2804_v44 = vadd.f32 %v6049_v43, %v2803_v42  ;;  %5005 = vmatprep.mubr.msk.f32.mxu1 %vm2888_vm3, %v2872_v38 }
 0x39c   : > { %5006 = vmatmul.mubr.msk.f32.gmra.mrb[124].mxu1 %vm2888_vm3, %v2873_v40  ;;  %v2875_v46 = vmax.f32 %v2809_v41, 0.0 }
 0x39d   : > { %v2874_v45 = vmax.f32 %v2804_v44, 0.0 }
 0x39f   : > { %5008 = vmatprep.mubr.msk.f32.mxu1 %vm2888_vm3, %v2874_v45 }
 0x3a0   : > { %5009 = vmatmul.mubr.msk.f32.gmra.mrb[126].mxu1 %vm2888_vm3, %v2875_v46 }
 0x3f7   : > { %v4917_v47 = vpop.f32.mrb[64].mxu1 }
 0x3f8   : > { %v3153_v43 = vadd.f32 %v4917_v47, %v6183_v21  ;;  %v3147_v48 = vpop.f32.mrb[65].mxu1 }
 0x3f9   : > { %v3148_v49 = vadd.f32 %v6183_v21, %v3147_v48 }
 0x3fa   : > { %3468 = vst.msk [vmem:[%s6187_s14 + $0x8] sm:$0xff] %vm3466_vm4, %v3153_v43 }
 0x3fb   : > { %3467 = vst.msk [vmem:[%s6187_s14] sm:$0xff] %vm3466_vm4, %v3148_v49  ;;  %v4920_v50 = vpop.f32.mrb[66].mxu1 }
 0x3fc   : > { %v3163_v51 = vadd.f32 %v4920_v50, %v6183_v21  ;;  %v3157_v52 = vpop.f32.mrb[67].mxu1 }
 0x3fd   : > { %v3158_v53 = vadd.f32 %v6183_v21, %v3157_v52 }
 0x3fe   : > { %3470 = vst.msk [vmem:[%s6187_s14 + $0x18] sm:$0xff] %vm3466_vm4, %v3163_v51 }
 0x3ff   : > { %3469 = vst.msk [vmem:[%s6187_s14 + $0x10] sm:$0xff] %vm3466_vm4, %v3158_v53  ;;  %v4923_v54 = vpop.f32.mrb[68].mxu1 }
 0x400   : > { %v3173_v55 = vadd.f32 %v4923_v54, %v6183_v21  ;;  %v3167_v56 = vpop.f32.mrb[69].mxu1 }
 0x401   : > { %v3168_v57 = vadd.f32 %v6183_v21, %v3167_v56 }
 0x402   : > { %3472 = vst.msk [vmem:[%s6187_s14 + $0x28] sm:$0xff] %vm3466_vm4, %v3173_v55 }
 0x403   : > { %3471 = vst.msk [vmem:[%s6187_s14 + $0x20] sm:$0xff] %vm3466_vm4, %v3168_v57  ;;  %v4926_v58 = vpop.f32.mrb[70].mxu1 }
 0x404   : > { %v3183_v59 = vadd.f32 %v4926_v58, %v6183_v21  ;;  %v3177_v60 = vpop.f32.mrb[71].mxu1 }
 0x405   : > { %v3178_v61 = vadd.f32 %v6183_v21, %v3177_v60 }
 0x406   : > { %3474 = vst.msk [vmem:[%s6187_s14 + $0x38] sm:$0xff] %vm3466_vm4, %v3183_v59 }
 0x407   : > { %3473 = vst.msk [vmem:[%s6187_s14 + $0x30] sm:$0xff] %vm3466_vm4, %v3178_v61  ;;  %v4929_v62 = vpop.f32.mrb[72].mxu1 }
 0x408   : > { %v3193_v63 = vadd.f32 %v4929_v62, %v6183_v21  ;;  %v3187_v0 = vpop.f32.mrb[73].mxu1 }
 0x409   : > { %v3188_v1 = vadd.f32 %v6183_v21, %v3187_v0 }
 0x40a   : > { %3476 = vst.msk [vmem:[%s6187_s14 + $0x48] sm:$0xff] %vm3466_vm4, %v3193_v63 }
 0x40b   : > { %3475 = vst.msk [vmem:[%s6187_s14 + $0x40] sm:$0xff] %vm3466_vm4, %v3188_v1  ;;  %v4932_v2 = vpop.f32.mrb[74].mxu1 }
 0x40c   : > { %v3203_v3 = vadd.f32 %v4932_v2, %v6183_v21  ;;  %v3197_v4 = vpop.f32.mrb[75].mxu1 }
 0x40d   : > { %v3198_v5 = vadd.f32 %v6183_v21, %v3197_v4 }
 0x40e   : > { %3478 = vst.msk [vmem:[%s6187_s14 + $0x58] sm:$0xff] %vm3466_vm4, %v3203_v3 }
 0x40f   : > { %3477 = vst.msk [vmem:[%s6187_s14 + $0x50] sm:$0xff] %vm3466_vm4, %v3198_v5  ;;  %v4935_v6 = vpop.f32.mrb[76].mxu1 }
 0x410   : > { %v3213_v7 = vadd.f32 %v4935_v6, %v6183_v21  ;;  %v3207_v8 = vpop.f32.mrb[77].mxu1 }
 0x411   : > { %v3208_v9 = vadd.f32 %v6183_v21, %v3207_v8 }
 0x412   : > { %3480 = vst.msk [vmem:[%s6187_s14 + $0x68] sm:$0xff] %vm3466_vm4, %v3213_v7 }
 0x413   : > { %3479 = vst.msk [vmem:[%s6187_s14 + $0x60] sm:$0xff] %vm3466_vm4, %v3208_v9  ;;  %v4938_v10 = vpop.f32.mrb[78].mxu1 }
 0x414   : > { %v3223_v11 = vadd.f32 %v4938_v10, %v6183_v21  ;;  %v3217_v12 = vpop.f32.mrb[79].mxu1 }
 0x415   : > { %v3218_v13 = vadd.f32 %v6183_v21, %v3217_v12 }
 0x416   : > { %3482 = vst.msk [vmem:[%s6187_s14 + $0x78] sm:$0xff] %vm3466_vm4, %v3223_v11 }
 0x417   : > { %3481 = vst.msk [vmem:[%s6187_s14 + $0x70] sm:$0xff] %vm3466_vm4, %v3218_v13  ;;  %v4941_v14 = vpop.f32.mrb[80].mxu1 }
 0x418   : > { %v3233_v15 = vadd.f32 %v4941_v14, %v6183_v21  ;;  %v3227_v16 = vpop.f32.mrb[81].mxu1 }
 0x419   : > { %v3228_v17 = vadd.f32 %v6183_v21, %v3227_v16 }
 0x41a   : > { %3484 = vst.msk [vmem:[%s6187_s14 + $0x88] sm:$0xff] %vm3466_vm4, %v3233_v15 }
 0x41b   : > { %3483 = vst.msk [vmem:[%s6187_s14 + $0x80] sm:$0xff] %vm3466_vm4, %v3228_v17  ;;  %v4944_v18 = vpop.f32.mrb[82].mxu1 }
 0x41c   : > { %v3243_v19 = vadd.f32 %v4944_v18, %v6183_v21  ;;  %v3237_v20 = vpop.f32.mrb[83].mxu1 }
 0x41d   : > { %v3238_v22 = vadd.f32 %v6183_v21, %v3237_v20 }
 0x41e   : > { %3486 = vst.msk [vmem:[%s6187_s14 + $0x98] sm:$0xff] %vm3466_vm4, %v3243_v19 }
 0x41f   : > { %3485 = vst.msk [vmem:[%s6187_s14 + $0x90] sm:$0xff] %vm3466_vm4, %v3238_v22  ;;  %v4947_v23 = vpop.f32.mrb[84].mxu1 }
 0x420   : > { %v3253_v24 = vadd.f32 %v4947_v23, %v6183_v21  ;;  %v3247_v25 = vpop.f32.mrb[85].mxu1 }
 0x421   : > { %v3248_v26 = vadd.f32 %v6183_v21, %v3247_v25 }
 0x422   : > { %3488 = vst.msk [vmem:[%s6187_s14 + $0xa8] sm:$0xff] %vm3466_vm4, %v3253_v24 }
 0x423   : > { %3487 = vst.msk [vmem:[%s6187_s14 + $0xa0] sm:$0xff] %vm3466_vm4, %v3248_v26  ;;  %v4950_v27 = vpop.f32.mrb[86].mxu1 }
 0x424   : > { %v3263_v28 = vadd.f32 %v4950_v27, %v6183_v21  ;;  %v3257_v29 = vpop.f32.mrb[87].mxu1 }
 0x425   : > { %v3258_v30 = vadd.f32 %v6183_v21, %v3257_v29 }
 0x426   : > { %3490 = vst.msk [vmem:[%s6187_s14 + $0xb8] sm:$0xff] %vm3466_vm4, %v3263_v28 }
 0x427   : > { %3489 = vst.msk [vmem:[%s6187_s14 + $0xb0] sm:$0xff] %vm3466_vm4, %v3258_v30  ;;  %v4953_v31 = vpop.f32.mrb[88].mxu1 }
 0x428   : > { %v3273_v32 = vadd.f32 %v4953_v31, %v6183_v21  ;;  %v3267_v33 = vpop.f32.mrb[89].mxu1 }
 0x429   : > { %v3268_v34 = vadd.f32 %v6183_v21, %v3267_v33 }
 0x42a   : > { %3492 = vst.msk [vmem:[%s6187_s14 + $0xc8] sm:$0xff] %vm3466_vm4, %v3273_v32 }
 0x42b   : > { %3491 = vst.msk [vmem:[%s6187_s14 + $0xc0] sm:$0xff] %vm3466_vm4, %v3268_v34  ;;  %v4956_v35 = vpop.f32.mrb[90].mxu1 }
 0x42c   : > { %v3283_v36 = vadd.f32 %v4956_v35, %v6183_v21  ;;  %v3277_v37 = vpop.f32.mrb[91].mxu1 }
 0x42d   : > { %v3278_v38 = vadd.f32 %v6183_v21, %v3277_v37 }
 0x42e   : > { %3494 = vst.msk [vmem:[%s6187_s14 + $0xd8] sm:$0xff] %vm3466_vm4, %v3283_v36 }
 0x42f   : > { %3493 = vst.msk [vmem:[%s6187_s14 + $0xd0] sm:$0xff] %vm3466_vm4, %v3278_v38  ;;  %v4959_v39 = vpop.f32.mrb[92].mxu1 }
 0x430   : > { %v3293_v40 = vadd.f32 %v4959_v39, %v6183_v21  ;;  %v3287_v41 = vpop.f32.mrb[93].mxu1 }
 0x431   : > { %v3288_v42 = vadd.f32 %v6183_v21, %v3287_v41 }
 0x432   : > { %3496 = vst.msk [vmem:[%s6187_s14 + $0xe8] sm:$0xff] %vm3466_vm4, %v3293_v40 }
 0x433   : > { %3495 = vst.msk [vmem:[%s6187_s14 + $0xe0] sm:$0xff] %vm3466_vm4, %v3288_v42  ;;  %v4962_v44 = vpop.f32.mrb[94].mxu1 }
 0x434   : > { %v3303_v45 = vadd.f32 %v4962_v44, %v6183_v21  ;;  %v3297_v46 = vpop.f32.mrb[95].mxu1 }
 0x435   : > { %v3298_v47 = vadd.f32 %v6183_v21, %v3297_v46 }
 0x436   : > { %3498 = vst.msk [vmem:[%s6187_s14 + $0xf8] sm:$0xff] %vm3466_vm4, %v3303_v45 }
 0x437   : > { %3497 = vst.msk [vmem:[%s6187_s14 + $0xf0] sm:$0xff] %vm3466_vm4, %v3298_v47  ;;  %v4965_v43 = vpop.f32.mrb[96].mxu1 }
 0x438   : > { %v3313_v48 = vadd.f32 %v4965_v43, %v6183_v21  ;;  %v3307_v49 = vpop.f32.mrb[97].mxu1 }
 0x439   : > { %v3308_v50 = vadd.f32 %v6183_v21, %v3307_v49 }
 0x43a   : > { %3500 = vst.msk [vmem:[%s6187_s14 + $0x108] sm:$0xff] %vm3466_vm4, %v3313_v48 }
 0x43b   : > { %3499 = vst.msk [vmem:[%s6187_s14 + $0x100] sm:$0xff] %vm3466_vm4, %v3308_v50  ;;  %v4968_v51 = vpop.f32.mrb[98].mxu1 }
 0x43c   : > { %v3323_v52 = vadd.f32 %v4968_v51, %v6183_v21  ;;  %v3317_v53 = vpop.f32.mrb[99].mxu1 }
 0x43d   : > { %v3318_v54 = vadd.f32 %v6183_v21, %v3317_v53 }
 0x43e   : > { %3502 = vst.msk [vmem:[%s6187_s14 + $0x118] sm:$0xff] %vm3466_vm4, %v3323_v52 }
 0x43f   : > { %3501 = vst.msk [vmem:[%s6187_s14 + $0x110] sm:$0xff] %vm3466_vm4, %v3318_v54  ;;  %v4971_v55 = vpop.f32.mrb[100].mxu1 }
 0x440   : > { %v3333_v56 = vadd.f32 %v4971_v55, %v6183_v21  ;;  %v3327_v57 = vpop.f32.mrb[101].mxu1 }
 0x441   : > { %v3328_v58 = vadd.f32 %v6183_v21, %v3327_v57 }
 0x442   : > { %3504 = vst.msk [vmem:[%s6187_s14 + $0x128] sm:$0xff] %vm3466_vm4, %v3333_v56 }
 0x443   : > { %3503 = vst.msk [vmem:[%s6187_s14 + $0x120] sm:$0xff] %vm3466_vm4, %v3328_v58  ;;  %v4974_v59 = vpop.f32.mrb[102].mxu1 }
 0x444   : > { %v3343_v60 = vadd.f32 %v4974_v59, %v6183_v21  ;;  %v3337_v61 = vpop.f32.mrb[103].mxu1 }
 0x445   : > { %v3338_v62 = vadd.f32 %v6183_v21, %v3337_v61 }
 0x446   : > { %3506 = vst.msk [vmem:[%s6187_s14 + $0x138] sm:$0xff] %vm3466_vm4, %v3343_v60 }
 0x447   : > { %3505 = vst.msk [vmem:[%s6187_s14 + $0x130] sm:$0xff] %vm3466_vm4, %v3338_v62  ;;  %v4977_v63 = vpop.f32.mrb[104].mxu1 }
 0x448   : > { %v3353_v0 = vadd.f32 %v4977_v63, %v6183_v21  ;;  %v3347_v1 = vpop.f32.mrb[105].mxu1 }
 0x449   : > { %v3348_v2 = vadd.f32 %v6183_v21, %v3347_v1 }
 0x44a   : > { %3508 = vst.msk [vmem:[%s6187_s14 + $0x148] sm:$0xff] %vm3466_vm4, %v3353_v0 }
 0x44b   : > { %3507 = vst.msk [vmem:[%s6187_s14 + $0x140] sm:$0xff] %vm3466_vm4, %v3348_v2  ;;  %v4980_v3 = vpop.f32.mrb[106].mxu1 }
 0x44c   : > { %v3363_v4 = vadd.f32 %v4980_v3, %v6183_v21  ;;  %v3357_v5 = vpop.f32.mrb[107].mxu1 }
 0x44d   : > { %v3358_v6 = vadd.f32 %v6183_v21, %v3357_v5 }
 0x44e   : > { %3510 = vst.msk [vmem:[%s6187_s14 + $0x158] sm:$0xff] %vm3466_vm4, %v3363_v4 }
 0x44f   : > { %3509 = vst.msk [vmem:[%s6187_s14 + $0x150] sm:$0xff] %vm3466_vm4, %v3358_v6  ;;  %v4983_v7 = vpop.f32.mrb[108].mxu1 }
 0x450   : > { %v3373_v8 = vadd.f32 %v4983_v7, %v6183_v21  ;;  %v3367_v9 = vpop.f32.mrb[109].mxu1 }
 0x451   : > { %v3368_v10 = vadd.f32 %v6183_v21, %v3367_v9 }
 0x452   : > { %3512 = vst.msk [vmem:[%s6187_s14 + $0x168] sm:$0xff] %vm3466_vm4, %v3373_v8 }
 0x453   : > { %3511 = vst.msk [vmem:[%s6187_s14 + $0x160] sm:$0xff] %vm3466_vm4, %v3368_v10  ;;  %v4986_v11 = vpop.f32.mrb[110].mxu1 }
 0x454   : > { %v3383_v12 = vadd.f32 %v4986_v11, %v6183_v21  ;;  %v3377_v13 = vpop.f32.mrb[111].mxu1 }
 0x455   : > { %v3378_v14 = vadd.f32 %v6183_v21, %v3377_v13 }
 0x456   : > { %3514 = vst.msk [vmem:[%s6187_s14 + $0x178] sm:$0xff] %vm3466_vm4, %v3383_v12 }
 0x457   : > { %3513 = vst.msk [vmem:[%s6187_s14 + $0x170] sm:$0xff] %vm3466_vm4, %v3378_v14  ;;  %v4989_v15 = vpop.f32.mrb[112].mxu1 }
 0x458   : > { %v3393_v16 = vadd.f32 %v4989_v15, %v6183_v21  ;;  %v3387_v17 = vpop.f32.mrb[113].mxu1 }
 0x459   : > { %v3388_v18 = vadd.f32 %v6183_v21, %v3387_v17 }
 0x45a   : > { %3516 = vst.msk [vmem:[%s6187_s14 + $0x188] sm:$0xff] %vm3466_vm4, %v3393_v16 }
 0x45b   : > { %3515 = vst.msk [vmem:[%s6187_s14 + $0x180] sm:$0xff] %vm3466_vm4, %v3388_v18  ;;  %v4992_v19 = vpop.f32.mrb[114].mxu1 }
 0x45c   : > { %v3403_v20 = vadd.f32 %v4992_v19, %v6183_v21  ;;  %v3397_v22 = vpop.f32.mrb[115].mxu1 }
 0x45d   : > { %v3398_v23 = vadd.f32 %v6183_v21, %v3397_v22 }
 0x45e   : > { %3518 = vst.msk [vmem:[%s6187_s14 + $0x198] sm:$0xff] %vm3466_vm4, %v3403_v20 }
 0x45f   : > { %3517 = vst.msk [vmem:[%s6187_s14 + $0x190] sm:$0xff] %vm3466_vm4, %v3398_v23  ;;  %v4995_v24 = vpop.f32.mrb[116].mxu1 }
 0x460   : > { %v3413_v25 = vadd.f32 %v4995_v24, %v6183_v21  ;;  %v3407_v26 = vpop.f32.mrb[117].mxu1 }
 0x461   : > { %v3408_v27 = vadd.f32 %v6183_v21, %v3407_v26 }
 0x462   : > { %3520 = vst.msk [vmem:[%s6187_s14 + $0x1a8] sm:$0xff] %vm3466_vm4, %v3413_v25 }
 0x463   : > { %3519 = vst.msk [vmem:[%s6187_s14 + $0x1a0] sm:$0xff] %vm3466_vm4, %v3408_v27  ;;  %v4998_v28 = vpop.f32.mrb[118].mxu1 }
 0x464   : > { %v3423_v29 = vadd.f32 %v4998_v28, %v6183_v21  ;;  %v3417_v30 = vpop.f32.mrb[119].mxu1 }
 0x465   : > { %v3418_v31 = vadd.f32 %v6183_v21, %v3417_v30 }
 0x466   : > { %3522 = vst.msk [vmem:[%s6187_s14 + $0x1b8] sm:$0xff] %vm3466_vm4, %v3423_v29 }
 0x467   : > { %3521 = vst.msk [vmem:[%s6187_s14 + $0x1b0] sm:$0xff] %vm3466_vm4, %v3418_v31  ;;  %v5001_v32 = vpop.f32.mrb[120].mxu1 }
 0x468   : > { %v3433_v33 = vadd.f32 %v5001_v32, %v6183_v21  ;;  %v3427_v34 = vpop.f32.mrb[121].mxu1 }
 0x469   : > { %v3428_v35 = vadd.f32 %v6183_v21, %v3427_v34 }
 0x46a   : > { %3524 = vst.msk [vmem:[%s6187_s14 + $0x1c8] sm:$0xff] %vm3466_vm4, %v3433_v33 }
 0x46b   : > { %3523 = vst.msk [vmem:[%s6187_s14 + $0x1c0] sm:$0xff] %vm3466_vm4, %v3428_v35  ;;  %v5004_v36 = vpop.f32.mrb[122].mxu1 }
 0x46c   : > { %v3443_v37 = vadd.f32 %v5004_v36, %v6183_v21  ;;  %v3437_v38 = vpop.f32.mrb[123].mxu1 }
 0x46d   : > { %v3438_v39 = vadd.f32 %v6183_v21, %v3437_v38 }
 0x46e   : > { %3526 = vst.msk [vmem:[%s6187_s14 + $0x1d8] sm:$0xff] %vm3466_vm4, %v3443_v37 }
 0x46f   : > { %3525 = vst.msk [vmem:[%s6187_s14 + $0x1d0] sm:$0xff] %vm3466_vm4, %v3438_v39  ;;  %v5007_v40 = vpop.f32.mrb[124].mxu1 }
 0x470   : > { %v3453_v41 = vadd.f32 %v5007_v40, %v6183_v21  ;;  %v3447_v42 = vpop.f32.mrb[125].mxu1 }
 0x471   : > { %v3448_v44 = vadd.f32 %v6183_v21, %v3447_v42  ;;  %3537 = sbr.rel (!%p5302_p4) target bundleno = 1216 (0x4c0), region = 52 }
 0x472   : > { %3528 = vst.msk [vmem:[%s6187_s14 + $0x1e8] sm:$0xff] %vm3466_vm4, %v3453_v41 }
 0x473   : > { %3527 = vst.msk [vmem:[%s6187_s14 + $0x1e0] sm:$0xff] %vm3466_vm4, %v3448_v44  ;;  %v5010_v45 = vpop.f32.mrb[126].mxu1 }
 0x474   : > { %v3463_v46 = vadd.f32 %v5010_v45, %v6183_v21  ;;  %v3457_v47 = vpop.f32.mrb[127].mxu1 }
 0x475   : > { %v3458_v43 = vadd.f32 %v6183_v21, %v3457_v47 }
 0x476   : > { %3530 = vst.msk [vmem:[%s6187_s14 + $0x1f8] sm:$0xff] %vm3466_vm4, %v3463_v46 }
 0x477   : > { %3529 = vst.msk [vmem:[%s6187_s14 + $0x1f0] sm:$0xff] %vm3466_vm4, %v3458_v43 }
 0x478   : > { %s6603_s24 = smov (!%p3540_p8, %s3539_s24), 64 }
 0x479   : > { %s4281_s19 = sshll.u32 %s6603_s24, 7 }
 0x47a   : > { %p4284_p9 = scmp.eq.s32.totalorder %s4281_s19, 0 }
 0x47b   : > { %s6392_s20 = sshrl.u32 (!%p4284_p9), %s6603_s24, 6 }
 0x47c   : > { %3548 = sbr.rel (%p4284_p9) target bundleno = 1216 (0x4c0), region = 56  ;;  %p4285_p10 = scmp.le.s32.totalorder (!%p4284_p9), %s6392_s20, 0 }
 0x483   : > { %3960 = sbr.rel (%p4285_p10) target bundleno = 1195 (0x4ab), region = 135  ;;  %s6594_s27 = smov (!%p4285_p10), %s6386_s18 }
 0x484   : > { %s6595_s9 = smov (!%p4285_p10), %s6187_s14  ;;  %s6401_s10 = smov (!%p4285_p10), 0  }
 0x485   : > { %s6403_s21 = smov (!%p4285_p10), 0  }
 0x48a LB: >> { %v3736_v21 = vld [vmem:[%s5210_s9] sm:$0xff]  ;;  %v3738_v48 = vld [vmem:[%s5210_s9 + $0x8] sm:$0xff]  ;;  %v3740_v49 = vld [vmem:[%s5210_s9 + $0x10] sm:$0xff]  ;;  %s3864_s22 = sadd.s32 1, %s5214_s10  ;;  %s3730_s21 = sadd.s32 1, %s5218_s21   ;;  %s5218_s21 = sphi %s6403_s21, %s3730_s21   ;;  %s5214_s10 = sphi %s6401_s10, %s6598_s10   ;;  %s5210_s9 = sphi %s6595_s9, %s6597_s9   ;;  %s5206_s27 = sphi %s6594_s27, %s6596_s27  }
 0x48b   : >> { %3737 = vst [vmem:[%s5206_s27] sm:$0xff] %v3736_v21  ;;  %3739 = vst [vmem:[%s5206_s27 + $0x8] sm:$0xff] %v3738_v48  ;;  %v3742_v50 = vld [vmem:[%s5210_s9 + $0x18] sm:$0xff]  ;;  %v3744_v51 = vld [vmem:[%s5210_s9 + $0x20] sm:$0xff]  ;;  %p3865_p11 = scmp.ge.s32.totalorder %s3864_s22, %s6392_s20  ;;  %p3729_p12 = scmp.ge.s32.totalorder %s3730_s21, %s6392_s20 }
 0x48c   : >> { %3741 = vst [vmem:[%s5206_s27 + $0x10] sm:$0xff] %v3740_v49  ;;  %v3746_v52 = vld [vmem:[%s5210_s9 + $0x28] sm:$0xff]  ;;  %3743 = vst [vmem:[%s5206_s27 + $0x18] sm:$0xff] %v3742_v50  ;;  %v3748_v53 = vld [vmem:[%s5210_s9 + $0x30] sm:$0xff] }
 0x48d   : >> { %3745 = vst [vmem:[%s5206_s27 + $0x20] sm:$0xff] %v3744_v51  ;;  %3747 = vst [vmem:[%s5206_s27 + $0x28] sm:$0xff] %v3746_v52  ;;  %v3750_v54 = vld [vmem:[%s5210_s9 + $0x38] sm:$0xff]  ;;  %v3752_v55 = vld [vmem:[%s5210_s9 + $0x40] sm:$0xff]  ;;  %s6605_s22 = smov (%p3865_p11, %s3864_s22), 0 }
 0x48e   : >> { %3749 = vst [vmem:[%s5206_s27 + $0x30] sm:$0xff] %v3748_v53  ;;  %3751 = vst [vmem:[%s5206_s27 + $0x38] sm:$0xff] %v3750_v54  ;;  %v3754_v56 = vld [vmem:[%s5210_s9 + $0x48] sm:$0xff]  ;;  %v3756_v57 = vld [vmem:[%s5210_s9 + $0x50] sm:$0xff]  ;;  %s4286_s23 = sshll.u32 %s6605_s22, 9  ;;  %s6598_s10 = smov %s6605_s22 }
 0x48f   : >> { %3753 = vst [vmem:[%s5206_s27 + $0x40] sm:$0xff] %v3752_v55  ;;  %v3758_v58 = vld [vmem:[%s5210_s9 + $0x58] sm:$0xff]  ;;  %3755 = vst [vmem:[%s5206_s27 + $0x48] sm:$0xff] %v3754_v56  ;;  %v3760_v59 = vld [vmem:[%s5210_s9 + $0x60] sm:$0xff]  ;;  %s6459_s26 = scalar_lea.vmem %s6187_s14, %s4286_s23 [#allocation3]   ;;  %s6462_s29 = scalar_lea.vmem %s6386_s18, %s4286_s23  }
 0x490   : >> { %3757 = vst [vmem:[%s5206_s27 + $0x50] sm:$0xff] %v3756_v57  ;;  %3759 = vst [vmem:[%s5206_s27 + $0x58] sm:$0xff] %v3758_v58  ;;  %v3762_v60 = vld [vmem:[%s5210_s9 + $0x68] sm:$0xff]  ;;  %v3764_v61 = vld [vmem:[%s5210_s9 + $0x70] sm:$0xff] }
 0x491   : >> { %3761 = vst [vmem:[%s5206_s27 + $0x60] sm:$0xff] %v3760_v59  ;;  %3763 = vst [vmem:[%s5206_s27 + $0x68] sm:$0xff] %v3762_v60  ;;  %v3766_v62 = vld [vmem:[%s5210_s9 + $0x78] sm:$0xff]  ;;  %v3768_v63 = vld [vmem:[%s5210_s9 + $0x80] sm:$0xff] }
 0x492   : >> { %3765 = vst [vmem:[%s5206_s27 + $0x70] sm:$0xff] %v3764_v61  ;;  %v3770_v0 = vld [vmem:[%s5210_s9 + $0x88] sm:$0xff]  ;;  %3767 = vst [vmem:[%s5206_s27 + $0x78] sm:$0xff] %v3766_v62  ;;  %v3772_v1 = vld [vmem:[%s5210_s9 + $0x90] sm:$0xff] }
 0x493   : >> { %3769 = vst [vmem:[%s5206_s27 + $0x80] sm:$0xff] %v3768_v63  ;;  %3771 = vst [vmem:[%s5206_s27 + $0x88] sm:$0xff] %v3770_v0  ;;  %v3774_v2 = vld [vmem:[%s5210_s9 + $0x98] sm:$0xff]  ;;  %v3776_v3 = vld [vmem:[%s5210_s9 + $0xa0] sm:$0xff] }
 0x494   : >> { %3773 = vst [vmem:[%s5206_s27 + $0x90] sm:$0xff] %v3772_v1  ;;  %3775 = vst [vmem:[%s5206_s27 + $0x98] sm:$0xff] %v3774_v2  ;;  %v3778_v4 = vld [vmem:[%s5210_s9 + $0xa8] sm:$0xff]  ;;  %v3780_v5 = vld [vmem:[%s5210_s9 + $0xb0] sm:$0xff] }
 0x495   : >> { %3777 = vst [vmem:[%s5206_s27 + $0xa0] sm:$0xff] %v3776_v3  ;;  %v3782_v6 = vld [vmem:[%s5210_s9 + $0xb8] sm:$0xff]  ;;  %3779 = vst [vmem:[%s5206_s27 + $0xa8] sm:$0xff] %v3778_v4  ;;  %v3784_v7 = vld [vmem:[%s5210_s9 + $0xc0] sm:$0xff] }
 0x496   : >> { %3781 = vst [vmem:[%s5206_s27 + $0xb0] sm:$0xff] %v3780_v5  ;;  %3783 = vst [vmem:[%s5206_s27 + $0xb8] sm:$0xff] %v3782_v6  ;;  %v3786_v8 = vld [vmem:[%s5210_s9 + $0xc8] sm:$0xff]  ;;  %v3788_v9 = vld [vmem:[%s5210_s9 + $0xd0] sm:$0xff] }
 0x497   : >> { %3785 = vst [vmem:[%s5206_s27 + $0xc0] sm:$0xff] %v3784_v7  ;;  %3787 = vst [vmem:[%s5206_s27 + $0xc8] sm:$0xff] %v3786_v8  ;;  %v3790_v10 = vld [vmem:[%s5210_s9 + $0xd8] sm:$0xff]  ;;  %v3792_v11 = vld [vmem:[%s5210_s9 + $0xe0] sm:$0xff] }
 0x498   : >> { %3789 = vst [vmem:[%s5206_s27 + $0xd0] sm:$0xff] %v3788_v9  ;;  %v3794_v12 = vld [vmem:[%s5210_s9 + $0xe8] sm:$0xff]  ;;  %3791 = vst [vmem:[%s5206_s27 + $0xd8] sm:$0xff] %v3790_v10  ;;  %v3796_v13 = vld [vmem:[%s5210_s9 + $0xf0] sm:$0xff] }
 0x499   : >> { %3793 = vst [vmem:[%s5206_s27 + $0xe0] sm:$0xff] %v3792_v11  ;;  %3795 = vst [vmem:[%s5206_s27 + $0xe8] sm:$0xff] %v3794_v12  ;;  %v3798_v14 = vld [vmem:[%s5210_s9 + $0xf8] sm:$0xff]  ;;  %v3800_v15 = vld [vmem:[%s5210_s9 + $0x100] sm:$0xff] }
 0x49a   : >> { %3797 = vst [vmem:[%s5206_s27 + $0xf0] sm:$0xff] %v3796_v13  ;;  %3799 = vst [vmem:[%s5206_s27 + $0xf8] sm:$0xff] %v3798_v14  ;;  %v3802_v16 = vld [vmem:[%s5210_s9 + $0x108] sm:$0xff]  ;;  %v3804_v17 = vld [vmem:[%s5210_s9 + $0x110] sm:$0xff] }
 0x49b   : >> { %3801 = vst [vmem:[%s5206_s27 + $0x100] sm:$0xff] %v3800_v15  ;;  %v3806_v18 = vld [vmem:[%s5210_s9 + $0x118] sm:$0xff]  ;;  %3803 = vst [vmem:[%s5206_s27 + $0x108] sm:$0xff] %v3802_v16  ;;  %v3808_v19 = vld [vmem:[%s5210_s9 + $0x120] sm:$0xff] }
 0x49c   : >> { %3805 = vst [vmem:[%s5206_s27 + $0x110] sm:$0xff] %v3804_v17  ;;  %3807 = vst [vmem:[%s5206_s27 + $0x118] sm:$0xff] %v3806_v18  ;;  %v3810_v20 = vld [vmem:[%s5210_s9 + $0x128] sm:$0xff]  ;;  %v3812_v22 = vld [vmem:[%s5210_s9 + $0x130] sm:$0xff] }
 0x49d   : >> { %3809 = vst [vmem:[%s5206_s27 + $0x120] sm:$0xff] %v3808_v19  ;;  %3811 = vst [vmem:[%s5206_s27 + $0x128] sm:$0xff] %v3810_v20  ;;  %v3814_v23 = vld [vmem:[%s5210_s9 + $0x138] sm:$0xff]  ;;  %v3816_v24 = vld [vmem:[%s5210_s9 + $0x140] sm:$0xff] }
 0x49e   : >> { %3813 = vst [vmem:[%s5206_s27 + $0x130] sm:$0xff] %v3812_v22  ;;  %v3818_v25 = vld [vmem:[%s5210_s9 + $0x148] sm:$0xff]  ;;  %3815 = vst [vmem:[%s5206_s27 + $0x138] sm:$0xff] %v3814_v23  ;;  %v3820_v26 = vld [vmem:[%s5210_s9 + $0x150] sm:$0xff] }
 0x49f   : >> { %3817 = vst [vmem:[%s5206_s27 + $0x140] sm:$0xff] %v3816_v24  ;;  %3819 = vst [vmem:[%s5206_s27 + $0x148] sm:$0xff] %v3818_v25  ;;  %v3822_v27 = vld [vmem:[%s5210_s9 + $0x158] sm:$0xff]  ;;  %v3824_v28 = vld [vmem:[%s5210_s9 + $0x160] sm:$0xff] }
 0x4a0   : >> { %3821 = vst [vmem:[%s5206_s27 + $0x150] sm:$0xff] %v3820_v26  ;;  %3823 = vst [vmem:[%s5206_s27 + $0x158] sm:$0xff] %v3822_v27  ;;  %v3826_v29 = vld [vmem:[%s5210_s9 + $0x168] sm:$0xff]  ;;  %v3828_v30 = vld [vmem:[%s5210_s9 + $0x170] sm:$0xff] }
 0x4a1   : >> { %3825 = vst [vmem:[%s5206_s27 + $0x160] sm:$0xff] %v3824_v28  ;;  %v3830_v31 = vld [vmem:[%s5210_s9 + $0x178] sm:$0xff]  ;;  %3827 = vst [vmem:[%s5206_s27 + $0x168] sm:$0xff] %v3826_v29  ;;  %v3832_v32 = vld [vmem:[%s5210_s9 + $0x180] sm:$0xff] }
 0x4a2   : >> { %3829 = vst [vmem:[%s5206_s27 + $0x170] sm:$0xff] %v3828_v30  ;;  %3831 = vst [vmem:[%s5206_s27 + $0x178] sm:$0xff] %v3830_v31  ;;  %v3834_v33 = vld [vmem:[%s5210_s9 + $0x188] sm:$0xff]  ;;  %v3836_v34 = vld [vmem:[%s5210_s9 + $0x190] sm:$0xff] }
 0x4a3   : >> { %3833 = vst [vmem:[%s5206_s27 + $0x180] sm:$0xff] %v3832_v32  ;;  %3835 = vst [vmem:[%s5206_s27 + $0x188] sm:$0xff] %v3834_v33  ;;  %v3838_v35 = vld [vmem:[%s5210_s9 + $0x198] sm:$0xff]  ;;  %v3840_v36 = vld [vmem:[%s5210_s9 + $0x1a0] sm:$0xff] }
 0x4a4   : >> { %3837 = vst [vmem:[%s5206_s27 + $0x190] sm:$0xff] %v3836_v34  ;;  %v3842_v37 = vld [vmem:[%s5210_s9 + $0x1a8] sm:$0xff]  ;;  %3839 = vst [vmem:[%s5206_s27 + $0x198] sm:$0xff] %v3838_v35  ;;  %v3844_v38 = vld [vmem:[%s5210_s9 + $0x1b0] sm:$0xff]  ;;  %3732 = sbr.rel (!%p3729_p12) target bundleno = 1162 (0x48a), region = 141 }
 0x4a5   : >> { %3841 = vst [vmem:[%s5206_s27 + $0x1a0] sm:$0xff] %v3840_v36  ;;  %3843 = vst [vmem:[%s5206_s27 + $0x1a8] sm:$0xff] %v3842_v37  ;;  %v3846_v39 = vld [vmem:[%s5210_s9 + $0x1b8] sm:$0xff]  ;;  %v3848_v40 = vld [vmem:[%s5210_s9 + $0x1c0] sm:$0xff] }
 0x4a6   : >> { %3845 = vst [vmem:[%s5206_s27 + $0x1b0] sm:$0xff] %v3844_v38  ;;  %3847 = vst [vmem:[%s5206_s27 + $0x1b8] sm:$0xff] %v3846_v39  ;;  %v3850_v41 = vld [vmem:[%s5210_s9 + $0x1c8] sm:$0xff]  ;;  %v3852_v42 = vld [vmem:[%s5210_s9 + $0x1d0] sm:$0xff] }
 0x4a7   : >> { %3849 = vst [vmem:[%s5206_s27 + $0x1c0] sm:$0xff] %v3848_v40  ;;  %v3854_v44 = vld [vmem:[%s5210_s9 + $0x1d8] sm:$0xff]  ;;  %3851 = vst [vmem:[%s5206_s27 + $0x1c8] sm:$0xff] %v3850_v41  ;;  %v3856_v45 = vld [vmem:[%s5210_s9 + $0x1e0] sm:$0xff] }
 0x4a8   : >> { %3853 = vst [vmem:[%s5206_s27 + $0x1d0] sm:$0xff] %v3852_v42  ;;  %3855 = vst [vmem:[%s5206_s27 + $0x1d8] sm:$0xff] %v3854_v44  ;;  %v3858_v46 = vld [vmem:[%s5210_s9 + $0x1e8] sm:$0xff]  ;;  %v3860_v47 = vld [vmem:[%s5210_s9 + $0x1f0] sm:$0xff] }
 0x4a9   : >> { %3857 = vst [vmem:[%s5206_s27 + $0x1e0] sm:$0xff] %v3856_v45  ;;  %3859 = vst [vmem:[%s5206_s27 + $0x1e8] sm:$0xff] %v3858_v46  ;;  %v3862_v43 = vld [vmem:[%s5210_s9 + $0x1f8] sm:$0xff]  ;;  %s6597_s9 = smov %s6459_s26 }
 0x4aa   : >> { %3861 = vst [vmem:[%s5206_s27 + $0x1f0] sm:$0xff] %v3860_v47  ;;  %3863 = vst [vmem:[%s5206_s27 + $0x1f8] sm:$0xff] %v3862_v43  ;;  %s6596_s27 = smov %s6462_s29 }
 0x4ab PF: > { %s6567_s30 = sand.u32 63, %s6603_s24   ;;  %s4297_s11 = sshll.u32 %s6392_s20, 9 }
 0x4ac   : > { %s3875_s12 = scalar_lea.vmem %s6187_s14, %s4297_s11 [#allocation3]   ;;  %s3877_s13 = scalar_lea.vmem %s6386_s18, %s4297_s11  }
 0x4ad   : > { %p4291_p13 = scmp.le.s32.totalorder %s6567_s30, 0 }
 0x4ae   : > { %s5220_s15 = smov (!%p4291_p13), %s3877_s13   ;;  %s5224_s16 = smov (!%p4291_p13), %s3875_s12  }
 0x4af   : > { %3974 = sbr.rel (%p4291_p13) target bundleno = 1216 (0x4c0), region = 146  ;;  %s5228_s17 = smov (!%p4291_p13), 0  }
 0x4b0   : > { %s5232_s19 = smov (!%p4291_p13), 0  }
 0x4b6 LB: >> { %v3887_v21 = vld [vmem:[%s5226_s16] sm:$0xff]  ;;  %s3889_s24 = sadd.s32 1, %s5230_s17  ;;  %s3881_s19 = sadd.s32 1, %s5234_s19   ;;  %s5234_s19 = sphi %s5232_s19, %s3881_s19   ;;  %s5230_s17 = sphi %s5228_s17, %s5229_s17   ;;  %s5226_s16 = sphi %s5224_s16, %s3894_s16   ;;  %s5222_s15 = sphi %s5220_s15, %s3895_s15  }
 0x4b7   : >> { %3888 = vst [vmem:[%s5222_s15] sm:$0xff] %v3887_v21  ;;  %p3890_p0 = scmp.ge.s32.totalorder %s3889_s24, %s6567_s30  ;;  %p3880_p1 = scmp.ge.s32.totalorder %s3881_s19, %s6567_s30 }
 0x4b9   : >> { %s6607_s24 = smov (%p3890_p0, %s3889_s24), 0  ;;  %3883 = sbr.rel (!%p3880_p1) target bundleno = 1206 (0x4b6), region = 152 }
 0x4ba   : >> { %s4292_s14 = sshll.u32 %s6607_s24, 3  ;;  %s5229_s17 = smov %s6607_s24  }
 0x4bb   : >> { %s3894_s16 = scalar_lea.vmem %s3875_s12, %s4292_s14 [#allocation3]   ;;  %s3895_s15 = scalar_lea.vmem %s3877_s13, %s4292_s14  }
 0x4c0 PF: > { %p14_p2 = scmp.ge.s32.totalorder %s5292_s28, 4   ;;  %s6599_s24 = smov %s5198_s25 }
 0x4c1   : > { %s6600_s25 = smov %s5300_s8  ;;  %s6601_s26 = smov %s5292_s28 }
 0x4c2   :  { %16 = sbr.rel (!%p14_p2) target bundleno = 2 (0x2), region = 163 }

</bundles_post_ra>
